<compile_context>
chip_gen: v5e
topology: v5e:2x2
jax: 0.10.0
libtpu: 0.0.40
codegen_flags: <defaults>
</compile_context>

<pallas_src>
from functools import partial

import numpy as np
import jax
import jax.numpy as jnp
from jax import lax
from jax.experimental import pallas as pl
from jax.experimental.pallas import tpu as pltpu


# Padded activation buffers place logical padded column j at buffer column j + 7, so the
# interior pooled *store* starts at column 8 (sublane-aligned) while the conv tap *reads*
# use cheap offsets 7/8/9.  Buffer columns < 7 and > Wo+8 are never read.
_W_OFF = 7


# --------------------------- in-kernel building blocks ---------------------------

def _grouped_conv3x3(src_ref, w_ref, acc_ref, *, w_off):
    """acc <- 3x3 SAME conv of src; taps grouped along K per dy (3 matmuls, not 9).

    src_ref : (nb, Ho+2, Wbuf, Cin)  zero-halo'd input (halo cols at w_off / w_off+1+Wo)
    w_ref   : (3, 3*Cin, Cout)       weights grouped per dy, row order (dx, cin)
    acc_ref : (nb, Ho, Wo, Cout)     f32 accumulator (1 store + 2 RMW passes)
    """
    nb, Ho, Wo, Cout = acc_ref.shape
    Cin = src_ref.shape[-1]
    M = nb * Ho * Wo
    for dy in range(3):
        taps = [src_ref[:, dy:dy + Ho, w_off + dx:w_off + dx + Wo, :].reshape(M, Cin)
                for dx in range(3)]
        lhs = jnp.concatenate(taps, axis=-1).astype(w_ref.dtype)      # (M, 3*Cin)
        contrib = jnp.dot(lhs, w_ref[dy], preferred_element_type=jnp.float32)
        contrib = contrib.reshape(nb, Ho, Wo, Cout)
        if dy == 0:
            acc_ref[...] = contrib
        else:
            acc_ref[...] += contrib


def _relu_pool_store(acc_ref, b_ref, dst_ref, *, interior):
    """dst <- maxpool2x2(relu(acc + bias)).  Bias/ReLU applied AFTER the max (monotone,
    identical result, 4x less data touched).

    If `interior`, dst is the next conv's zero-halo'd VMEM buffer: only the halo strips
    (rows 0 / Hh+1, cols _W_OFF / 8+Wh) are zeroed each step — the interior is fully
    overwritten by the pooled store, and the never-read slack columns stay untouched.
    """
    nb, Ho, Wo, C = acc_ref.shape
    Hh, Wh = Ho // 2, Wo // 2
    p00 = acc_ref[:, pl.ds(0, Hh, stride=2), pl.ds(0, Wh, stride=2), :]
    p01 = acc_ref[:, pl.ds(0, Hh, stride=2), pl.ds(1, Wh, stride=2), :]
    p10 = acc_ref[:, pl.ds(1, Hh, stride=2), pl.ds(0, Wh, stride=2), :]
    p11 = acc_ref[:, pl.ds(1, Hh, stride=2), pl.ds(1, Wh, stride=2), :]
    pooled = jnp.maximum(jnp.maximum(p00, p01), jnp.maximum(p10, p11))
    pooled = jnp.maximum(pooled + b_ref[...], 0.0).astype(dst_ref.dtype)
    if interior:
        wbuf = dst_ref.shape[2]
        zrow = jnp.zeros((nb, 1, wbuf, C), dst_ref.dtype)
        zcol = jnp.zeros((nb, Hh + 2, 1, C), dst_ref.dtype)
        dst_ref[:, 0:1, :, :] = zrow                         # top halo row
        dst_ref[:, Hh + 1:Hh + 2, :, :] = zrow               # bottom halo row
        dst_ref[:, :, _W_OFF:_W_OFF + 1, :] = zcol           # left halo column
        dst_ref[:, :, 8 + Wh:9 + Wh, :] = zcol               # right halo column
        dst_ref[:, 1:1 + Hh, 8:8 + Wh, :] = pooled           # interior (aligned at col 8)
    else:
        dst_ref[...] = pooled


def _encoder_kernel(xt_ref, w1_ref, b1_ref, w2_ref, b2_ref, w3_ref, b3_ref,
                    w4_ref, b4_ref, out_ref,
                    acc1, p2, acc2, p3, acc3, p4):
    nb, H, W, K1 = xt_ref.shape
    C1 = acc1.shape[-1]

    # enc1: SAME conv already im2col'd into channels -> ONE matmul (nb*H*W, K1)@(K1, C1).
    lhs1 = xt_ref[...].reshape(nb * H * W, K1)
    acc1[...] = jnp.dot(lhs1, w1_ref[...],
                        preferred_element_type=jnp.float32).reshape(nb, H, W, C1)
    _relu_pool_store(acc1, b1_ref, p2, interior=True)

    # enc2 / enc3: SAME convs, 3 K-grouped matmuls each, pooled into the next buffer.
    _grouped_conv3x3(p2, w2_ref, acc2, w_off=_W_OFF)
    _relu_pool_store(acc2, b2_ref, p3, interior=True)
    _grouped_conv3x3(p3, w3_ref, acc3, w_off=_W_OFF)
    _relu_pool_store(acc3, b3_ref, p4, interior=False)

    # enc4: VALID conv, 3 K-grouped matmuls accumulated as a value, ONE block store.
    _, Ho4, Wo4, C4 = out_ref.shape
    C3 = p4.shape[-1]
    M4 = nb * Ho4 * Wo4
    acc = None
    for dy in range(3):
        taps = [p4[:, dy:dy + Ho4, dx:dx + Wo4, :].reshape(M4, C3) for dx in range(3)]
        lhs = jnp.concatenate(taps, axis=-1).astype(w4_ref.dtype)     # (M4, 3*C3)
        c = jnp.dot(lhs, w4_ref[dy], preferred_element_type=jnp.float32)
        acc = c if acc is None else acc + c
    out = jnp.maximum(acc + b4_ref[...], 0.0)
    out_ref[...] = out.reshape(nb, Ho4, Wo4, C4)


# ----------------------------------- wrapper -----------------------------------

def _const_spec(shape):
    nd = len(shape)
    # TODO(synk): pipeline_mode=pl.Buffered(1) would drop the redundant second weight
    # buffer (constant index map); left at the default double-buffering for safety.
    return pl.BlockSpec(shape, lambda n, _d=nd: (0,) * _d)


def _batch_spec(shape):
    nr = len(shape) - 1
    return pl.BlockSpec(shape, lambda n, _r=nr: (n,) + (0,) * _r)


@partial(jax.jit, static_argnames=("compute_dtype", "images_per_step"))
def encoder_forward(x_nchw, params, *, compute_dtype=jnp.bfloat16, images_per_step=1):
    """x_nchw: (N, Cin, H, W) f32.  params: 4x (w (3,3,Cin,Cout) HWIO, b (Cout,)).

    compute_dtype   : dtype of the MXU operands (accumulation is always f32).
    images_per_step : images folded into one grid step (amortizes per-step overhead on
                      single-TC v5e/v6e; keep >= 2 grid steps so v7x megacore stays fed).
    """
    (w1, b1), (w2, b2), (w3, b3), (w4, b4) = params
    N, Cin, H, W = x_nchw.shape
    nb = images_per_step
    assert N % nb == 0, "batch must be divisible by images_per_step"
    assert H % 8 == 0 and W % 8 == 0 and H >= 24 and W >= 24, \
        "need H, W multiples of 8 and >= 24"

    C1, C2, C3, C4 = w1.shape[3], w2.shape[3], w3.shape[3], w4.shape[3]
    H2, W2, H4, W4, H8, W8 = H // 2, W // 2, H // 4, W // 4, H // 8, W // 8
    Ho, Wo = H8 - 2, W8 - 2                       # final VALID conv output size

    # Layer-1 im2col packed into channels: the 9 (dy,dx) taps of the SAME conv become
    # 9*Cin channels (padded to a multiple of 8), so enc1 is one matmul and the channel
    # padding carries real data instead of zeros.
    x = jnp.transpose(x_nchw, (0, 2, 3, 1))                           # NHWC
    xp = jnp.pad(x, ((0, 0), (1, 1), (1, 1), (0, 0)))
    xt = jnp.concatenate([xp[:, dy:dy + H, dx:dx + W, :]
                          for dy in range(3) for dx in range(3)], axis=-1)
    K1 = 9 * Cin
    K1p = ((K1 + 7) // 8) * 8
    xt = jnp.pad(xt, ((0, 0), (0, 0), (0, 0), (0, K1p - K1))).astype(compute_dtype)

    # Weights: enc1 flattened to (K1p, C1); enc2..enc4 grouped per dy as (3, 3*Cin, Cout)
    # with row order (dx, cin), matching the in-kernel tap concatenation.  Biases (1, C).
    w1f = jnp.pad(w1.reshape(K1, C1), ((0, K1p - K1), (0, 0))).astype(compute_dtype)
    w2g = w2.reshape(3, 3 * C1, C2).astype(compute_dtype)
    w3g = w3.reshape(3, 3 * C2, C3).astype(compute_dtype)
    w4g = w4.reshape(3, 3 * C3, C4).astype(compute_dtype)
    b1r, b2r, b3r, b4r = (b.reshape(1, -1).astype(jnp.float32)
                          for b in (b1, b2, b3, b4))

    # --- VMEM budget guard (fused scratch scales ~linearly with nb*H*W) ---
    cdt_b = jnp.dtype(compute_dtype).itemsize
    scratch_bytes = 4 * nb * (
        H * W * C1 + (H2 + 2) * (W2 + 16) * C1 + H2 * W2 * C2 +
        (H4 + 2) * (W4 + 16) * C2 + H4 * W4 * C3 + H8 * W8 * C3)
    io_bytes = 2 * nb * (H * W * K1p * cdt_b + Ho * Wo * C4 * 4)      # double-buffered
    w_bytes = 2 * cdt_b * (K1p * C1 + 9 * C1 * C2 + 9 * C2 * C3 + 9 * C3 * C4)
    vmem_est = scratch_bytes + io_bytes + w_bytes
    # TODO(synk): add an H-strip grid axis (1-row halo overlap) instead of failing here
    # once inputs outgrow VMEM (v7x: 64 MiB physical / 32 MiB default scoped limit).
    assert vmem_est < 48 * 1024 * 1024, f"fused encoder needs ~{vmem_est} B of VMEM"
    vmem_limit = (min(2 * vmem_est, 100 * 1024 * 1024)
                  if vmem_est > 16 * 1024 * 1024 else None)

    out_nhwc = pl.pallas_call(
        _encoder_kernel,
        out_shape=jax.ShapeDtypeStruct((N, Ho, Wo, C4), jnp.float32),
        grid_spec=pltpu.PrefetchScalarGridSpec(
            num_scalar_prefetch=0,
            grid=(N // nb,),                       # nb images per grid step
            in_specs=[
                _batch_spec((nb, H, W, K1p)),
                _const_spec((K1p, C1)), _const_spec((1, C1)),
                _const_spec((3, 3 * C1, C2)), _const_spec((1, C2)),
                _const_spec((3, 3 * C2, C3)), _const_spec((1, C3)),
                _const_spec((3, 3 * C3, C4)), _const_spec((1, C4)),
            ],
            out_specs=_batch_spec((nb, Ho, Wo, C4)),
            scratch_shapes=[
                pltpu.VMEM((nb, H, W, C1), jnp.float32),             # acc1 (conv1 pre-pool)
                pltpu.VMEM((nb, H2 + 2, W2 + 16, C1), jnp.float32),  # p2: padded conv2 in
                pltpu.VMEM((nb, H2, W2, C2), jnp.float32),           # acc2
                pltpu.VMEM((nb, H4 + 2, W4 + 16, C2), jnp.float32),  # p3: padded conv3 in
                pltpu.VMEM((nb, H4, W4, C3), jnp.float32),           # acc3
                pltpu.VMEM((nb, H8, W8, C3), jnp.float32),           # p4: conv4 in (VALID)
            ],
        ),
        compiler_params=pltpu.CompilerParams(
            dimension_semantics=("parallel",),     # megacore: split batch across TCs
            vmem_limit_bytes=vmem_limit),
    )(xt, w1f, b1r, w2g, b2r, w3g, b3r, w4g, b4r)

    return jnp.transpose(out_nhwc, (0, 3, 1, 2))   # NHWC -> NCHW (match PyTorch)


# ---------------------------------- reference ----------------------------------

def encoder_reference(x_nchw, params):
    """Pure-JAX reference for correctness checking."""
    x = jnp.transpose(x_nchw, (0, 2, 3, 1))
    cfgs = [(params[0], 'SAME', True), (params[1], 'SAME', True),
            (params[2], 'SAME', True), (params[3], 'VALID', False)]
    for (w, b), pad, pool in cfgs:
        x = lax.conv_general_dilated(
            x, w, window_strides=(1, 1), padding=pad,
            dimension_numbers=('NHWC', 'HWIO', 'NHWC'),
            precision=lax.Precision.HIGHEST)
        x = jnp.maximum(x + b, 0.0)
        if pool:
            x = lax.reduce_window(x, -jnp.inf, lax.max,
                                  (1, 2, 2, 1), (1, 2, 2, 1), 'VALID')
    return jnp.transpose(x, (0, 3, 1, 2))


if __name__ == "__main__":
    key = jax.random.PRNGKey(0)
    k_x, k1, k2, k3, k4 = jax.random.split(key, 5)

    def init_conv(k, cin, cout):
        # Deterministic, PyTorch-style uniform(-1/sqrt(fan_in), 1/sqrt(fan_in)).
        kw, kb = jax.random.split(k)
        bound = 1.0 / float((cin * 9) ** 0.5)
        w = jax.random.uniform(kw, (3, 3, cin, cout), jnp.float32, -bound, bound)
        b = jax.random.uniform(kb, (cout,), jnp.float32, -bound, bound)
        return w, b

    params = (init_conv(k1, 1, 64),
              init_conv(k2, 64, 32),
              init_conv(k3, 32, 16),
              init_conv(k4, 16, 8))

    # NCHW input like the PyTorch module; spatial 32 so the final valid 3x3 conv
    # (after three 2x2 pools -> 4x4 feature map) produces a 2x2 output.
    x = jax.random.normal(k_x, (2, 1, 32, 32), dtype=jnp.float32)
    ref = encoder_reference(x, params)

    # Exact path (f32 MXU operands) — tight tolerance.
    out_f32 = jax.block_until_ready(
        encoder_forward(x, params, compute_dtype=jnp.float32))
    assert out_f32.shape == (2, 8, 2, 2), out_f32.shape
    np.testing.assert_allclose(np.asarray(out_f32), np.asarray(ref),
                               rtol=1e-3, atol=1e-3)

    # Default fast path (bf16 MXU operands, f32 accumulation) — bf16-appropriate tolerance.
    out_bf16 = jax.block_until_ready(encoder_forward(x, params))
    assert out_bf16.shape == (2, 8, 2, 2), out_bf16.shape
    np.testing.assert_allclose(np.asarray(out_bf16), np.asarray(ref),
                               rtol=2e-2, atol=2e-2)

    print("KERNEL_OK")
</pallas_src>

<mosaic_0001>
module attributes {stable_mosaic.version = 11 : i64} {
  func.func @_encoder_kernel(%arg0: i32, %arg1: memref<1x32x32x16xf32, #tpu.memory_space<vmem>>, %arg2: memref<16x64xf32, #tpu.memory_space<vmem>>, %arg3: memref<1x64xf32, #tpu.memory_space<vmem>>, %arg4: memref<3x192x32xf32, #tpu.memory_space<vmem>>, %arg5: memref<1x32xf32, #tpu.memory_space<vmem>>, %arg6: memref<3x96x16xf32, #tpu.memory_space<vmem>>, %arg7: memref<1x16xf32, #tpu.memory_space<vmem>>, %arg8: memref<3x48x8xf32, #tpu.memory_space<vmem>>, %arg9: memref<1x8xf32, #tpu.memory_space<vmem>>, %arg10: memref<1x2x2x8xf32, #tpu.memory_space<vmem>>, %arg11: memref<1x32x32x64xf32, #tpu.memory_space<vmem>>, %arg12: memref<1x18x32x64xf32, #tpu.memory_space<vmem>>, %arg13: memref<1x16x16x32xf32, #tpu.memory_space<vmem>>, %arg14: memref<1x10x24x32xf32, #tpu.memory_space<vmem>>, %arg15: memref<1x8x8x16xf32, #tpu.memory_space<vmem>>, %arg16: memref<1x4x4x16xf32, #tpu.memory_space<vmem>>) attributes {dimension_semantics = [#tpu.dimension_semantics<parallel>], iteration_bounds = array<i64: 2>, scalar_prefetch = 0 : i64, scratch_operands = 6 : i64, tpu.core_type = #tpu.core_type<tc>, window_params = [{transform_indices = @transform_0, window_bounds = array<i64: 1, 32, 32, 16>}, {pipeline_mode = #tpu.pipeline_mode<synchronous>, transform_indices = @transform_1, window_bounds = array<i64: 16, 64>}, {pipeline_mode = #tpu.pipeline_mode<synchronous>, transform_indices = @transform_2, window_bounds = array<i64: 1, 64>}, {pipeline_mode = #tpu.pipeline_mode<synchronous>, transform_indices = @transform_3, window_bounds = array<i64: 3, 192, 32>}, {pipeline_mode = #tpu.pipeline_mode<synchronous>, transform_indices = @transform_4, window_bounds = array<i64: 1, 32>}, {pipeline_mode = #tpu.pipeline_mode<synchronous>, transform_indices = @transform_5, window_bounds = array<i64: 3, 96, 16>}, {pipeline_mode = #tpu.pipeline_mode<synchronous>, transform_indices = @transform_6, window_bounds = array<i64: 1, 16>}, {pipeline_mode = #tpu.pipeline_mode<synchronous>, transform_indices = @transform_7, window_bounds = array<i64: 3, 48, 8>}, {pipeline_mode = #tpu.pipeline_mode<synchronous>, transform_indices = @transform_8, window_bounds = array<i64: 1, 8>}, {transform_indices = @transform_9, window_bounds = array<i64: 1, 2, 2, 8>}]} {
    %c0 = arith.constant 0 : index
    %c0_0 = arith.constant 0 : index
    %c0_1 = arith.constant 0 : index
    %c0_2 = arith.constant 0 : index
    %0 = vector.load %arg1[%c0, %c0_0, %c0_1, %c0_2] : memref<1x32x32x16xf32, #tpu.memory_space<vmem>>, vector<1x32x32x16xf32>
    %1 = vector.shape_cast %0 : vector<1x32x32x16xf32> to vector<1024x16xf32>
    %c0_3 = arith.constant 0 : index
    %c0_4 = arith.constant 0 : index
    %2 = vector.load %arg2[%c0_3, %c0_4] : memref<16x64xf32, #tpu.memory_space<vmem>>, vector<16x64xf32>
    %cst = arith.constant dense<0.000000e+00> : vector<1024x64xf32>
    %3 = tpu.matmul %1, %2, %cst {dimension_numbers = #tpu.dot_dimension_numbers<[1], [0], [0], [1], [0, 0, 1, 1], [], []>} : vector<1024x16xf32>, vector<16x64xf32>, vector<1024x64xf32> -> vector<1024x64xf32>
    %4 = vector.shape_cast %3 : vector<1024x64xf32> to vector<1x32x32x64xf32>
    %c0_5 = arith.constant 0 : index
    %c0_6 = arith.constant 0 : index
    %c0_7 = arith.constant 0 : index
    %c0_8 = arith.constant 0 : index
    %5 = vector.load %arg11[%c0_5, %c0_6, %c0_7, %c0_8] : memref<1x32x32x64xf32, #tpu.memory_space<vmem>>, vector<1x32x32x64xf32>
    tpu.vector_store %arg11[%c0_5, %c0_6, %c0_7, %c0_8], %4 {strides = array<i32>} : memref<1x32x32x64xf32, #tpu.memory_space<vmem>>, vector<1x32x32x64xf32>,
    %c0_9 = arith.constant 0 : index
    %c0_10 = arith.constant 0 : index
    %c0_11 = arith.constant 0 : index
    %c0_12 = arith.constant 0 : index
    %6 = tpu.strided_load %arg11[%c0_9, %c0_10, %c0_11, %c0_12] {strides = array<i32: 1, 2, 2, 1>} : memref<1x32x32x64xf32, #tpu.memory_space<vmem>>, vector<1x16x16x64xf32>
    %c0_13 = arith.constant 0 : index
    %c0_14 = arith.constant 0 : index
    %c1 = arith.constant 1 : index
    %c0_15 = arith.constant 0 : index
    %7 = tpu.strided_load %arg11[%c0_13, %c0_14, %c1, %c0_15] {strides = array<i32: 1, 2, 2, 1>} : memref<1x32x32x64xf32, #tpu.memory_space<vmem>>, vector<1x16x16x64xf32>
    %c0_16 = arith.constant 0 : index
    %c1_17 = arith.constant 1 : index
    %c0_18 = arith.constant 0 : index
    %c0_19 = arith.constant 0 : index
    %8 = tpu.strided_load %arg11[%c0_16, %c1_17, %c0_18, %c0_19] {strides = array<i32: 1, 2, 2, 1>} : memref<1x32x32x64xf32, #tpu.memory_space<vmem>>, vector<1x16x16x64xf32>
    %c0_20 = arith.constant 0 : index
    %c1_21 = arith.constant 1 : index
    %c1_22 = arith.constant 1 : index
    %c0_23 = arith.constant 0 : index
    %9 = tpu.strided_load %arg11[%c0_20, %c1_21, %c1_22, %c0_23] {strides = array<i32: 1, 2, 2, 1>} : memref<1x32x32x64xf32, #tpu.memory_space<vmem>>, vector<1x16x16x64xf32>
    %10 = arith.maximumf %6, %7 : vector<1x16x16x64xf32>
    %11 = arith.maximumf %8, %9 : vector<1x16x16x64xf32>
    %12 = arith.maximumf %10, %11 : vector<1x16x16x64xf32>
    %c0_24 = arith.constant 0 : index
    %c0_25 = arith.constant 0 : index
    %13 = vector.load %arg3[%c0_24, %c0_25] : memref<1x64xf32, #tpu.memory_space<vmem>>, vector<1x64xf32>
    %14 = vector.shape_cast %13 : vector<1x64xf32> to vector<1x1x1x64xf32>
    %15 = vector.broadcast %14 : vector<1x1x1x64xf32> to vector<1x16x16x64xf32>
    %16 = arith.addf %12, %15 : vector<1x16x16x64xf32>
    %cst_26 = arith.constant 0.000000e+00 : f32
    %17 = vector.broadcast %cst_26 : f32 to vector<1x16x16x64xf32>
    %18 = arith.maximumf %16, %17 : vector<1x16x16x64xf32>
    %cst_27 = arith.constant 0.000000e+00 : f32
    %19 = vector.broadcast %cst_27 : f32 to vector<1x1x32x64xf32>
    %cst_28 = arith.constant 0.000000e+00 : f32
    %20 = vector.broadcast %cst_28 : f32 to vector<1x18x1x64xf32>
    %c0_29 = arith.constant 0 : index
    %c0_30 = arith.constant 0 : index
    %c0_31 = arith.constant 0 : index
    %c0_32 = arith.constant 0 : index
    %21 = vector.load %arg12[%c0_29, %c0_30, %c0_31, %c0_32] : memref<1x18x32x64xf32, #tpu.memory_space<vmem>>, vector<1x1x32x64xf32>
    tpu.vector_store %arg12[%c0_29, %c0_30, %c0_31, %c0_32], %19 {strides = array<i32>} : memref<1x18x32x64xf32, #tpu.memory_space<vmem>>, vector<1x1x32x64xf32>,
    %c0_33 = arith.constant 0 : index
    %c17 = arith.constant 17 : index
    %c0_34 = arith.constant 0 : index
    %c0_35 = arith.constant 0 : index
    %22 = vector.load %arg12[%c0_33, %c17, %c0_34, %c0_35] : memref<1x18x32x64xf32, #tpu.memory_space<vmem>>, vector<1x1x32x64xf32>
    tpu.vector_store %arg12[%c0_33, %c17, %c0_34, %c0_35], %19 {strides = array<i32>} : memref<1x18x32x64xf32, #tpu.memory_space<vmem>>, vector<1x1x32x64xf32>,
    %c0_36 = arith.constant 0 : index
    %c0_37 = arith.constant 0 : index
    %c7 = arith.constant 7 : index
    %c0_38 = arith.constant 0 : index
    %23 = vector.load %arg12[%c0_36, %c0_37, %c7, %c0_38] : memref<1x18x32x64xf32, #tpu.memory_space<vmem>>, vector<1x18x1x64xf32>
    tpu.vector_store %arg12[%c0_36, %c0_37, %c7, %c0_38], %20 {strides = array<i32>} : memref<1x18x32x64xf32, #tpu.memory_space<vmem>>, vector<1x18x1x64xf32>,
    %c0_39 = arith.constant 0 : index
    %c0_40 = arith.constant 0 : index
    %c24 = arith.constant 24 : index
    %c0_41 = arith.constant 0 : index
    %24 = vector.load %arg12[%c0_39, %c0_40, %c24, %c0_41] : memref<1x18x32x64xf32, #tpu.memory_space<vmem>>, vector<1x18x1x64xf32>
    tpu.vector_store %arg12[%c0_39, %c0_40, %c24, %c0_41], %20 {strides = array<i32>} : memref<1x18x32x64xf32, #tpu.memory_space<vmem>>, vector<1x18x1x64xf32>,
    %c0_42 = arith.constant 0 : index
    %c1_43 = arith.constant 1 : index
    %c8 = arith.constant 8 : index
    %c0_44 = arith.constant 0 : index
    %25 = vector.load %arg12[%c0_42, %c1_43, %c8, %c0_44] : memref<1x18x32x64xf32, #tpu.memory_space<vmem>>, vector<1x16x16x64xf32>
    tpu.vector_store %arg12[%c0_42, %c1_43, %c8, %c0_44], %18 {strides = array<i32>} : memref<1x18x32x64xf32, #tpu.memory_space<vmem>>, vector<1x16x16x64xf32>,
    %c0_45 = arith.constant 0 : index
    %c0_46 = arith.constant 0 : index
    %c7_47 = arith.constant 7 : index
    %c0_48 = arith.constant 0 : index
    %26 = vector.load %arg12[%c0_45, %c0_46, %c7_47, %c0_48] : memref<1x18x32x64xf32, #tpu.memory_space<vmem>>, vector<1x16x16x64xf32>
    %27 = vector.shape_cast %26 : vector<1x16x16x64xf32> to vector<256x64xf32>
    %c0_49 = arith.constant 0 : index
    %c0_50 = arith.constant 0 : index
    %c8_51 = arith.constant 8 : index
    %c0_52 = arith.constant 0 : index
    %28 = vector.load %arg12[%c0_49, %c0_50, %c8_51, %c0_52] : memref<1x18x32x64xf32, #tpu.memory_space<vmem>>, vector<1x16x16x64xf32>
    %29 = vector.shape_cast %28 : vector<1x16x16x64xf32> to vector<256x64xf32>
    %c0_53 = arith.constant 0 : index
    %c0_54 = arith.constant 0 : index
    %c9 = arith.constant 9 : index
    %c0_55 = arith.constant 0 : index
    %30 = vector.load %arg12[%c0_53, %c0_54, %c9, %c0_55] : memref<1x18x32x64xf32, #tpu.memory_space<vmem>>, vector<1x16x16x64xf32>
    %31 = vector.shape_cast %30 : vector<1x16x16x64xf32> to vector<256x64xf32>
    %32 = tpu.concatenate %27, %29, %31 in 1 : vector<256x64xf32>, vector<256x64xf32>, vector<256x64xf32> -> vector<256x192xf32>
    %c0_56 = arith.constant 0 : index
    %c0_57 = arith.constant 0 : index
    %c0_58 = arith.constant 0 : index
    %33 = vector.load %arg4[%c0_56, %c0_57, %c0_58] : memref<3x192x32xf32, #tpu.memory_space<vmem>>, vector<1x192x32xf32>
    %34 = vector.shape_cast %33 : vector<1x192x32xf32> to vector<192x32xf32>
    %cst_59 = arith.constant dense<0.000000e+00> : vector<256x32xf32>
    %35 = tpu.matmul %32, %34, %cst_59 {dimension_numbers = #tpu.dot_dimension_numbers<[1], [0], [0], [1], [0, 0, 1, 1], [], []>} : vector<256x192xf32>, vector<192x32xf32>, vector<256x32xf32> -> vector<256x32xf32>
    %36 = vector.shape_cast %35 : vector<256x32xf32> to vector<1x16x16x32xf32>
    %c0_60 = arith.constant 0 : index
    %c0_61 = arith.constant 0 : index
    %c0_62 = arith.constant 0 : index
    %c0_63 = arith.constant 0 : index
    %37 = vector.load %arg13[%c0_60, %c0_61, %c0_62, %c0_63] : memref<1x16x16x32xf32, #tpu.memory_space<vmem>>, vector<1x16x16x32xf32>
    tpu.vector_store %arg13[%c0_60, %c0_61, %c0_62, %c0_63], %36 {strides = array<i32>} : memref<1x16x16x32xf32, #tpu.memory_space<vmem>>, vector<1x16x16x32xf32>,
    %c0_64 = arith.constant 0 : index
    %c1_65 = arith.constant 1 : index
    %c7_66 = arith.constant 7 : index
    %c0_67 = arith.constant 0 : index
    %38 = vector.load %arg12[%c0_64, %c1_65, %c7_66, %c0_67] : memref<1x18x32x64xf32, #tpu.memory_space<vmem>>, vector<1x16x16x64xf32>
    %39 = vector.shape_cast %38 : vector<1x16x16x64xf32> to vector<256x64xf32>
    %c0_68 = arith.constant 0 : index
    %c1_69 = arith.constant 1 : index
    %c8_70 = arith.constant 8 : index
    %c0_71 = arith.constant 0 : index
    %40 = vector.load %arg12[%c0_68, %c1_69, %c8_70, %c0_71] : memref<1x18x32x64xf32, #tpu.memory_space<vmem>>, vector<1x16x16x64xf32>
    %41 = vector.shape_cast %40 : vector<1x16x16x64xf32> to vector<256x64xf32>
    %c0_72 = arith.constant 0 : index
    %c1_73 = arith.constant 1 : index
    %c9_74 = arith.constant 9 : index
    %c0_75 = arith.constant 0 : index
    %42 = vector.load %arg12[%c0_72, %c1_73, %c9_74, %c0_75] : memref<1x18x32x64xf32, #tpu.memory_space<vmem>>, vector<1x16x16x64xf32>
    %43 = vector.shape_cast %42 : vector<1x16x16x64xf32> to vector<256x64xf32>
    %44 = tpu.concatenate %39, %41, %43 in 1 : vector<256x64xf32>, vector<256x64xf32>, vector<256x64xf32> -> vector<256x192xf32>
    %c1_76 = arith.constant 1 : index
    %c0_77 = arith.constant 0 : index
    %c0_78 = arith.constant 0 : index
    %45 = vector.load %arg4[%c1_76, %c0_77, %c0_78] : memref<3x192x32xf32, #tpu.memory_space<vmem>>, vector<1x192x32xf32>
    %46 = vector.shape_cast %45 : vector<1x192x32xf32> to vector<192x32xf32>
    %cst_79 = arith.constant dense<0.000000e+00> : vector<256x32xf32>
    %47 = tpu.matmul %44, %46, %cst_79 {dimension_numbers = #tpu.dot_dimension_numbers<[1], [0], [0], [1], [0, 0, 1, 1], [], []>} : vector<256x192xf32>, vector<192x32xf32>, vector<256x32xf32> -> vector<256x32xf32>
    %48 = vector.shape_cast %47 : vector<256x32xf32> to vector<1x16x16x32xf32>
    %c0_80 = arith.constant 0 : index
    %c0_81 = arith.constant 0 : index
    %c0_82 = arith.constant 0 : index
    %c0_83 = arith.constant 0 : index
    %49 = vector.load %arg13[%c0_80, %c0_81, %c0_82, %c0_83] : memref<1x16x16x32xf32, #tpu.memory_space<vmem>>, vector<1x16x16x32xf32>
    %50 = arith.addf %49, %48 : vector<1x16x16x32xf32>
    %c0_84 = arith.constant 0 : index
    %c0_85 = arith.constant 0 : index
    %c0_86 = arith.constant 0 : index
    %c0_87 = arith.constant 0 : index
    %51 = vector.load %arg13[%c0_84, %c0_85, %c0_86, %c0_87] : memref<1x16x16x32xf32, #tpu.memory_space<vmem>>, vector<1x16x16x32xf32>
    tpu.vector_store %arg13[%c0_84, %c0_85, %c0_86, %c0_87], %50 {strides = array<i32>} : memref<1x16x16x32xf32, #tpu.memory_space<vmem>>, vector<1x16x16x32xf32>,
    %c0_88 = arith.constant 0 : index
    %c2 = arith.constant 2 : index
    %c7_89 = arith.constant 7 : index
    %c0_90 = arith.constant 0 : index
    %52 = vector.load %arg12[%c0_88, %c2, %c7_89, %c0_90] : memref<1x18x32x64xf32, #tpu.memory_space<vmem>>, vector<1x16x16x64xf32>
    %53 = vector.shape_cast %52 : vector<1x16x16x64xf32> to vector<256x64xf32>
    %c0_91 = arith.constant 0 : index
    %c2_92 = arith.constant 2 : index
    %c8_93 = arith.constant 8 : index
    %c0_94 = arith.constant 0 : index
    %54 = vector.load %arg12[%c0_91, %c2_92, %c8_93, %c0_94] : memref<1x18x32x64xf32, #tpu.memory_space<vmem>>, vector<1x16x16x64xf32>
    %55 = vector.shape_cast %54 : vector<1x16x16x64xf32> to vector<256x64xf32>
    %c0_95 = arith.constant 0 : index
    %c2_96 = arith.constant 2 : index
    %c9_97 = arith.constant 9 : index
    %c0_98 = arith.constant 0 : index
    %56 = vector.load %arg12[%c0_95, %c2_96, %c9_97, %c0_98] : memref<1x18x32x64xf32, #tpu.memory_space<vmem>>, vector<1x16x16x64xf32>
    %57 = vector.shape_cast %56 : vector<1x16x16x64xf32> to vector<256x64xf32>
    %58 = tpu.concatenate %53, %55, %57 in 1 : vector<256x64xf32>, vector<256x64xf32>, vector<256x64xf32> -> vector<256x192xf32>
    %c2_99 = arith.constant 2 : index
    %c0_100 = arith.constant 0 : index
    %c0_101 = arith.constant 0 : index
    %59 = vector.load %arg4[%c2_99, %c0_100, %c0_101] : memref<3x192x32xf32, #tpu.memory_space<vmem>>, vector<1x192x32xf32>
    %60 = vector.shape_cast %59 : vector<1x192x32xf32> to vector<192x32xf32>
    %cst_102 = arith.constant dense<0.000000e+00> : vector<256x32xf32>
    %61 = tpu.matmul %58, %60, %cst_102 {dimension_numbers = #tpu.dot_dimension_numbers<[1], [0], [0], [1], [0, 0, 1, 1], [], []>} : vector<256x192xf32>, vector<192x32xf32>, vector<256x32xf32> -> vector<256x32xf32>
    %62 = vector.shape_cast %61 : vector<256x32xf32> to vector<1x16x16x32xf32>
    %c0_103 = arith.constant 0 : index
    %c0_104 = arith.constant 0 : index
    %c0_105 = arith.constant 0 : index
    %c0_106 = arith.constant 0 : index
    %63 = vector.load %arg13[%c0_103, %c0_104, %c0_105, %c0_106] : memref<1x16x16x32xf32, #tpu.memory_space<vmem>>, vector<1x16x16x32xf32>
    %64 = arith.addf %63, %62 : vector<1x16x16x32xf32>
    %c0_107 = arith.constant 0 : index
    %c0_108 = arith.constant 0 : index
    %c0_109 = arith.constant 0 : index
    %c0_110 = arith.constant 0 : index
    %65 = vector.load %arg13[%c0_107, %c0_108, %c0_109, %c0_110] : memref<1x16x16x32xf32, #tpu.memory_space<vmem>>, vector<1x16x16x32xf32>
    tpu.vector_store %arg13[%c0_107, %c0_108, %c0_109, %c0_110], %64 {strides = array<i32>} : memref<1x16x16x32xf32, #tpu.memory_space<vmem>>, vector<1x16x16x32xf32>,
    %c0_111 = arith.constant 0 : index
    %c0_112 = arith.constant 0 : index
    %c0_113 = arith.constant 0 : index
    %c0_114 = arith.constant 0 : index
    %66 = tpu.strided_load %arg13[%c0_111, %c0_112, %c0_113, %c0_114] {strides = array<i32: 1, 2, 2, 1>} : memref<1x16x16x32xf32, #tpu.memory_space<vmem>>, vector<1x8x8x32xf32>
    %c0_115 = arith.constant 0 : index
    %c0_116 = arith.constant 0 : index
    %c1_117 = arith.constant 1 : index
    %c0_118 = arith.constant 0 : index
    %67 = tpu.strided_load %arg13[%c0_115, %c0_116, %c1_117, %c0_118] {strides = array<i32: 1, 2, 2, 1>} : memref<1x16x16x32xf32, #tpu.memory_space<vmem>>, vector<1x8x8x32xf32>
    %c0_119 = arith.constant 0 : index
    %c1_120 = arith.constant 1 : index
    %c0_121 = arith.constant 0 : index
    %c0_122 = arith.constant 0 : index
    %68 = tpu.strided_load %arg13[%c0_119, %c1_120, %c0_121, %c0_122] {strides = array<i32: 1, 2, 2, 1>} : memref<1x16x16x32xf32, #tpu.memory_space<vmem>>, vector<1x8x8x32xf32>
    %c0_123 = arith.constant 0 : index
    %c1_124 = arith.constant 1 : index
    %c1_125 = arith.constant 1 : index
    %c0_126 = arith.constant 0 : index
    %69 = tpu.strided_load %arg13[%c0_123, %c1_124, %c1_125, %c0_126] {strides = array<i32: 1, 2, 2, 1>} : memref<1x16x16x32xf32, #tpu.memory_space<vmem>>, vector<1x8x8x32xf32>
    %70 = arith.maximumf %66, %67 : vector<1x8x8x32xf32>
    %71 = arith.maximumf %68, %69 : vector<1x8x8x32xf32>
    %72 = arith.maximumf %70, %71 : vector<1x8x8x32xf32>
    %c0_127 = arith.constant 0 : index
    %c0_128 = arith.constant 0 : index
    %73 = vector.load %arg5[%c0_127, %c0_128] : memref<1x32xf32, #tpu.memory_space<vmem>>, vector<1x32xf32>
    %74 = vector.shape_cast %73 : vector<1x32xf32> to vector<1x1x1x32xf32>
    %75 = vector.broadcast %74 : vector<1x1x1x32xf32> to vector<1x8x8x32xf32>
    %76 = arith.addf %72, %75 : vector<1x8x8x32xf32>
    %cst_129 = arith.constant 0.000000e+00 : f32
    %77 = vector.broadcast %cst_129 : f32 to vector<1x8x8x32xf32>
    %78 = arith.maximumf %76, %77 : vector<1x8x8x32xf32>
    %cst_130 = arith.constant 0.000000e+00 : f32
    %79 = vector.broadcast %cst_130 : f32 to vector<1x1x24x32xf32>
    %cst_131 = arith.constant 0.000000e+00 : f32
    %80 = vector.broadcast %cst_131 : f32 to vector<1x10x1x32xf32>
    %c0_132 = arith.constant 0 : index
    %c0_133 = arith.constant 0 : index
    %c0_134 = arith.constant 0 : index
    %c0_135 = arith.constant 0 : index
    %81 = vector.load %arg14[%c0_132, %c0_133, %c0_134, %c0_135] : memref<1x10x24x32xf32, #tpu.memory_space<vmem>>, vector<1x1x24x32xf32>
    tpu.vector_store %arg14[%c0_132, %c0_133, %c0_134, %c0_135], %79 {strides = array<i32>} : memref<1x10x24x32xf32, #tpu.memory_space<vmem>>, vector<1x1x24x32xf32>,
    %c0_136 = arith.constant 0 : index
    %c9_137 = arith.constant 9 : index
    %c0_138 = arith.constant 0 : index
    %c0_139 = arith.constant 0 : index
    %82 = vector.load %arg14[%c0_136, %c9_137, %c0_138, %c0_139] : memref<1x10x24x32xf32, #tpu.memory_space<vmem>>, vector<1x1x24x32xf32>
    tpu.vector_store %arg14[%c0_136, %c9_137, %c0_138, %c0_139], %79 {strides = array<i32>} : memref<1x10x24x32xf32, #tpu.memory_space<vmem>>, vector<1x1x24x32xf32>,
    %c0_140 = arith.constant 0 : index
    %c0_141 = arith.constant 0 : index
    %c7_142 = arith.constant 7 : index
    %c0_143 = arith.constant 0 : index
    %83 = vector.load %arg14[%c0_140, %c0_141, %c7_142, %c0_143] : memref<1x10x24x32xf32, #tpu.memory_space<vmem>>, vector<1x10x1x32xf32>
    tpu.vector_store %arg14[%c0_140, %c0_141, %c7_142, %c0_143], %80 {strides = array<i32>} : memref<1x10x24x32xf32, #tpu.memory_space<vmem>>, vector<1x10x1x32xf32>,
    %c0_144 = arith.constant 0 : index
    %c0_145 = arith.constant 0 : index
    %c16 = arith.constant 16 : index
    %c0_146 = arith.constant 0 : index
    %84 = vector.load %arg14[%c0_144, %c0_145, %c16, %c0_146] : memref<1x10x24x32xf32, #tpu.memory_space<vmem>>, vector<1x10x1x32xf32>
    tpu.vector_store %arg14[%c0_144, %c0_145, %c16, %c0_146], %80 {strides = array<i32>} : memref<1x10x24x32xf32, #tpu.memory_space<vmem>>, vector<1x10x1x32xf32>,
    %c0_147 = arith.constant 0 : index
    %c1_148 = arith.constant 1 : index
    %c8_149 = arith.constant 8 : index
    %c0_150 = arith.constant 0 : index
    %85 = vector.load %arg14[%c0_147, %c1_148, %c8_149, %c0_150] : memref<1x10x24x32xf32, #tpu.memory_space<vmem>>, vector<1x8x8x32xf32>
    tpu.vector_store %arg14[%c0_147, %c1_148, %c8_149, %c0_150], %78 {strides = array<i32>} : memref<1x10x24x32xf32, #tpu.memory_space<vmem>>, vector<1x8x8x32xf32>,
    %c0_151 = arith.constant 0 : index
    %c0_152 = arith.constant 0 : index
    %c7_153 = arith.constant 7 : index
    %c0_154 = arith.constant 0 : index
    %86 = vector.load %arg14[%c0_151, %c0_152, %c7_153, %c0_154] : memref<1x10x24x32xf32, #tpu.memory_space<vmem>>, vector<1x8x8x32xf32>
    %87 = vector.shape_cast %86 : vector<1x8x8x32xf32> to vector<64x32xf32>
    %c0_155 = arith.constant 0 : index
    %c0_156 = arith.constant 0 : index
    %c8_157 = arith.constant 8 : index
    %c0_158 = arith.constant 0 : index
    %88 = vector.load %arg14[%c0_155, %c0_156, %c8_157, %c0_158] : memref<1x10x24x32xf32, #tpu.memory_space<vmem>>, vector<1x8x8x32xf32>
    %89 = vector.shape_cast %88 : vector<1x8x8x32xf32> to vector<64x32xf32>
    %c0_159 = arith.constant 0 : index
    %c0_160 = arith.constant 0 : index
    %c9_161 = arith.constant 9 : index
    %c0_162 = arith.constant 0 : index
    %90 = vector.load %arg14[%c0_159, %c0_160, %c9_161, %c0_162] : memref<1x10x24x32xf32, #tpu.memory_space<vmem>>, vector<1x8x8x32xf32>
    %91 = vector.shape_cast %90 : vector<1x8x8x32xf32> to vector<64x32xf32>
    %92 = tpu.concatenate %87, %89, %91 in 1 : vector<64x32xf32>, vector<64x32xf32>, vector<64x32xf32> -> vector<64x96xf32>
    %c0_163 = arith.constant 0 : index
    %c0_164 = arith.constant 0 : index
    %c0_165 = arith.constant 0 : index
    %93 = vector.load %arg6[%c0_163, %c0_164, %c0_165] : memref<3x96x16xf32, #tpu.memory_space<vmem>>, vector<1x96x16xf32>
    %94 = vector.shape_cast %93 : vector<1x96x16xf32> to vector<96x16xf32>
    %cst_166 = arith.constant dense<0.000000e+00> : vector<64x16xf32>
    %95 = tpu.matmul %92, %94, %cst_166 {dimension_numbers = #tpu.dot_dimension_numbers<[1], [0], [0], [1], [0, 0, 1, 1], [], []>} : vector<64x96xf32>, vector<96x16xf32>, vector<64x16xf32> -> vector<64x16xf32>
    %96 = vector.shape_cast %95 : vector<64x16xf32> to vector<1x8x8x16xf32>
    %c0_167 = arith.constant 0 : index
    %c0_168 = arith.constant 0 : index
    %c0_169 = arith.constant 0 : index
    %c0_170 = arith.constant 0 : index
    %97 = vector.load %arg15[%c0_167, %c0_168, %c0_169, %c0_170] : memref<1x8x8x16xf32, #tpu.memory_space<vmem>>, vector<1x8x8x16xf32>
    tpu.vector_store %arg15[%c0_167, %c0_168, %c0_169, %c0_170], %96 {strides = array<i32>} : memref<1x8x8x16xf32, #tpu.memory_space<vmem>>, vector<1x8x8x16xf32>,
    %c0_171 = arith.constant 0 : index
    %c1_172 = arith.constant 1 : index
    %c7_173 = arith.constant 7 : index
    %c0_174 = arith.constant 0 : index
    %98 = vector.load %arg14[%c0_171, %c1_172, %c7_173, %c0_174] : memref<1x10x24x32xf32, #tpu.memory_space<vmem>>, vector<1x8x8x32xf32>
    %99 = vector.shape_cast %98 : vector<1x8x8x32xf32> to vector<64x32xf32>
    %c0_175 = arith.constant 0 : index
    %c1_176 = arith.constant 1 : index
    %c8_177 = arith.constant 8 : index
    %c0_178 = arith.constant 0 : index
    %100 = vector.load %arg14[%c0_175, %c1_176, %c8_177, %c0_178] : memref<1x10x24x32xf32, #tpu.memory_space<vmem>>, vector<1x8x8x32xf32>
    %101 = vector.shape_cast %100 : vector<1x8x8x32xf32> to vector<64x32xf32>
    %c0_179 = arith.constant 0 : index
    %c1_180 = arith.constant 1 : index
    %c9_181 = arith.constant 9 : index
    %c0_182 = arith.constant 0 : index
    %102 = vector.load %arg14[%c0_179, %c1_180, %c9_181, %c0_182] : memref<1x10x24x32xf32, #tpu.memory_space<vmem>>, vector<1x8x8x32xf32>
    %103 = vector.shape_cast %102 : vector<1x8x8x32xf32> to vector<64x32xf32>
    %104 = tpu.concatenate %99, %101, %103 in 1 : vector<64x32xf32>, vector<64x32xf32>, vector<64x32xf32> -> vector<64x96xf32>
    %c1_183 = arith.constant 1 : index
    %c0_184 = arith.constant 0 : index
    %c0_185 = arith.constant 0 : index
    %105 = vector.load %arg6[%c1_183, %c0_184, %c0_185] : memref<3x96x16xf32, #tpu.memory_space<vmem>>, vector<1x96x16xf32>
    %106 = vector.shape_cast %105 : vector<1x96x16xf32> to vector<96x16xf32>
    %cst_186 = arith.constant dense<0.000000e+00> : vector<64x16xf32>
    %107 = tpu.matmul %104, %106, %cst_186 {dimension_numbers = #tpu.dot_dimension_numbers<[1], [0], [0], [1], [0, 0, 1, 1], [], []>} : vector<64x96xf32>, vector<96x16xf32>, vector<64x16xf32> -> vector<64x16xf32>
    %108 = vector.shape_cast %107 : vector<64x16xf32> to vector<1x8x8x16xf32>
    %c0_187 = arith.constant 0 : index
    %c0_188 = arith.constant 0 : index
    %c0_189 = arith.constant 0 : index
    %c0_190 = arith.constant 0 : index
    %109 = vector.load %arg15[%c0_187, %c0_188, %c0_189, %c0_190] : memref<1x8x8x16xf32, #tpu.memory_space<vmem>>, vector<1x8x8x16xf32>
    %110 = arith.addf %109, %108 : vector<1x8x8x16xf32>
    %c0_191 = arith.constant 0 : index
    %c0_192 = arith.constant 0 : index
    %c0_193 = arith.constant 0 : index
    %c0_194 = arith.constant 0 : index
    %111 = vector.load %arg15[%c0_191, %c0_192, %c0_193, %c0_194] : memref<1x8x8x16xf32, #tpu.memory_space<vmem>>, vector<1x8x8x16xf32>
    tpu.vector_store %arg15[%c0_191, %c0_192, %c0_193, %c0_194], %110 {strides = array<i32>} : memref<1x8x8x16xf32, #tpu.memory_space<vmem>>, vector<1x8x8x16xf32>,
    %c0_195 = arith.constant 0 : index
    %c2_196 = arith.constant 2 : index
    %c7_197 = arith.constant 7 : index
    %c0_198 = arith.constant 0 : index
    %112 = vector.load %arg14[%c0_195, %c2_196, %c7_197, %c0_198] : memref<1x10x24x32xf32, #tpu.memory_space<vmem>>, vector<1x8x8x32xf32>
    %113 = vector.shape_cast %112 : vector<1x8x8x32xf32> to vector<64x32xf32>
    %c0_199 = arith.constant 0 : index
    %c2_200 = arith.constant 2 : index
    %c8_201 = arith.constant 8 : index
    %c0_202 = arith.constant 0 : index
    %114 = vector.load %arg14[%c0_199, %c2_200, %c8_201, %c0_202] : memref<1x10x24x32xf32, #tpu.memory_space<vmem>>, vector<1x8x8x32xf32>
    %115 = vector.shape_cast %114 : vector<1x8x8x32xf32> to vector<64x32xf32>
    %c0_203 = arith.constant 0 : index
    %c2_204 = arith.constant 2 : index
    %c9_205 = arith.constant 9 : index
    %c0_206 = arith.constant 0 : index
    %116 = vector.load %arg14[%c0_203, %c2_204, %c9_205, %c0_206] : memref<1x10x24x32xf32, #tpu.memory_space<vmem>>, vector<1x8x8x32xf32>
    %117 = vector.shape_cast %116 : vector<1x8x8x32xf32> to vector<64x32xf32>
    %118 = tpu.concatenate %113, %115, %117 in 1 : vector<64x32xf32>, vector<64x32xf32>, vector<64x32xf32> -> vector<64x96xf32>
    %c2_207 = arith.constant 2 : index
    %c0_208 = arith.constant 0 : index
    %c0_209 = arith.constant 0 : index
    %119 = vector.load %arg6[%c2_207, %c0_208, %c0_209] : memref<3x96x16xf32, #tpu.memory_space<vmem>>, vector<1x96x16xf32>
    %120 = vector.shape_cast %119 : vector<1x96x16xf32> to vector<96x16xf32>
    %cst_210 = arith.constant dense<0.000000e+00> : vector<64x16xf32>
    %121 = tpu.matmul %118, %120, %cst_210 {dimension_numbers = #tpu.dot_dimension_numbers<[1], [0], [0], [1], [0, 0, 1, 1], [], []>} : vector<64x96xf32>, vector<96x16xf32>, vector<64x16xf32> -> vector<64x16xf32>
    %122 = vector.shape_cast %121 : vector<64x16xf32> to vector<1x8x8x16xf32>
    %c0_211 = arith.constant 0 : index
    %c0_212 = arith.constant 0 : index
    %c0_213 = arith.constant 0 : index
    %c0_214 = arith.constant 0 : index
    %123 = vector.load %arg15[%c0_211, %c0_212, %c0_213, %c0_214] : memref<1x8x8x16xf32, #tpu.memory_space<vmem>>, vector<1x8x8x16xf32>
    %124 = arith.addf %123, %122 : vector<1x8x8x16xf32>
    %c0_215 = arith.constant 0 : index
    %c0_216 = arith.constant 0 : index
    %c0_217 = arith.constant 0 : index
    %c0_218 = arith.constant 0 : index
    %125 = vector.load %arg15[%c0_215, %c0_216, %c0_217, %c0_218] : memref<1x8x8x16xf32, #tpu.memory_space<vmem>>, vector<1x8x8x16xf32>
    tpu.vector_store %arg15[%c0_215, %c0_216, %c0_217, %c0_218], %124 {strides = array<i32>} : memref<1x8x8x16xf32, #tpu.memory_space<vmem>>, vector<1x8x8x16xf32>,
    %c0_219 = arith.constant 0 : index
    %c0_220 = arith.constant 0 : index
    %c0_221 = arith.constant 0 : index
    %c0_222 = arith.constant 0 : index
    %126 = tpu.strided_load %arg15[%c0_219, %c0_220, %c0_221, %c0_222] {strides = array<i32: 1, 2, 2, 1>} : memref<1x8x8x16xf32, #tpu.memory_space<vmem>>, vector<1x4x4x16xf32>
    %c0_223 = arith.constant 0 : index
    %c0_224 = arith.constant 0 : index
    %c1_225 = arith.constant 1 : index
    %c0_226 = arith.constant 0 : index
    %127 = tpu.strided_load %arg15[%c0_223, %c0_224, %c1_225, %c0_226] {strides = array<i32: 1, 2, 2, 1>} : memref<1x8x8x16xf32, #tpu.memory_space<vmem>>, vector<1x4x4x16xf32>
    %c0_227 = arith.constant 0 : index
    %c1_228 = arith.constant 1 : index
    %c0_229 = arith.constant 0 : index
    %c0_230 = arith.constant 0 : index
    %128 = tpu.strided_load %arg15[%c0_227, %c1_228, %c0_229, %c0_230] {strides = array<i32: 1, 2, 2, 1>} : memref<1x8x8x16xf32, #tpu.memory_space<vmem>>, vector<1x4x4x16xf32>
    %c0_231 = arith.constant 0 : index
    %c1_232 = arith.constant 1 : index
    %c1_233 = arith.constant 1 : index
    %c0_234 = arith.constant 0 : index
    %129 = tpu.strided_load %arg15[%c0_231, %c1_232, %c1_233, %c0_234] {strides = array<i32: 1, 2, 2, 1>} : memref<1x8x8x16xf32, #tpu.memory_space<vmem>>, vector<1x4x4x16xf32>
    %130 = arith.maximumf %126, %127 : vector<1x4x4x16xf32>
    %131 = arith.maximumf %128, %129 : vector<1x4x4x16xf32>
    %132 = arith.maximumf %130, %131 : vector<1x4x4x16xf32>
    %c0_235 = arith.constant 0 : index
    %c0_236 = arith.constant 0 : index
    %133 = vector.load %arg7[%c0_235, %c0_236] : memref<1x16xf32, #tpu.memory_space<vmem>>, vector<1x16xf32>
    %134 = vector.shape_cast %133 : vector<1x16xf32> to vector<1x1x1x16xf32>
    %135 = vector.broadcast %134 : vector<1x1x1x16xf32> to vector<1x4x4x16xf32>
    %136 = arith.addf %132, %135 : vector<1x4x4x16xf32>
    %cst_237 = arith.constant 0.000000e+00 : f32
    %137 = vector.broadcast %cst_237 : f32 to vector<1x4x4x16xf32>
    %138 = arith.maximumf %136, %137 : vector<1x4x4x16xf32>
    %c0_238 = arith.constant 0 : index
    %c0_239 = arith.constant 0 : index
    %c0_240 = arith.constant 0 : index
    %c0_241 = arith.constant 0 : index
    %139 = vector.load %arg16[%c0_238, %c0_239, %c0_240, %c0_241] : memref<1x4x4x16xf32, #tpu.memory_space<vmem>>, vector<1x4x4x16xf32>
    tpu.vector_store %arg16[%c0_238, %c0_239, %c0_240, %c0_241], %138 {strides = array<i32>} : memref<1x4x4x16xf32, #tpu.memory_space<vmem>>, vector<1x4x4x16xf32>,
    %c0_242 = arith.constant 0 : index
    %c0_243 = arith.constant 0 : index
    %c0_244 = arith.constant 0 : index
    %c0_245 = arith.constant 0 : index
    %140 = vector.load %arg16[%c0_242, %c0_243, %c0_244, %c0_245] : memref<1x4x4x16xf32, #tpu.memory_space<vmem>>, vector<1x2x2x16xf32>
    %141 = vector.shape_cast %140 : vector<1x2x2x16xf32> to vector<4x16xf32>
    %c0_246 = arith.constant 0 : index
    %c0_247 = arith.constant 0 : index
    %c1_248 = arith.constant 1 : index
    %c0_249 = arith.constant 0 : index
    %142 = vector.load %arg16[%c0_246, %c0_247, %c1_248, %c0_249] : memref<1x4x4x16xf32, #tpu.memory_space<vmem>>, vector<1x2x2x16xf32>
    %143 = vector.shape_cast %142 : vector<1x2x2x16xf32> to vector<4x16xf32>
    %c0_250 = arith.constant 0 : index
    %c0_251 = arith.constant 0 : index
    %c2_252 = arith.constant 2 : index
    %c0_253 = arith.constant 0 : index
    %144 = vector.load %arg16[%c0_250, %c0_251, %c2_252, %c0_253] : memref<1x4x4x16xf32, #tpu.memory_space<vmem>>, vector<1x2x2x16xf32>
    %145 = vector.shape_cast %144 : vector<1x2x2x16xf32> to vector<4x16xf32>
    %146 = tpu.concatenate %141, %143, %145 in 1 : vector<4x16xf32>, vector<4x16xf32>, vector<4x16xf32> -> vector<4x48xf32>
    %c0_254 = arith.constant 0 : index
    %c0_255 = arith.constant 0 : index
    %c0_256 = arith.constant 0 : index
    %147 = vector.load %arg8[%c0_254, %c0_255, %c0_256] : memref<3x48x8xf32, #tpu.memory_space<vmem>>, vector<1x48x8xf32>
    %148 = vector.shape_cast %147 : vector<1x48x8xf32> to vector<48x8xf32>
    %cst_257 = arith.constant dense<0.000000e+00> : vector<4x8xf32>
    %149 = tpu.matmul %146, %148, %cst_257 {dimension_numbers = #tpu.dot_dimension_numbers<[1], [0], [0], [1], [0, 0, 1, 1], [], []>} : vector<4x48xf32>, vector<48x8xf32>, vector<4x8xf32> -> vector<4x8xf32>
    %c0_258 = arith.constant 0 : index
    %c1_259 = arith.constant 1 : index
    %c0_260 = arith.constant 0 : index
    %c0_261 = arith.constant 0 : index
    %150 = vector.load %arg16[%c0_258, %c1_259, %c0_260, %c0_261] : memref<1x4x4x16xf32, #tpu.memory_space<vmem>>, vector<1x2x2x16xf32>
    %151 = vector.shape_cast %150 : vector<1x2x2x16xf32> to vector<4x16xf32>
    %c0_262 = arith.constant 0 : index
    %c1_263 = arith.constant 1 : index
    %c1_264 = arith.constant 1 : index
    %c0_265 = arith.constant 0 : index
    %152 = vector.load %arg16[%c0_262, %c1_263, %c1_264, %c0_265] : memref<1x4x4x16xf32, #tpu.memory_space<vmem>>, vector<1x2x2x16xf32>
    %153 = vector.shape_cast %152 : vector<1x2x2x16xf32> to vector<4x16xf32>
    %c0_266 = arith.constant 0 : index
    %c1_267 = arith.constant 1 : index
    %c2_268 = arith.constant 2 : index
    %c0_269 = arith.constant 0 : index
    %154 = vector.load %arg16[%c0_266, %c1_267, %c2_268, %c0_269] : memref<1x4x4x16xf32, #tpu.memory_space<vmem>>, vector<1x2x2x16xf32>
    %155 = vector.shape_cast %154 : vector<1x2x2x16xf32> to vector<4x16xf32>
    %156 = tpu.concatenate %151, %153, %155 in 1 : vector<4x16xf32>, vector<4x16xf32>, vector<4x16xf32> -> vector<4x48xf32>
    %c1_270 = arith.constant 1 : index
    %c0_271 = arith.constant 0 : index
    %c0_272 = arith.constant 0 : index
    %157 = vector.load %arg8[%c1_270, %c0_271, %c0_272] : memref<3x48x8xf32, #tpu.memory_space<vmem>>, vector<1x48x8xf32>
    %158 = vector.shape_cast %157 : vector<1x48x8xf32> to vector<48x8xf32>
    %cst_273 = arith.constant dense<0.000000e+00> : vector<4x8xf32>
    %159 = tpu.matmul %156, %158, %cst_273 {dimension_numbers = #tpu.dot_dimension_numbers<[1], [0], [0], [1], [0, 0, 1, 1], [], []>} : vector<4x48xf32>, vector<48x8xf32>, vector<4x8xf32> -> vector<4x8xf32>
    %160 = arith.addf %149, %159 : vector<4x8xf32>
    %c0_274 = arith.constant 0 : index
    %c2_275 = arith.constant 2 : index
    %c0_276 = arith.constant 0 : index
    %c0_277 = arith.constant 0 : index
    %161 = vector.load %arg16[%c0_274, %c2_275, %c0_276, %c0_277] : memref<1x4x4x16xf32, #tpu.memory_space<vmem>>, vector<1x2x2x16xf32>
    %162 = vector.shape_cast %161 : vector<1x2x2x16xf32> to vector<4x16xf32>
    %c0_278 = arith.constant 0 : index
    %c2_279 = arith.constant 2 : index
    %c1_280 = arith.constant 1 : index
    %c0_281 = arith.constant 0 : index
    %163 = vector.load %arg16[%c0_278, %c2_279, %c1_280, %c0_281] : memref<1x4x4x16xf32, #tpu.memory_space<vmem>>, vector<1x2x2x16xf32>
    %164 = vector.shape_cast %163 : vector<1x2x2x16xf32> to vector<4x16xf32>
    %c0_282 = arith.constant 0 : index
    %c2_283 = arith.constant 2 : index
    %c2_284 = arith.constant 2 : index
    %c0_285 = arith.constant 0 : index
    %165 = vector.load %arg16[%c0_282, %c2_283, %c2_284, %c0_285] : memref<1x4x4x16xf32, #tpu.memory_space<vmem>>, vector<1x2x2x16xf32>
    %166 = vector.shape_cast %165 : vector<1x2x2x16xf32> to vector<4x16xf32>
    %167 = tpu.concatenate %162, %164, %166 in 1 : vector<4x16xf32>, vector<4x16xf32>, vector<4x16xf32> -> vector<4x48xf32>
    %c2_286 = arith.constant 2 : index
    %c0_287 = arith.constant 0 : index
    %c0_288 = arith.constant 0 : index
    %168 = vector.load %arg8[%c2_286, %c0_287, %c0_288] : memref<3x48x8xf32, #tpu.memory_space<vmem>>, vector<1x48x8xf32>
    %169 = vector.shape_cast %168 : vector<1x48x8xf32> to vector<48x8xf32>
    %cst_289 = arith.constant dense<0.000000e+00> : vector<4x8xf32>
    %170 = tpu.matmul %167, %169, %cst_289 {dimension_numbers = #tpu.dot_dimension_numbers<[1], [0], [0], [1], [0, 0, 1, 1], [], []>} : vector<4x48xf32>, vector<48x8xf32>, vector<4x8xf32> -> vector<4x8xf32>
    %171 = arith.addf %160, %170 : vector<4x8xf32>
    %c0_290 = arith.constant 0 : index
    %c0_291 = arith.constant 0 : index
    %172 = vector.load %arg9[%c0_290, %c0_291] : memref<1x8xf32, #tpu.memory_space<vmem>>, vector<1x8xf32>
    %173 = vector.broadcast %172 : vector<1x8xf32> to vector<4x8xf32>
    %174 = arith.addf %171, %173 : vector<4x8xf32>
    %cst_292 = arith.constant 0.000000e+00 : f32
    %175 = vector.broadcast %cst_292 : f32 to vector<4x8xf32>
    %176 = arith.maximumf %174, %175 : vector<4x8xf32>
    %177 = vector.shape_cast %176 : vector<4x8xf32> to vector<1x2x2x8xf32>
    %c0_293 = arith.constant 0 : index
    %c0_294 = arith.constant 0 : index
    %c0_295 = arith.constant 0 : index
    %c0_296 = arith.constant 0 : index
    %178 = vector.load %arg10[%c0_293, %c0_294, %c0_295, %c0_296] : memref<1x2x2x8xf32, #tpu.memory_space<vmem>>, vector<1x2x2x8xf32>
    tpu.vector_store %arg10[%c0_293, %c0_294, %c0_295, %c0_296], %177 {strides = array<i32>} : memref<1x2x2x8xf32, #tpu.memory_space<vmem>>, vector<1x2x2x8xf32>,
    return
  }
  func.func @transform_0(%arg0: i32) -> (i32, i32, i32, i32) {
    %c0_i32 = arith.constant 0 : i32
    %c0_i32_0 = arith.constant 0 : i32
    %c0_i32_1 = arith.constant 0 : i32
    %c0_i32_2 = arith.constant 0 : i32
    return %arg0, %c0_i32, %c0_i32_0, %c0_i32_1 : i32, i32, i32, i32
  }
  func.func @transform_1(%arg0: i32) -> (i32, i32) {
    %c0_i32 = arith.constant 0 : i32
    %c0_i32_0 = arith.constant 0 : i32
    %c0_i32_1 = arith.constant 0 : i32
    return %c0_i32, %c0_i32_0 : i32, i32
  }
  func.func @transform_2(%arg0: i32) -> (i32, i32) {
    %c0_i32 = arith.constant 0 : i32
    %c0_i32_0 = arith.constant 0 : i32
    %c0_i32_1 = arith.constant 0 : i32
    return %c0_i32, %c0_i32_0 : i32, i32
  }
  func.func @transform_3(%arg0: i32) -> (i32, i32, i32) {
    %c0_i32 = arith.constant 0 : i32
    %c0_i32_0 = arith.constant 0 : i32
    %c0_i32_1 = arith.constant 0 : i32
    %c0_i32_2 = arith.constant 0 : i32
    return %c0_i32, %c0_i32_0, %c0_i32_1 : i32, i32, i32
  }
  func.func @transform_4(%arg0: i32) -> (i32, i32) {
    %c0_i32 = arith.constant 0 : i32
    %c0_i32_0 = arith.constant 0 : i32
    %c0_i32_1 = arith.constant 0 : i32
    return %c0_i32, %c0_i32_0 : i32, i32
  }
  func.func @transform_5(%arg0: i32) -> (i32, i32, i32) {
    %c0_i32 = arith.constant 0 : i32
    %c0_i32_0 = arith.constant 0 : i32
    %c0_i32_1 = arith.constant 0 : i32
    %c0_i32_2 = arith.constant 0 : i32
    return %c0_i32, %c0_i32_0, %c0_i32_1 : i32, i32, i32
  }
  func.func @transform_6(%arg0: i32) -> (i32, i32) {
    %c0_i32 = arith.constant 0 : i32
    %c0_i32_0 = arith.constant 0 : i32
    %c0_i32_1 = arith.constant 0 : i32
    return %c0_i32, %c0_i32_0 : i32, i32
  }
  func.func @transform_7(%arg0: i32) -> (i32, i32, i32) {
    %c0_i32 = arith.constant 0 : i32
    %c0_i32_0 = arith.constant 0 : i32
    %c0_i32_1 = arith.constant 0 : i32
    %c0_i32_2 = arith.constant 0 : i32
    return %c0_i32, %c0_i32_0, %c0_i32_1 : i32, i32, i32
  }
  func.func @transform_8(%arg0: i32) -> (i32, i32) {
    %c0_i32 = arith.constant 0 : i32
    %c0_i32_0 = arith.constant 0 : i32
    %c0_i32_1 = arith.constant 0 : i32
    return %c0_i32, %c0_i32_0 : i32, i32
  }
  func.func @transform_9(%arg0: i32) -> (i32, i32, i32, i32) {
    %c0_i32 = arith.constant 0 : i32
    %c0_i32_0 = arith.constant 0 : i32
    %c0_i32_1 = arith.constant 0 : i32
    %c0_i32_2 = arith.constant 0 : i32
    return %arg0, %c0_i32, %c0_i32_0, %c0_i32_1 : i32, i32, i32, i32
  }
}

</mosaic_0001>

<bundles_post_ra>
// kernel: encoder_forward.1
= control target key start
LH: loop header
LB: loop body
LE: loop exit
PB: predicated region body
PF: predicated region fallthrough
CT: control target
= control target key end

     0   :  { %14 = vsyncpa [#allocation9], 0  ;;  %s7902_s0 = inlined_call_operand.vmem [shape: f32[2,32,32,16], index: 0, kind: input, shape index: {}]   ;;  %s7903_s1 = inlined_call_operand.vmem [shape: f32[16,64], index: 1, kind: input, shape index: {}]   ;;  %s7904_s2 = inlined_call_operand.vmem [shape: f32[1,64], index: 2, kind: input, shape index: {}]   ;;  %s7905_s3 = inlined_call_operand.vmem [shape: f32[3,192,32], index: 3, kind: input, shape index: {}]   ;;  %s7906_s4 = inlined_call_operand.vmem [shape: f32[1,32], index: 4, kind: input, shape index: {}]   ;;  %s7907_s5 = inlined_call_operand.vmem [shape: f32[3,96,16], index: 5, kind: input, shape index: {}]   ;;  %s7908_s6 = inlined_call_operand.vmem [shape: f32[1,16], index: 6, kind: input, shape index: {}]   ;;  %s7909_s7 = inlined_call_operand.vmem [shape: f32[3,48,8], index: 7, kind: input, shape index: {}]   ;;  %s7910_s8 = inlined_call_operand.vmem [shape: f32[1,8], index: 8, kind: input, shape index: {}]   ;;  %s7911_s9 = inlined_call_operand.hbm [shape: f32[2,2,2,8], index: 9, kind: output, shape index: {}]  }
   0x1   :  { %16 = vsyncpa [#allocation9 + $0x1], 0  ;;  %s5763_s30 = smov 0   ;;  %s5765_s10 = smov 0  }
   0x2   :  { %s5767_s11 = smov 0   ;;  %s5769_s12 = smov 0  }
   0x3 LB: > { %s5784_s13 = sadd.s32 4294967295, %s5706_s12   ;;  %s5082_s14 = sadd.s32 4294967294, %s5706_s12   ;;  %s5706_s12 = sphi %s5769_s12, %s7929_s12   ;;  %s5702_s11 = sphi %s5767_s11, %s7928_s11   ;;  %s5698_s10 = sphi %s5765_s10, %s7927_s10   ;;  %s5694_s30 = sphi %s5763_s30, %s7926_s30  }
   0x4   : > { %s5788_s15 = sadd.s32 1, %s5706_s12   ;;  %s223_s16 = sadd.s32 1, %s5702_s11 }
   0x5   : > { %s220_s17 = ssub.s32 %s5706_s12, %s5788_s15  ;;  %p233_p0 = scmp.ne.s32.totalorder %s5702_s11, %s5698_s10 }
   0x6   : > { %p221_p1 = scmp.eq.s32.totalorder %s220_s17, 0  ;;  %p234_p2 = scmp.eq.s32.totalorder %s5784_s13, 1 }
   0x7   : > { %p239_p3 = scmp.ne.s32.totalorder %s5698_s10, %s5694_s30  ;;  %p240_p4 = scmp.eq.s32.totalorder %s5082_s14, 1 }
   0x8   : > { %s5799_s18 = scalar_select %p221_p1, %s5702_s11, %s223_s16  }
   0x9   : > { %p5801_p5 = por %p234_p2, %p233_p0  ;;  %p5805_p6 = por %p240_p4, %p239_p3 }
   0xa   : > { %p5085_p7 = scmp.ge.s32.totalorder %s5706_s12, 1  ;;  %p290_p8 = scmp.lt.s32.totalorder %s5706_s12, 3 }
   0xc   : > { %p291_p9 = pnand %p5085_p7, %p290_p8 }
   0xe   : > { %294 = sbr.rel (%p291_p9) target bundleno = 2058 (0x80a), region = 56 }
  0x13   : > { %v460_v0 = vld [vmem:[%s7903_s1 + $0x8] sm:$0xff]  ;;  %v459_v1 = vld [vmem:[%s7903_s1] sm:$0xff]  ;;  %p326_p10 = scmp.lt.s32.totalorder %s5784_s13, 1  ;;  %vm461_vm0 = vcmask 130048   ;;  %vm1247_vm1 = vcmask 523264   ;;  %v2153_v36 = vld [vmem:[%s7905_s3 + $0xb8] sm:$0xff] }
  0x14   : > { %860 = vmatpush.msra.mxu0 %v460_v0  ;;  %5432 = vmatpush.msra.mxu2 %v460_v0  ;;  %v2152_v37 = vld [vmem:[%s7905_s3 + $0xb0] sm:$0xff]  ;;  %v2151_v39 = vld [vmem:[%s7905_s3 + $0xa8] sm:$0xff]  ;;  %v2150_v40 = vld [vmem:[%s7905_s3 + $0xa0] sm:$0xff]  ;;  %v7912_v45 = vmov 0.0   ;;  %vm1804_vm2 = vcmask 516096   ;;  %vm2476_vm3 = vcmask 261120  }
  0x15   : > { %s327_s25 = scalar_select %p326_p10, %s5784_s13, 1  ;;  %5433 = vmatpush.msra.mxu3 %v460_v0  ;;  %5431 = vmatpush.msra.mxu1 %v460_v0  ;;  %v2149_v44 = vld [vmem:[%s7905_s3 + $0x98] sm:$0xff]  ;;  %1796 = vst.msk [vmem:[#allocation3 + $0x8] sm:$0xff] %vm1247_vm1, %v7912_v45  ;;  %v2148_v46 = vld [vmem:[%s7905_s3 + $0x90] sm:$0xff]  ;;  %v2147_v48 = vld [vmem:[%s7905_s3 + $0x88] sm:$0xff]  ;;  %vm4022_vm4 = vcmask 253952  }
  0x16   : > { %861 = vmatpush.msra.mxu0 %v459_v1  ;;  %5435 = vmatpush.msra.mxu2 %v459_v1  ;;  %1797 = vst.msk [vmem:[#allocation3 + $0x10] sm:$0xff] %vm1247_vm1, %v7912_v45  ;;  %v2146_v49 = vld [vmem:[%s7905_s3 + $0x80] sm:$0xff]  ;;  %vm4168_vm5 = vcmask 785408   ;;  %vm4710_vm6 = vcmask 125952   ;;  %s5711_s14 = smov 16   ;;  %vm4795_vm7 = vcmask 392192  }
  0x17   : > { %s5429_s26 = sshll.u32 %s327_s25, 10  ;;  %5436 = vmatpush.msra.mxu3 %v459_v1  ;;  %5434 = vmatpush.msra.mxu1 %v459_v1  ;;  %1795 = vst.msk [vmem:[#allocation3] sm:$0xff] %vm1247_vm1, %v7912_v45  ;;  %s5709_s25 = smov 64   ;;  %vm4916_vm8 = vcmask 58368  }
  0x18   : > { %s5822_s29 = scalar_lea.vmem %s7902_s0, %s5429_s26  ;;  %2371 = vmatpush.msrb.mxu2 %v2153_v36  ;;  %1798 = vst.msk [vmem:[#allocation3 + $0x18] sm:$0xff] %vm1247_vm1, %v7912_v45  ;;  %s323_s22 = sand.u32 1, %s5698_s10  }
  0x19   : > { %v331_v2 = vld [vmem:[%s5822_s29] sm:$0xff]  ;;  %v332_v3 = vld [vmem:[%s5822_s29 + $0x8] sm:$0xff]  ;;  %v333_v4 = vld [vmem:[%s5822_s29 + $0x10] sm:$0xff]  ;;  %1800 = vst.msk [vmem:[#allocation3 + $0x220] sm:$0xff] %vm1247_vm1, %v7912_v45  ;;  %s5086_s23 = sshll.u32 %s323_s22, 2  ;;  %s5430_s24 = sshll.u32 %s5784_s13, 2 }
  0x1a   : > { %5089 = vmatmul.msk.f32.vlgmr.msra.gmra.mxu0 %vm461_vm0, %v331_v2  ;;  %v334_v5 = vld [vmem:[%s5822_s29 + $0x18] sm:$0xff]  ;;  %v335_v6 = vld [vmem:[%s5822_s29 + $0x20] sm:$0xff]  ;;  %v336_v7 = vld [vmem:[%s5822_s29 + $0x28] sm:$0xff]  ;;  %2372 = vmatpush.msrb.mxu2 %v2152_v37  ;;  %1801 = vst.msk [vmem:[#allocation3 + $0x228] sm:$0xff] %vm1247_vm1, %v7912_v45  ;;  %s325_s16 = scalar_lea.vmem [#allocation8], %s5086_s23  ;;  %s4920_s13 = scalar_lea.sflag [#allocation9], %s323_s22 }
  0x1b   : > { %v337_v8 = vld [vmem:[%s5822_s29 + $0x30] sm:$0xff]  ;;  %v430_v9 = vld [vmem:[%s5822_s29 + $0x318] sm:$0xff]  ;;  %v431_v11 = vld [vmem:[%s5822_s29 + $0x320] sm:$0xff]  ;;  %1802 = vst.msk [vmem:[#allocation3 + $0x230] sm:$0xff] %vm1247_vm1, %v7912_v45  ;;  %s4932_s17 = sshll.u32 %s325_s16, 4  ;;  %s5664_s23 = scalar_lea.hbm %s7911_s9, 8  ;;  %s4933_s17 = int_to_ptr.vmem [resolvable:$true] %s4932_s17 }
  0x1c   : > { %5188 = vmatmul.msk.f32.vlgmr.msra.gmra.mxu2 %vm461_vm0, %v430_v9  ;;  %v338_v10 = vld [vmem:[%s5822_s29 + $0x38] sm:$0xff]  ;;  %v339_v12 = vld [vmem:[%s5822_s29 + $0x40] sm:$0xff]  ;;  %v432_v13 = vld [vmem:[%s5822_s29 + $0x328] sm:$0xff]  ;;  %1803 = vst.msk [vmem:[#allocation3 + $0x238] sm:$0xff] %vm1247_vm1, %v7912_v45 }
  0x1d   : > { %v340_v14 = vld [vmem:[%s5822_s29 + $0x48] sm:$0xff]  ;;  %v433_v15 = vld [vmem:[%s5822_s29 + $0x330] sm:$0xff]  ;;  %v434_v17 = vld [vmem:[%s5822_s29 + $0x338] sm:$0xff]  ;;  %2373 = vmatpush.msrb.mxu2 %v2151_v39  ;;  %1823 = vst.msk [vmem:[#allocation3 + $0x18] sm:$0x1] %vm1804_vm2, %v7912_v45 }
  0x1e   : > { %v341_v16 = vld [vmem:[%s5822_s29 + $0x50] sm:$0xff]  ;;  %v342_v18 = vld [vmem:[%s5822_s29 + $0x58] sm:$0xff]  ;;  %v343_v19 = vld [vmem:[%s5822_s29 + $0x60] sm:$0xff]  ;;  %1805 = vst.msk [vmem:[#allocation3 + $0x7] sm:$0x1] %vm1804_vm2, %v7912_v45 }
  0x1f   : > { %v435_v20 = vld [vmem:[%s5822_s29 + $0x340] sm:$0xff]  ;;  %v344_v21 = vld [vmem:[%s5822_s29 + $0x68] sm:$0xff]  ;;  %v345_v23 = vld [vmem:[%s5822_s29 + $0x70] sm:$0xff]  ;;  %2374 = vmatpush.msrb.mxu2 %v2150_v40  ;;  %1806 = vst.msk [vmem:[#allocation3 + $0x27] sm:$0x1] %vm1804_vm2, %v7912_v45 }
  0x20   : > { %v436_v22 = vld [vmem:[%s5822_s29 + $0x348] sm:$0xff]  ;;  %v437_v24 = vld [vmem:[%s5822_s29 + $0x350] sm:$0xff]  ;;  %v346_v25 = vld [vmem:[%s5822_s29 + $0x78] sm:$0xff]  ;;  %1807 = vst.msk [vmem:[#allocation3 + $0x47] sm:$0x1] %vm1804_vm2, %v7912_v45 }
  0x21   : > { %v438_v26 = vld [vmem:[%s5822_s29 + $0x358] sm:$0xff]  ;;  %v347_v28 = vld [vmem:[%s5822_s29 + $0x80] sm:$0xff]  ;;  %v348_v31 = vld [vmem:[%s5822_s29 + $0x88] sm:$0xff]  ;;  %2375 = vmatpush.msrb.mxu2 %v2149_v44  ;;  %1808 = vst.msk [vmem:[#allocation3 + $0x67] sm:$0x1] %vm1804_vm2, %v7912_v45 }
  0x22   : > { %5090 = vmatmul.msk.f32.gmra.mxu0 %vm461_vm0, %v332_v3  ;;  %v439_v29 = vld [vmem:[%s5822_s29 + $0x360] sm:$0xff]  ;;  %v440_v32 = vld [vmem:[%s5822_s29 + $0x368] sm:$0xff]  ;;  %v349_v34 = vld [vmem:[%s5822_s29 + $0x90] sm:$0xff]  ;;  %1809 = vst.msk [vmem:[#allocation3 + $0x87] sm:$0x1] %vm1804_vm2, %v7912_v45 }
  0x23   : > { %v441_v35 = vld [vmem:[%s5822_s29 + $0x370] sm:$0xff]  ;;  %v443_v38 = vld [vmem:[%s5822_s29 + $0x380] sm:$0xff]  ;;  %v350_v42 = vld [vmem:[%s5822_s29 + $0x98] sm:$0xff]  ;;  %2376 = vmatpush.msrb.mxu2 %v2148_v46  ;;  %1810 = vst.msk [vmem:[#allocation3 + $0xa7] sm:$0x1] %vm1804_vm2, %v7912_v45 }
  0x24   : > { %5189 = vmatmul.msk.f32.gmra.mxu2 %vm461_vm0, %v431_v11  ;;  %5201 = vmatmul.msk.f32.vlgmr.msra.gmra.mxu3 %vm461_vm0, %v443_v38  ;;  %v442_v43 = vld [vmem:[%s5822_s29 + $0x378] sm:$0xff]  ;;  %v444_v47 = vld [vmem:[%s5822_s29 + $0x388] sm:$0xff]  ;;  %v351_v51 = vld [vmem:[%s5822_s29 + $0xa0] sm:$0xff]  ;;  %1811 = vst.msk [vmem:[#allocation3 + $0xc7] sm:$0x1] %vm1804_vm2, %v7912_v45 }
  0x25   : > { %2377 = vmatpush.msrb.mxu2 %v2147_v48  ;;  %v1938_v52 = vld [vmem:[#allocation3 + $0x9] sm:$0xff]  ;;  %v352_v55 = vld [vmem:[%s5822_s29 + $0xa8] sm:$0xff]  ;;  %v1939_v56 = vld [vmem:[#allocation3 + $0x11] sm:$0xff]  ;;  %1812 = vst.msk [vmem:[#allocation3 + $0xe7] sm:$0x1] %vm1804_vm2, %v7912_v45 }
  0x26   : > { %v445_v53 = vld [vmem:[%s5822_s29 + $0x390] sm:$0xff]  ;;  %1813 = vst.msk [vmem:[#allocation3 + $0x107] sm:$0x1] %vm1804_vm2, %v7912_v45  ;;  %v446_v57 = vld [vmem:[%s5822_s29 + $0x398] sm:$0xff]  ;;  %v5981_v2 = vld [vmem:[%s7904_s2] ss:$0 sm:$0xff] }
  0x27   : > { %2378 = vmatpush.msrb.mxu2 %v2146_v49  ;;  %1814 = vst.msk [vmem:[#allocation3 + $0x127] sm:$0x1] %vm1804_vm2, %v7912_v45  ;;  %v353_v60 = vld [vmem:[%s5822_s29 + $0xb0] sm:$0xff]  ;;  %v355_v11 = vld [vmem:[%s5822_s29 + $0xc0] sm:$0xff]  ;;  %v358_v37 = vld [vmem:[%s5822_s29 + $0xd8] sm:$0xff] }
  0x28   : > { %1815 = vst.msk [vmem:[#allocation3 + $0x147] sm:$0x1] %vm1804_vm2, %v7912_v45  ;;  %v420_v40 = vld [vmem:[%s5822_s29 + $0x2c8] sm:$0xff]  ;;  %v421_v46 = vld [vmem:[%s5822_s29 + $0x2d0] sm:$0xff] }
  0x29   : > { %1816 = vst.msk [vmem:[#allocation3 + $0x167] sm:$0x1] %vm1804_vm2, %v7912_v45  ;;  %5178 = vmatmul.msk.f32.vlgmr.msra.gmra.mxu1 %vm461_vm0, %v420_v40  ;;  %v452_v44 = vld [vmem:[%s5822_s29 + $0x3c8] sm:$0xff]  ;;  %v5255_v40 = vld [vmem:[%s7905_s3 + $0xf0] sm:$0xff] }
  0x2a   : > { %5091 = vmatmul.msk.f32.gmra.mxu0 %vm461_vm0, %v333_v4  ;;  %1817 = vst.msk [vmem:[#allocation3 + $0x187] sm:$0x1] %vm1804_vm2, %v7912_v45  ;;  %v360_v49 = vld [vmem:[%s5822_s29 + $0xe8] sm:$0xff] }
  0x2b   : > { %1818 = vst.msk [vmem:[#allocation3 + $0x1a7] sm:$0x1] %vm1804_vm2, %v7912_v45 }
  0x2c   : > { %5190 = vmatmul.msk.f32.gmra.mxu2 %vm461_vm0, %v432_v13  ;;  %5202 = vmatmul.msk.f32.gmra.mxu3 %vm461_vm0, %v444_v47  ;;  %1819 = vst.msk [vmem:[#allocation3 + $0x1c7] sm:$0x1] %vm1804_vm2, %v7912_v45  ;;  %v453_v47 = vld [vmem:[%s5822_s29 + $0x3d0] sm:$0xff] }
  0x2d   : > { %1820 = vst.msk [vmem:[#allocation3 + $0x1e7] sm:$0x1] %vm1804_vm2, %v7912_v45 }
  0x2e   : > { %1821 = vst.msk [vmem:[#allocation3 + $0x207] sm:$0x1] %vm1804_vm2, %v7912_v45 }
  0x2f   : > { %1822 = vst.msk [vmem:[#allocation3 + $0x227] sm:$0x1] %vm1804_vm2, %v7912_v45 }
  0x30   : > { %1824 = vst.msk [vmem:[#allocation3 + $0x38] sm:$0x1] %vm1804_vm2, %v7912_v45 }
  0x31   : > { %1825 = vst.msk [vmem:[#allocation3 + $0x58] sm:$0x1] %vm1804_vm2, %v7912_v45  ;;  %5179 = vmatmul.msk.f32.gmra.mxu1 %vm461_vm0, %v421_v46  ;;  %v5253_v46 = vld [vmem:[%s7905_s3 + $0xe0] sm:$0xff] }
  0x32   : > { %5092 = vmatmul.msk.f32.gmra.mxu0 %vm461_vm0, %v334_v5  ;;  %1826 = vst.msk [vmem:[#allocation3 + $0x78] sm:$0x1] %vm1804_vm2, %v7912_v45 }
  0x33   : > { %1827 = vst.msk [vmem:[#allocation3 + $0x98] sm:$0x1] %vm1804_vm2, %v7912_v45 }
  0x34   : > { %5191 = vmatmul.msk.f32.gmra.mxu2 %vm461_vm0, %v433_v15  ;;  %5203 = vmatmul.msk.f32.gmra.mxu3 %vm461_vm0, %v445_v53  ;;  %1828 = vst.msk [vmem:[#allocation3 + $0xb8] sm:$0x1] %vm1804_vm2, %v7912_v45 }
  0x35   : > { %1829 = vst.msk [vmem:[#allocation3 + $0xd8] sm:$0x1] %vm1804_vm2, %v7912_v45 }
  0x36   : > { %1830 = vst.msk [vmem:[#allocation3 + $0xf8] sm:$0x1] %vm1804_vm2, %v7912_v45 }
  0x37   : > { %1831 = vst.msk [vmem:[#allocation3 + $0x118] sm:$0x1] %vm1804_vm2, %v7912_v45 }
  0x38   : > { %1832 = vst.msk [vmem:[#allocation3 + $0x138] sm:$0x1] %vm1804_vm2, %v7912_v45 }
  0x39   : > { %1833 = vst.msk [vmem:[#allocation3 + $0x158] sm:$0x1] %vm1804_vm2, %v7912_v45 }
  0x3a   : > { %5093 = vmatmul.msk.f32.gmra.mxu0 %vm461_vm0, %v335_v6  ;;  %v447_v6 = vld [vmem:[%s5822_s29 + $0x3a0] sm:$0xff]  ;;  %1834 = vst.msk [vmem:[#allocation3 + $0x178] sm:$0x1] %vm1804_vm2, %v7912_v45 }
  0x3b   : > { %1835 = vst.msk [vmem:[#allocation3 + $0x198] sm:$0x1] %vm1804_vm2, %v7912_v45 }
  0x3c   : > { %5192 = vmatmul.msk.f32.gmra.mxu2 %vm461_vm0, %v434_v17  ;;  %5204 = vmatmul.msk.f32.gmra.mxu3 %vm461_vm0, %v446_v57  ;;  %1836 = vst.msk [vmem:[#allocation3 + $0x1b8] sm:$0x1] %vm1804_vm2, %v7912_v45 }
  0x3d   : > { %1837 = vst.msk [vmem:[#allocation3 + $0x1d8] sm:$0x1] %vm1804_vm2, %v7912_v45 }
  0x3e   : > { %1838 = vst.msk [vmem:[#allocation3 + $0x1f8] sm:$0x1] %vm1804_vm2, %v7912_v45 }
  0x3f   : > { %1839 = vst.msk [vmem:[#allocation3 + $0x218] sm:$0x1] %vm1804_vm2, %v7912_v45 }
  0x40   : > { %1840 = vst.msk [vmem:[#allocation3 + $0x238] sm:$0x1] %vm1804_vm2, %v7912_v45 }
  0x41   : > { %4015 = vst.msk [vmem:[#allocation5] sm:$0xff] %vm2476_vm3, %v7912_v45 }
  0x42   : > { %5094 = vmatmul.msk.f32.gmra.mxu0 %vm461_vm0, %v336_v7  ;;  %4016 = vst.msk [vmem:[#allocation5 + $0x8] sm:$0xff] %vm2476_vm3, %v7912_v45 }
  0x43   : > { %4017 = vst.msk [vmem:[#allocation5 + $0x10] sm:$0xff] %vm2476_vm3, %v7912_v45 }
  0x44   : > { %5193 = vmatmul.msk.f32.gmra.mxu2 %vm461_vm0, %v435_v20  ;;  %5205 = vmatmul.msk.f32.gmra.mxu3 %vm461_vm0, %v447_v6  ;;  %v362_v6 = vld [vmem:[%s5822_s29 + $0xf8] sm:$0xff]  ;;  %4019 = vst.msk [vmem:[#allocation5 + $0xd8] sm:$0xff] %vm2476_vm3, %v7912_v45 }
  0x45   : > { %4020 = vst.msk [vmem:[#allocation5 + $0xe0] sm:$0xff] %vm2476_vm3, %v7912_v45 }
  0x46   : > { %4021 = vst.msk [vmem:[#allocation5 + $0xe8] sm:$0xff] %vm2476_vm3, %v7912_v45 }
  0x4a   : > { %5095 = vmatmul.msk.f32.gmra.mxu0 %vm461_vm0, %v337_v8  ;;  %v354_v8 = vld [vmem:[%s5822_s29 + $0xb8] sm:$0xff] }
  0x4c   : > { %5194 = vmatmul.msk.f32.gmra.mxu2 %vm461_vm0, %v436_v22  ;;  %v449_v22 = vld [vmem:[%s5822_s29 + $0x3b0] sm:$0xff] }
  0x52   : > { %5096 = vmatmul.msk.f32.gmra.mxu0 %vm461_vm0, %v338_v10 }
  0x54   : > { %5195 = vmatmul.msk.f32.gmra.mxu2 %vm461_vm0, %v437_v24  ;;  %v356_v24 = vld [vmem:[%s5822_s29 + $0xc8] sm:$0xff] }
  0x5a   : > { %5097 = vmatmul.msk.f32.gmra.mxu0 %vm461_vm0, %v339_v12 }
  0x5c   : > { %5196 = vmatmul.msk.f32.gmra.mxu2 %vm461_vm0, %v438_v26 }
  0x62   : > { %5098 = vmatmul.msk.f32.gmra.mxu0 %vm461_vm0, %v340_v14 }
  0x64   : > { %5197 = vmatmul.msk.f32.gmra.mxu2 %vm461_vm0, %v439_v29 }
  0x6a   : > { %5099 = vmatmul.msk.f32.gmra.mxu0 %vm461_vm0, %v341_v16 }
  0x6c   : > { %5198 = vmatmul.msk.f32.gmra.mxu2 %vm461_vm0, %v440_v32 }
  0x72   : > { %5100 = vmatmul.msk.f32.gmra.mxu0 %vm461_vm0, %v342_v18 }
  0x74   : > { %5199 = vmatmul.msk.f32.gmra.mxu2 %vm461_vm0, %v441_v35  ;;  %v451_v35 = vld [vmem:[%s5822_s29 + $0x3c0] sm:$0xff] }
  0x7a   : > { %5101 = vmatmul.msk.f32.gmra.mxu0 %vm461_vm0, %v343_v19  ;;  %v448_v19 = vld [vmem:[%s5822_s29 + $0x3a8] sm:$0xff] }
  0x7b   : > { %5206 = vmatmul.msk.f32.gmra.mxu3 %vm461_vm0, %v448_v19 }
  0x7c   : > { %5200 = vmatmul.msk.f32.gmra.mxu2 %vm461_vm0, %v442_v43 }
  0x82   : > { %5102 = vmatmul.msk.f32.gmra.mxu0 %vm461_vm0, %v344_v21 }
  0x83   : > { %5207 = vmatmul.msk.f32.gmra.mxu3 %vm461_vm0, %v449_v22 }
  0x84   : > { %5217 = vmatmul.msk.f32.vlgmr.msrb.gmra.mxu2 %vm1247_vm1, %v1938_v52 }
  0x8a   : > { %5103 = vmatmul.msk.f32.gmra.mxu0 %vm461_vm0, %v345_v23 }
  0x8c   : > { %5218 = vmatmul.msk.f32.gmra.mxu2 %vm1247_vm1, %v1939_v56 }
  0x92   : > { %5104 = vmatmul.msk.f32.gmra.mxu0 %vm461_vm0, %v346_v25 }
  0x97   : > { %v863_v27 = vpop.f32.mrf.mxu0 }
  0x98   : > { %1248 = vst.msk [vmem:[#allocation2] sm:$0xff] %vm1247_vm1, %v863_v27 }
  0x9a   : > { %5105 = vmatmul.msk.f32.gmra.mxu0 %vm461_vm0, %v347_v28  ;;  %v357_v28 = vld [vmem:[%s5822_s29 + $0xd0] sm:$0xff] }
  0x9f   : > { %v866_v30 = vpop.f32.mrf.mxu0  ;;  %v1160_v15 = vpop.f32.mrf.mxu2 }
  0xa0   : > { %1249 = vst.msk [vmem:[#allocation2 + $0x8] sm:$0xff] %vm1247_vm1, %v866_v30  ;;  %v450_v30 = vld [vmem:[%s5822_s29 + $0x3b8] sm:$0xff] }
  0xa1   : > { %1347 = vst.msk [vmem:[#allocation2 + $0x318] sm:$0xff] %vm1247_vm1, %v1160_v15  ;;  %5208 = vmatmul.msk.f32.gmra.mxu3 %vm461_vm0, %v450_v30  ;;  %v5261_v15 = vld [vmem:[%s7905_s3 + $0x120] sm:$0xff]  ;;  %v5258_v30 = vld [vmem:[%s7905_s3 + $0x108] sm:$0xff] }
  0xa2   : > { %5106 = vmatmul.msk.f32.gmra.mxu0 %vm461_vm0, %v348_v31  ;;  %v1906_v31 = vld [vmem:[#allocation3 + $0x8] sm:$0xff] }
  0xa7   : > { %v869_v33 = vpop.f32.mrf.mxu0  ;;  %v1376_v58 = vld [vmem:[#allocation2] ss:$2 sm:$0xff]  ;;  %v1440_v59 = vld [vmem:[#allocation2 + $0x1] ss:$2 sm:$0xff]  ;;  %v1163_v25 = vpop.f32.mrf.mxu2 }
  0xa8   : > { %1250 = vst.msk [vmem:[#allocation2 + $0x10] sm:$0xff] %vm1247_vm1, %v869_v33  ;;  %v1631_v0 = vmax.f32 %v1376_v58, %v1440_v59  ;;  %v454_v59 = vld [vmem:[%s5822_s29 + $0x3d8] sm:$0xff] }
  0xa9   : > { %1348 = vst.msk [vmem:[#allocation2 + $0x320] sm:$0xff] %vm1247_vm1, %v1163_v25  ;;  %5209 = vmatmul.msk.f32.gmra.mxu3 %vm461_vm0, %v451_v35  ;;  %v5260_v25 = vld [vmem:[%s7905_s3 + $0x118] sm:$0xff]  ;;  %v457_v35 = vld [vmem:[%s5822_s29 + $0x3f0] sm:$0xff] }
  0xaa   : > { %5107 = vmatmul.msk.f32.gmra.mxu0 %vm461_vm0, %v349_v34 }
  0xaf   : > { %v872_v41 = vpop.f32.mrf.mxu0  ;;  %v1166_v29 = vpop.f32.mrf.mxu2 }
  0xb0   : > { %1251 = vst.msk [vmem:[#allocation2 + $0x18] sm:$0xff] %vm1247_vm1, %v872_v41 }
  0xb1   : > { %1349 = vst.msk [vmem:[#allocation2 + $0x328] sm:$0xff] %vm1247_vm1, %v1166_v29  ;;  %5210 = vmatmul.msk.f32.gmra.mxu3 %vm461_vm0, %v452_v44  ;;  %v2144_v44 = vld [vmem:[%s7905_s3 + $0x70] sm:$0xff] }
  0xb2   : > { %5108 = vmatmul.msk.f32.gmra.mxu0 %vm461_vm0, %v350_v42  ;;  %v359_v42 = vld [vmem:[%s5822_s29 + $0xe0] sm:$0xff] }
  0xb7   : > { %v875_v50 = vpop.f32.mrf.mxu0  ;;  %v1378_v9 = vld [vmem:[#allocation2 + $0x10] ss:$2 sm:$0xff]  ;;  %v1442_v10 = vld [vmem:[#allocation2 + $0x11] ss:$2 sm:$0xff]  ;;  %v1169_v38 = vpop.f32.mrf.mxu2 }
  0xb8   : > { %1252 = vst.msk [vmem:[#allocation2 + $0x20] sm:$0xff] %vm1247_vm1, %v875_v50  ;;  %v1632_v16 = vmax.f32 %v1378_v9, %v1442_v10  ;;  %v424_v9 = vld [vmem:[%s5822_s29 + $0x2e8] sm:$0xff] }
  0xb9   : > { %1350 = vst.msk [vmem:[#allocation2 + $0x330] sm:$0xff] %vm1247_vm1, %v1169_v38  ;;  %5211 = vmatmul.msk.f32.gmra.mxu3 %vm461_vm0, %v453_v47  ;;  %v5262_v10 = vld [vmem:[%s7905_s3 + $0x128] sm:$0xff] }
  0xba   : > { %5109 = vmatmul.msk.f32.gmra.mxu0 %vm461_vm0, %v351_v51  ;;  %v422_v51 = vld [vmem:[%s5822_s29 + $0x2d8] sm:$0xff] }
  0xbb   : > { %5180 = vmatmul.msk.f32.gmra.mxu1 %vm461_vm0, %v422_v51 }
  0xbf   : > { %v878_v54 = vpop.f32.mrf.mxu0  ;;  %v1172_v43 = vpop.f32.mrf.mxu2 }
  0xc0   : > { %1253 = vst.msk [vmem:[#allocation2 + $0x28] sm:$0xff] %vm1247_vm1, %v878_v54  ;;  %v361_v54 = vld [vmem:[%s5822_s29 + $0xf0] sm:$0xff] }
  0xc1   : > { %1351 = vst.msk [vmem:[#allocation2 + $0x338] sm:$0xff] %vm1247_vm1, %v1172_v43  ;;  %5212 = vmatmul.msk.f32.gmra.mxu3 %vm461_vm0, %v454_v59  ;;  %v5254_v43 = vld [vmem:[%s7905_s3 + $0xe8] sm:$0xff] }
  0xc2   : > { %5110 = vmatmul.msk.f32.gmra.mxu0 %vm461_vm0, %v352_v55  ;;  %v5250_v59 = vld [vmem:[%s7905_s3 + $0xc8] sm:$0xff] }
  0xc7   : > { %v1504_v61 = vld [vmem:[#allocation2 + $0x20] ss:$2 sm:$0xff]  ;;  %v1568_v62 = vld [vmem:[#allocation2 + $0x21] ss:$2 sm:$0xff]  ;;  %v881_v63 = vpop.f32.mrf.mxu0  ;;  %v1175_v50 = vpop.f32.mrf.mxu2 }
  0xc8   : > { %v1663_v1 = vmax.f32 %v1504_v61, %v1568_v62  ;;  %1254 = vst.msk [vmem:[#allocation2 + $0x30] sm:$0xff] %vm1247_vm1, %v881_v63  ;;  %v423_v62 = vld [vmem:[%s5822_s29 + $0x2e0] sm:$0xff] }
  0xc9   : > { %1352 = vst.msk [vmem:[#allocation2 + $0x340] sm:$0xff] %vm1247_vm1, %v1175_v50  ;;  %5181 = vmatmul.msk.f32.gmra.mxu1 %vm461_vm0, %v423_v62  ;;  %v458_v50 = vld [vmem:[%s5822_s29 + $0x3f8] sm:$0xff] }
  0xca   : > { %v1695_v3 = vmax.f32 %v1631_v0, %v1663_v1  ;;  %5111 = vmatmul.msk.f32.gmra.mxu0 %vm461_vm0, %v353_v60  ;;  %v5264_v0 = vld [vmem:[%s7905_s3 + $0x138] sm:$0xff] }
  0xcb   : > { %2886 = vmatpush.msrb.mxu3 %v5264_v0 }
  0xcc   : > { %v1731_v4 = vadd.f32 %v5981_v2, %v1695_v3 }
  0xce   : > { %v1763_v5 = vmax.f32 %v1731_v4, 0.0  ;;  %v455_v4 = vld [vmem:[%s5822_s29 + $0x3e0] sm:$0xff] }
  0xcf   : > { %v884_v7 = vpop.f32.mrf.mxu0  ;;  %v1178_v58 = vpop.f32.mrf.mxu2  ;;  %5213 = vmatmul.msk.f32.gmra.mxu3 %vm461_vm0, %v455_v4  ;;  %v2138_v4 = vld [vmem:[%s7905_s3 + $0x40] sm:$0xff] }
  0xd0   : > { %1255 = vst.msk [vmem:[#allocation2 + $0x38] sm:$0xff] %vm1247_vm1, %v884_v7 }
  0xd1   : > { %1842 = vst.msk [vmem:[#allocation3 + $0x28] sm:$0xff] %vm1247_vm1, %v1763_v5  ;;  %5182 = vmatmul.msk.f32.gmra.mxu1 %vm461_vm0, %v424_v9 }
  0xd2   : > { %5112 = vmatmul.msk.f32.gmra.mxu0 %vm461_vm0, %v354_v8  ;;  %1353 = vst.msk [vmem:[#allocation2 + $0x348] sm:$0xff] %vm1247_vm1, %v1178_v58  ;;  %v5263_v8 = vld [vmem:[%s7905_s3 + $0x130] sm:$0xff]  ;;  %v2141_v58 = vld [vmem:[%s7905_s3 + $0x58] sm:$0xff] }
  0xd3   : > { %2887 = vmatpush.msrb.mxu3 %v5263_v8  ;;  %v2136_v8 = vld [vmem:[%s7905_s3 + $0x30] sm:$0xff] }
  0xd5   : > { %2888 = vmatpush.msrb.mxu3 %v5262_v10  ;;  %v367_v10 = vld [vmem:[%s5822_s29 + $0x120] sm:$0xff] }
  0xd7   : > { %v1506_v12 = vld [vmem:[#allocation2 + $0x30] ss:$2 sm:$0xff]  ;;  %v1570_v13 = vld [vmem:[#allocation2 + $0x31] ss:$2 sm:$0xff]  ;;  %v887_v14 = vpop.f32.mrf.mxu0  ;;  %v1181_v7 = vpop.f32.mrf.mxu2  ;;  %2889 = vmatpush.msrb.mxu3 %v5261_v15 }
  0xd8   : > { %v1664_v17 = vmax.f32 %v1506_v12, %v1570_v13  ;;  %1256 = vst.msk [vmem:[#allocation2 + $0x40] sm:$0xff] %vm1247_vm1, %v887_v14  ;;  %v6019_v18 = vld [vmem:[#allocation3 + $0x28] sm:$0xff]  ;;  %v363_v13 = vld [vmem:[%s5822_s29 + $0x100] sm:$0xff]  ;;  %v1907_v14 = vld [vmem:[#allocation3 + $0x10] sm:$0xff] }
  0xd9   : > { %2637 = vrot.lane.b32.xlu0 %v6019_v18, %s5709_s25  ;;  %1354 = vst.msk [vmem:[#allocation2 + $0x350] sm:$0xff] %vm1247_vm1, %v1181_v7  ;;  %2890 = vmatpush.msrb.mxu3 %v5260_v25  ;;  %v2137_v7 = vld [vmem:[%s7905_s3 + $0x38] sm:$0xff] }
  0xda   : > { %v1696_v20 = vmax.f32 %v1632_v16, %v1664_v17  ;;  %5113 = vmatmul.msk.f32.gmra.mxu0 %vm461_vm0, %v355_v11 }
  0xdc   : > { %v1732_v21 = vadd.f32 %v5981_v2, %v1696_v20 }
  0xde   : > { %v1764_v26 = vmax.f32 %v1732_v21, 0.0  ;;  %v456_v21 = vld [vmem:[%s5822_s29 + $0x3e8] sm:$0xff] }
  0xdf   : > { %v890_v23 = vpop.f32.mrf.mxu0  ;;  %v1184_v20 = vpop.f32.mrf.mxu2  ;;  %5214 = vmatmul.msk.f32.gmra.mxu3 %vm461_vm0, %v456_v21  ;;  %v2131_v21 = vld [vmem:[%s7905_s3 + $0x8] sm:$0xff] }
  0xe0   : > { %1257 = vst.msk [vmem:[#allocation2 + $0x48] sm:$0xff] %vm1247_vm1, %v890_v23 }
  0xe1   : > { %1843 = vst.msk [vmem:[#allocation3 + $0x30] sm:$0xff] %vm1247_vm1, %v1764_v26 }
  0xe2   : > { %5114 = vmatmul.msk.f32.gmra.mxu0 %vm461_vm0, %v356_v24  ;;  %1355 = vst.msk [vmem:[#allocation2 + $0x358] sm:$0xff] %vm1247_vm1, %v1184_v20  ;;  %v368_v20 = vld [vmem:[%s5822_s29 + $0x128] sm:$0xff] }
  0xe7   : > { %v893_v27 = vpop.f32.mrf.mxu0  ;;  %v1380_v52 = vld [vmem:[#allocation2 + $0x40] ss:$2 sm:$0xff]  ;;  %v1444_v53 = vld [vmem:[#allocation2 + $0x41] ss:$2 sm:$0xff]  ;;  %v1187_v38 = vpop.f32.mrf.mxu2  ;;  %5215 = vmatmul.msk.f32.gmra.mxu3 %vm461_vm0, %v457_v35 }
  0xe8   : > { %1258 = vst.msk [vmem:[#allocation2 + $0x50] sm:$0xff] %vm1247_vm1, %v893_v27  ;;  %v1940_v32 = vld [vmem:[#allocation3 + $0x29] sm:$0xff]  ;;  %v1941_v39 = vld [vmem:[#allocation3 + $0x31] sm:$0xff]  ;;  %v1633_v60 = vmax.f32 %v1380_v52, %v1444_v53 }
  0xe9   : > { %v6061_v33 = vld [vmem:[#allocation3 + $0x30] sm:$0xff]  ;;  %5219 = vmatmul.msk.f32.gmra.mxu2 %vm1247_vm1, %v1940_v32  ;;  %v5259_v27 = vld [vmem:[%s7905_s3 + $0x110] sm:$0xff]  ;;  %v5257_v32 = vld [vmem:[%s7905_s3 + $0x100] sm:$0xff]  ;;  %1356 = vst.msk [vmem:[#allocation2 + $0x360] sm:$0xff] %vm1247_vm1, %v1187_v38 }
  0xea   : > { %5115 = vmatmul.msk.f32.gmra.mxu0 %vm461_vm0, %v357_v28  ;;  %v5481_v34 = vpack.i.bf16 %v6061_v33, %v1906_v31  ;;  %v425_v28 = vld [vmem:[%s5822_s29 + $0x2f0] sm:$0xff]  ;;  %2891 = vmatpush.msrb.mxu3 %v5259_v27 }
  0xeb   : > { %5183 = vmatmul.msk.f32.gmra.mxu1 %vm461_vm0, %v425_v28 }
  0xec   : > { %5482 = vrot.lane.b32.xlu0 %v5481_v34, %s5709_s25  ;;  %2892 = vmatpush.msrb.mxu3 %v5258_v30  ;;  %v369_v30 = vld [vmem:[%s5822_s29 + $0x130] sm:$0xff] }
  0xee   : > { %2893 = vmatpush.msrb.mxu3 %v5257_v32 }
  0xef   : > { %v896_v36 = vpop.f32.mrf.mxu0  ;;  %5216 = vmatmul.msk.f32.gmra.mxu3 %vm461_vm0, %v458_v50  ;;  %v371_v50 = vld [vmem:[%s5822_s29 + $0x140] sm:$0xff] }
  0xf0   : > { %1259 = vst.msk [vmem:[#allocation2 + $0x58] sm:$0xff] %vm1247_vm1, %v896_v36 }
  0xf1   : > { %5220 = vmatmul.msk.f32.gmra.mxu2 %vm1247_vm1, %v1941_v39  ;;  %v5256_v39 = vld [vmem:[%s7905_s3 + $0xf8] sm:$0xff] }
  0xf2   : > { %5116 = vmatmul.msk.f32.gmra.mxu0 %vm461_vm0, %v358_v37  ;;  %v364_v37 = vld [vmem:[%s5822_s29 + $0x108] sm:$0xff]  ;;  %2894 = vmatpush.msrb.mxu3 %v5256_v39 }
  0xf4   : > { %2895 = vmatpush.msrb.mxu3 %v5255_v40 }
  0xf6   : > { %2896 = vmatpush.msrb.mxu3 %v5254_v43 }
  0xf7   : > { %v899_v41 = vpop.f32.mrf.mxu0  ;;  %v1382_v11 = vld [vmem:[#allocation2 + $0x50] ss:$2 sm:$0xff]  ;;  %v1446_v12 = vld [vmem:[#allocation2 + $0x51] ss:$2 sm:$0xff] }
  0xf8   : > { %1260 = vst.msk [vmem:[#allocation2 + $0x60] sm:$0xff] %vm1247_vm1, %v899_v41  ;;  %v1634_v22 = vmax.f32 %v1382_v11, %v1446_v12  ;;  %v426_v41 = vld [vmem:[%s5822_s29 + $0x2f8] sm:$0xff]  ;;  %2897 = vmatpush.msrb.mxu3 %v5253_v46  ;;  %v2135_v12 = vld [vmem:[%s7905_s3 + $0x28] sm:$0xff] }
  0xf9   : > { %5184 = vmatmul.msk.f32.gmra.mxu1 %vm461_vm0, %v426_v41 }
  0xfa   : > { %5117 = vmatmul.msk.f32.gmra.mxu0 %vm461_vm0, %v359_v42  ;;  %v2145_v42 = vld [vmem:[%s7905_s3 + $0x78] sm:$0xff] }
  0xfb   : > { %2250 = vmatpush.msrb.mxu1 %v2145_v42  ;;  %v370_v42 = vld [vmem:[%s5822_s29 + $0x138] sm:$0xff] }
  0xfd   : > { %2251 = vmatpush.msrb.mxu1 %v2144_v44 }
  0xff   : > { %v902_v48 = vpop.f32.mrf.mxu0 }
 0x100   : > { %1261 = vst.msk [vmem:[#allocation2 + $0x68] sm:$0xff] %vm1247_vm1, %v902_v48  ;;  %v365_v48 = vld [vmem:[%s5822_s29 + $0x110] sm:$0xff] }
 0x102   : > { %5118 = vmatmul.msk.f32.gmra.mxu0 %vm461_vm0, %v360_v49  ;;  %v1190_v49 = vpop.f32.mrf.mxu2 }
 0x103   : > { %1357 = vst.msk [vmem:[#allocation2 + $0x368] sm:$0xff] %vm1247_vm1, %v1190_v49 }
 0x107   : > { %v1508_v55 = vld [vmem:[#allocation2 + $0x60] ss:$2 sm:$0xff]  ;;  %v1572_v56 = vld [vmem:[#allocation2 + $0x61] ss:$2 sm:$0xff]  ;;  %v905_v57 = vpop.f32.mrf.mxu0 }
 0x108   : > { %v1665_v61 = vmax.f32 %v1508_v55, %v1572_v56  ;;  %1262 = vst.msk [vmem:[#allocation2 + $0x70] sm:$0xff] %vm1247_vm1, %v905_v57  ;;  %v5252_v55 = vld [vmem:[%s7905_s3 + $0xd8] sm:$0xff]  ;;  %v5251_v56 = vld [vmem:[%s7905_s3 + $0xd0] sm:$0xff]  ;;  %v427_v57 = vld [vmem:[%s5822_s29 + $0x300] sm:$0xff] }
 0x109   : > { %2898 = vmatpush.msrb.mxu3 %v5252_v55  ;;  %5185 = vmatmul.msk.f32.gmra.mxu1 %vm461_vm0, %v427_v57 }
 0x10a   : > { %v1697_v63 = vmax.f32 %v1633_v60, %v1665_v61  ;;  %5119 = vmatmul.msk.f32.gmra.mxu0 %vm461_vm0, %v361_v54  ;;  %v2143_v54 = vld [vmem:[%s7905_s3 + $0x68] sm:$0xff]  ;;  %v2140_v60 = vld [vmem:[%s7905_s3 + $0x50] sm:$0xff]  ;;  %v5249_v61 = vld [vmem:[%s7905_s3 + $0xc0] sm:$0xff]  ;;  %v1193_v0 = vpop.f32.mrf.mxu2 }
 0x10b   : > { %2252 = vmatpush.msrb.mxu1 %v2143_v54  ;;  %2899 = vmatpush.msrb.mxu3 %v5251_v56  ;;  %1358 = vst.msk [vmem:[#allocation2 + $0x370] sm:$0xff] %vm1247_vm1, %v1193_v0  ;;  %v6287_v0 = vld [vmem:[#allocation3 + $0x2f] sm:$0xff] }
 0x10c   : > { %v1733_v1 = vadd.f32 %v5981_v2, %v1697_v63  ;;  %v366_v63 = vld [vmem:[%s5822_s29 + $0x118] sm:$0xff] }
 0x10d   : > { %2900 = vmatpush.msrb.mxu3 %v5250_v59 }
 0x10e   : > { %v1765_v3 = vmax.f32 %v1733_v1, 0.0  ;;  %v2139_v1 = vld [vmem:[%s7905_s3 + $0x48] sm:$0xff] }
 0x10f   : > { %v908_v5 = vpop.f32.mrf.mxu0  ;;  %2901 = vmatpush.msrb.mxu3 %v5249_v61 }
 0x110   : > { %1263 = vst.msk [vmem:[#allocation2 + $0x78] sm:$0xff] %vm1247_vm1, %v908_v5  ;;  %v1199_v5 = vpop.f32.mrf.mxu3 }
 0x111   : > { %1844 = vst.msk [vmem:[#allocation3 + $0x48] sm:$0xff] %vm1247_vm1, %v1765_v3 }
 0x112   : > { %5120 = vmatmul.msk.f32.gmra.mxu0 %vm461_vm0, %v362_v6  ;;  %v428_v6 = vld [vmem:[%s5822_s29 + $0x308] sm:$0xff]  ;;  %1360 = vst.msk [vmem:[#allocation2 + $0x380] sm:$0xff] %vm1247_vm1, %v1199_v5  ;;  %v1196_v11 = vpop.f32.mrf.mxu2 }
 0x113   : > { %5186 = vmatmul.msk.f32.gmra.mxu1 %vm461_vm0, %v428_v6  ;;  %1359 = vst.msk [vmem:[#allocation2 + $0x378] sm:$0xff] %vm1247_vm1, %v1196_v11  ;;  %v373_v6 = vld [vmem:[%s5822_s29 + $0x150] sm:$0xff] }
 0x117   : > { %v1510_v16 = vld [vmem:[#allocation2 + $0x70] ss:$2 sm:$0xff]  ;;  %v1574_v17 = vld [vmem:[#allocation2 + $0x71] ss:$2 sm:$0xff]  ;;  %v911_v19 = vpop.f32.mrf.mxu0 }
 0x118   : > { %v1666_v23 = vmax.f32 %v1510_v16, %v1574_v17  ;;  %1264 = vst.msk [vmem:[#allocation2 + $0x80] sm:$0xff] %vm1247_vm1, %v911_v19  ;;  %v6124_v24 = vld [vmem:[#allocation3 + $0x48] sm:$0xff]  ;;  %v1202_v15 = vpop.f32.mrf.mxu3  ;;  %v2133_v16 = vld [vmem:[%s7905_s3 + $0x18] sm:$0xff] }
 0x119   : > { %v5486_v26 = vpack.i.bf16 %v6124_v24, %v1907_v14  ;;  %v429_v14 = vld [vmem:[%s5822_s29 + $0x310] sm:$0xff]  ;;  %1361 = vst.msk [vmem:[#allocation2 + $0x388] sm:$0xff] %vm1247_vm1, %v1202_v15 }
 0x11a   : > { %v1698_v29 = vmax.f32 %v1634_v22, %v1666_v23  ;;  %5121 = vmatmul.msk.f32.gmra.mxu0 %vm461_vm0, %v363_v13  ;;  %v2134_v13 = vld [vmem:[%s7905_s3 + $0x20] sm:$0xff]  ;;  %v2132_v17 = vld [vmem:[%s7905_s3 + $0x10] sm:$0xff] }
 0x11b   : > { %5487 = vrot.lane.b32.xlu1 %v5486_v26, %s5709_s25  ;;  %5187 = vmatmul.msk.f32.gmra.mxu1 %vm461_vm0, %v429_v14  ;;  %v2130_v22 = vld [vmem:[%s7905_s3] sm:$0xff]  ;;  %v1130_v14 = vpop.f32.mrf.mxu1 }
 0x11c   : > { %v1734_v31 = vadd.f32 %v5981_v2, %v1698_v29  ;;  %1337 = vst.msk [vmem:[#allocation2 + $0x2c8] sm:$0xff] %vm1247_vm1, %v1130_v14 }
 0x11e   : > { %v1766_v34 = vmax.f32 %v1734_v31, 0.0 }
 0x11f   : > { %v914_v36 = vpop.f32.mrf.mxu0 }
 0x120   : > { %1265 = vst.msk [vmem:[#allocation2 + $0x88] sm:$0xff] %vm1247_vm1, %v914_v36  ;;  %v1205_v23 = vpop.f32.mrf.mxu3  ;;  %v6263_v36 = vld [vmem:[#allocation3 + $0x27] sm:$0xff] }
 0x121   : > { %1845 = vst.msk [vmem:[#allocation3 + $0x50] sm:$0xff] %vm1247_vm1, %v1766_v34 }
 0x122   : > { %5122 = vmatmul.msk.f32.gmra.mxu0 %vm461_vm0, %v364_v37  ;;  %1362 = vst.msk [vmem:[#allocation2 + $0x390] sm:$0xff] %vm1247_vm1, %v1205_v23 }
 0x127   : > { %v917_v47 = vpop.f32.mrf.mxu0  ;;  %v1384_v25 = vld [vmem:[#allocation2 + $0x80] ss:$2 sm:$0xff]  ;;  %v1448_v26 = vld [vmem:[#allocation2 + $0x81] ss:$2 sm:$0xff] }
 0x128   : > { %1266 = vst.msk [vmem:[#allocation2 + $0x90] sm:$0xff] %vm1247_vm1, %v917_v47  ;;  %v1942_v51 = vld [vmem:[#allocation3 + $0x49] sm:$0xff]  ;;  %v1943_v3 = vld [vmem:[#allocation3 + $0x51] sm:$0xff]  ;;  %v1635_v31 = vmax.f32 %v1384_v25, %v1448_v26  ;;  %v1208_v37 = vpop.f32.mrf.mxu3 }
 0x129   : > { %v6176_v52 = vld [vmem:[#allocation3 + $0x50] sm:$0xff]  ;;  %5221 = vmatmul.msk.f32.gmra.mxu2 %vm1247_vm1, %v1942_v51  ;;  %1363 = vst.msk [vmem:[#allocation2 + $0x398] sm:$0xff] %vm1247_vm1, %v1208_v37 }
 0x12a   : > { %v5491_v53 = vpack.i.bf16 %v6176_v52, %v6019_v18  ;;  %5123 = vmatmul.msk.f32.gmra.mxu0 %vm461_vm0, %v365_v48  ;;  %v2142_v18 = vld [vmem:[%s7905_s3 + $0x60] sm:$0xff] }
 0x12b   : > { %2253 = vmatpush.msrb.mxu1 %v2142_v18 }
 0x12c   : > { %5492 = vrot.lane.b32.xlu1 %v5491_v53, %s5709_s25 }
 0x12d   : > { %2254 = vmatpush.msrb.mxu1 %v2141_v58 }
 0x12f   : > { %v920_v62 = vpop.f32.mrf.mxu0  ;;  %2255 = vmatpush.msrb.mxu1 %v2140_v60  ;;  %v372_v60 = vld [vmem:[%s5822_s29 + $0x148] sm:$0xff] }
 0x130   : > { %1267 = vst.msk [vmem:[#allocation2 + $0x98] sm:$0xff] %vm1247_vm1, %v920_v62  ;;  %v1211_v43 = vpop.f32.mrf.mxu3  ;;  %v1874_v62 = vld [vmem:[#allocation3 + $0x7] sm:$0xff] }
 0x131   : > { %5222 = vmatmul.msk.f32.gmra.mxu2 %vm1247_vm1, %v1943_v3  ;;  %2256 = vmatpush.msrb.mxu1 %v2139_v1  ;;  %1364 = vst.msk [vmem:[#allocation2 + $0x3a0] sm:$0xff] %vm1247_vm1, %v1211_v43 }
 0x132   : > { %5124 = vmatmul.msk.f32.gmra.mxu0 %vm461_vm0, %v366_v63 }
 0x133   : > { %2257 = vmatpush.msrb.mxu1 %v2138_v4 }
 0x135   : > { %2258 = vmatpush.msrb.mxu1 %v2137_v7 }
 0x137   : > { %v923_v9 = vpop.f32.mrf.mxu0  ;;  %2259 = vmatpush.msrb.mxu1 %v2136_v8  ;;  %v1386_v44 = vld [vmem:[#allocation2 + $0x90] ss:$2 sm:$0xff]  ;;  %v1450_v46 = vld [vmem:[#allocation2 + $0x91] ss:$2 sm:$0xff] }
 0x138   : > { %1268 = vst.msk [vmem:[#allocation2 + $0xa0] sm:$0xff] %vm1247_vm1, %v923_v9  ;;  %v1636_v51 = vmax.f32 %v1386_v44, %v1450_v46  ;;  %v1214_v57 = vpop.f32.mrf.mxu3  ;;  %v6326_v46 = vld [vmem:[#allocation3 + $0x47] sm:$0xff] }
 0x139   : > { %2260 = vmatpush.msrb.mxu1 %v2135_v12  ;;  %1365 = vst.msk [vmem:[#allocation2 + $0x3a8] sm:$0xff] %vm1247_vm1, %v1214_v57  ;;  %v374_v12 = vld [vmem:[%s5822_s29 + $0x158] sm:$0xff] }
 0x13a   : > { %5125 = vmatmul.msk.f32.gmra.mxu0 %vm461_vm0, %v367_v10 }
 0x13b   : > { %2261 = vmatpush.msrb.mxu1 %v2134_v13 }
 0x13d   : > { %2262 = vmatpush.msrb.mxu1 %v2133_v16  ;;  %v375_v16 = vld [vmem:[%s5822_s29 + $0x160] sm:$0xff] }
 0x13f   : > { %v926_v19 = vpop.f32.mrf.mxu0  ;;  %2263 = vmatpush.msrb.mxu1 %v2132_v17  ;;  %v1133_v17 = vpop.f32.mrf.mxu1 }
 0x140   : > { %1269 = vst.msk [vmem:[#allocation2 + $0xa8] sm:$0xff] %vm1247_vm1, %v926_v19  ;;  %v1217_v4 = vpop.f32.mrf.mxu3 }
 0x141   : > { %2264 = vmatpush.msrb.mxu1 %v2131_v21  ;;  %1366 = vst.msk [vmem:[#allocation2 + $0x3b0] sm:$0xff] %vm1247_vm1, %v1217_v4  ;;  %v376_v21 = vld [vmem:[%s5822_s29 + $0x168] sm:$0xff] }
 0x142   : > { %5126 = vmatmul.msk.f32.gmra.mxu0 %vm461_vm0, %v368_v20  ;;  %1338 = vst.msk [vmem:[#allocation2 + $0x2d0] sm:$0xff] %vm1247_vm1, %v1133_v17 }
 0x143   : > { %2265 = vmatpush.msrb.mxu1 %v2130_v22 }
 0x147   : > { %v1512_v27 = vld [vmem:[#allocation2 + $0xa0] ss:$2 sm:$0xff]  ;;  %v1576_v28 = vld [vmem:[#allocation2 + $0xa1] ss:$2 sm:$0xff]  ;;  %v929_v29 = vpop.f32.mrf.mxu0  ;;  %v1136_v22 = vpop.f32.mrf.mxu1 }
 0x148   : > { %v1667_v32 = vmax.f32 %v1512_v27, %v1576_v28  ;;  %1270 = vst.msk [vmem:[#allocation2 + $0xb0] sm:$0xff] %vm1247_vm1, %v929_v29  ;;  %v1220_v10 = vpop.f32.mrf.mxu3 }
 0x149   : > { %1367 = vst.msk [vmem:[#allocation2 + $0x3b8] sm:$0xff] %vm1247_vm1, %v1220_v10  ;;  %v380_v10 = vld [vmem:[%s5822_s29 + $0x188] sm:$0xff] }
 0x14a   : > { %v1699_v34 = vmax.f32 %v1635_v31, %v1667_v32  ;;  %5127 = vmatmul.msk.f32.gmra.mxu0 %vm461_vm0, %v369_v30  ;;  %1339 = vst.msk [vmem:[#allocation2 + $0x2d8] sm:$0xff] %vm1247_vm1, %v1136_v22  ;;  %v377_v30 = vld [vmem:[%s5822_s29 + $0x170] sm:$0xff] }
 0x14b   : > { %v2638_v35 = vpop.permute.xlu0 %2637 }
 0x14c   : > { %v2733_v38 = vsel %vm1247_vm1, %v6263_v36, %v2638_v35  ;;  %v1735_v39 = vadd.f32 %v5981_v2, %v1699_v34 }
 0x14d   : > { %2902 = vmatmul.f32.vlgmr.msrb.gmra.mxu3 %v2733_v38 }
 0x14e   : > { %v1767_v40 = vmax.f32 %v1735_v39, 0.0 }
 0x14f   : > { %v932_v41 = vpop.f32.mrf.mxu0  ;;  %v1139_v35 = vpop.f32.mrf.mxu1 }
 0x150   : > { %1271 = vst.msk [vmem:[#allocation2 + $0xb8] sm:$0xff] %vm1247_vm1, %v932_v41 }
 0x151   : > { %1846 = vst.msk [vmem:[#allocation3 + $0x68] sm:$0xff] %vm1247_vm1, %v1767_v40  ;;  %v1875_v40 = vld [vmem:[#allocation3 + $0xf] sm:$0xff] }
 0x152   : > { %5128 = vmatmul.msk.f32.gmra.mxu0 %vm461_vm0, %v370_v42  ;;  %1340 = vst.msk [vmem:[#allocation2 + $0x2e0] sm:$0xff] %vm1247_vm1, %v1139_v35  ;;  %v384_v35 = vld [vmem:[%s5822_s29 + $0x1a8] sm:$0xff] }
 0x157   : > { %v1514_v47 = vld [vmem:[#allocation2 + $0xb0] ss:$2 sm:$0xff]  ;;  %v1578_v48 = vld [vmem:[#allocation2 + $0xb1] ss:$2 sm:$0xff]  ;;  %v935_v49 = vpop.f32.mrf.mxu0 }
 0x158   : > { %v1668_v53 = vmax.f32 %v1514_v47, %v1578_v48  ;;  %1272 = vst.msk [vmem:[#allocation2 + $0xc0] sm:$0xff] %vm1247_vm1, %v935_v49  ;;  %v6276_v54 = vld [vmem:[#allocation3 + $0x68] sm:$0xff]  ;;  %v378_v47 = vld [vmem:[%s5822_s29 + $0x178] sm:$0xff] }
 0x159   : > { %v5496_v55 = vpack.i.bf16 %v6276_v54, %v6061_v33 }
 0x15a   : > { %v1700_v18 = vmax.f32 %v1636_v51, %v1668_v53  ;;  %5129 = vmatmul.msk.f32.gmra.mxu0 %vm461_vm0, %v371_v50  ;;  %v1142_v50 = vpop.f32.mrf.mxu1 }
 0x15b   : > { %5497 = vrot.lane.b32.xlu2 %v5496_v55, %s5709_s25  ;;  %1341 = vst.msk [vmem:[#allocation2 + $0x2e8] sm:$0xff] %vm1247_vm1, %v1142_v50 }
 0x15c   : > { %v1736_v56 = vadd.f32 %v5981_v2, %v1700_v18 }
 0x15e   : > { %v1768_v58 = vmax.f32 %v1736_v56, 0.0  ;;  %v5483_v61 = vpop.permute.xlu0 %5482 }
 0x15f   : > { %v938_v59 = vpop.f32.mrf.mxu0  ;;  %v5485_v63 = vunpack.i.h.bf16 %v5483_v61  ;;  %v5484_v33 = vunpack.i.l.bf16 %v5483_v61 }
 0x160   : > { %1273 = vst.msk [vmem:[#allocation2 + $0xc8] sm:$0xff] %vm1247_vm1, %v938_v59 }
 0x161   : > { %1847 = vst.msk [vmem:[#allocation3 + $0x70] sm:$0xff] %vm1247_vm1, %v1768_v58  ;;  %v2098_v1 = vsel %vm1247_vm1, %v1874_v62, %v5484_v33  ;;  %v2734_v3 = vsel %vm1247_vm1, %v6287_v0, %v5485_v63  ;;  %v379_v58 = vld [vmem:[%s5822_s29 + $0x180] sm:$0xff] }
 0x162   : > { %5130 = vmatmul.msk.f32.gmra.mxu0 %vm461_vm0, %v372_v60  ;;  %2266 = vmatmul.f32.vlgmr.msrb.gmra.mxu1 %v2098_v1 }
 0x163   : > { %2905 = vmatmul.f32.gmra.mxu3 %v2734_v3 }
 0x167   : > { %v941_v5 = vpop.f32.mrf.mxu0  ;;  %v1388_v25 = vld [vmem:[#allocation2 + $0xc0] ss:$2 sm:$0xff]  ;;  %v1452_v26 = vld [vmem:[#allocation2 + $0xc1] ss:$2 sm:$0xff] }
 0x168   : > { %1274 = vst.msk [vmem:[#allocation2 + $0xd0] sm:$0xff] %vm1247_vm1, %v941_v5  ;;  %v1944_v7 = vld [vmem:[#allocation3 + $0x69] sm:$0xff]  ;;  %v1945_v13 = vld [vmem:[#allocation3 + $0x71] sm:$0xff]  ;;  %v1637_v31 = vmax.f32 %v1388_v25, %v1452_v26  ;;  %v1145_v33 = vpop.f32.mrf.mxu1 }
 0x169   : > { %v6296_v8 = vld [vmem:[#allocation3 + $0x70] sm:$0xff]  ;;  %5223 = vmatmul.msk.f32.gmra.mxu2 %vm1247_vm1, %v1944_v7  ;;  %1342 = vst.msk [vmem:[#allocation2 + $0x2f0] sm:$0xff] %vm1247_vm1, %v1145_v33  ;;  %v387_v33 = vld [vmem:[%s5822_s29 + $0x1c0] sm:$0xff] }
 0x16a   : > { %v5501_v9 = vpack.i.bf16 %v6296_v8, %v6124_v24  ;;  %5131 = vmatmul.msk.f32.gmra.mxu0 %vm461_vm0, %v373_v6  ;;  %v1223_v24 = vpop.f32.mrf.mxu3 }
 0x16b   : > { %1368 = vst.msk [vmem:[#allocation2 + $0x3c0] sm:$0xff] %vm1247_vm1, %v1223_v24  ;;  %v381_v24 = vld [vmem:[%s5822_s29 + $0x190] sm:$0xff] }
 0x16c   : > { %5502 = vrot.lane.b32.xlu2 %v5501_v9, %s5709_s25 }
 0x16f   : > { %v944_v11 = vpop.f32.mrf.mxu0 }
 0x170   : > { %1275 = vst.msk [vmem:[#allocation2 + $0xd8] sm:$0xff] %vm1247_vm1, %v944_v11 }
 0x171   : > { %5224 = vmatmul.msk.f32.gmra.mxu2 %vm1247_vm1, %v1945_v13 }
 0x172   : > { %5132 = vmatmul.msk.f32.gmra.mxu0 %vm461_vm0, %v374_v12  ;;  %v1226_v19 = vpop.f32.mrf.mxu3 }
 0x173   : > { %1369 = vst.msk [vmem:[#allocation2 + $0x3c8] sm:$0xff] %vm1247_vm1, %v1226_v19 }
 0x176   : > { %v1148_v12 = vpop.f32.mrf.mxu1 }
 0x177   : > { %v947_v15 = vpop.f32.mrf.mxu0  ;;  %v1390_v53 = vld [vmem:[#allocation2 + $0xd0] ss:$2 sm:$0xff]  ;;  %v1454_v55 = vld [vmem:[#allocation2 + $0xd1] ss:$2 sm:$0xff]  ;;  %1343 = vst.msk [vmem:[#allocation2 + $0x2f8] sm:$0xff] %vm1247_vm1, %v1148_v12 }
 0x178   : > { %1276 = vst.msk [vmem:[#allocation2 + $0xe0] sm:$0xff] %vm1247_vm1, %v947_v15  ;;  %v1638_v59 = vmax.f32 %v1390_v53, %v1454_v55  ;;  %v6413_v55 = vld [vmem:[%s7904_s2] ss:$0 sm:$0xff] }
 0x17a   : > { %5133 = vmatmul.msk.f32.gmra.mxu0 %vm461_vm0, %v375_v16  ;;  %v1229_v23 = vpop.f32.mrf.mxu3 }
 0x17b   : > { %1370 = vst.msk [vmem:[#allocation2 + $0x3d0] sm:$0xff] %vm1247_vm1, %v1229_v23 }
 0x17f   : > { %v950_v20 = vpop.f32.mrf.mxu0 }
 0x180   : > { %1277 = vst.msk [vmem:[#allocation2 + $0xe8] sm:$0xff] %vm1247_vm1, %v950_v20 }
 0x182   : > { %5134 = vmatmul.msk.f32.gmra.mxu0 %vm461_vm0, %v376_v21  ;;  %v1232_v38 = vpop.f32.mrf.mxu3  ;;  %v382_v21 = vld [vmem:[%s5822_s29 + $0x198] sm:$0xff] }
 0x183   : > { %1371 = vst.msk [vmem:[#allocation2 + $0x3d8] sm:$0xff] %vm1247_vm1, %v1232_v38 }
 0x186   : > { %v1151_v17 = vpop.f32.mrf.mxu1 }
 0x187   : > { %v1516_v27 = vld [vmem:[#allocation2 + $0xe0] ss:$2 sm:$0xff]  ;;  %v1580_v28 = vld [vmem:[#allocation2 + $0xe1] ss:$2 sm:$0xff]  ;;  %v953_v29 = vpop.f32.mrf.mxu0  ;;  %1344 = vst.msk [vmem:[#allocation2 + $0x300] sm:$0xff] %vm1247_vm1, %v1151_v17 }
 0x188   : > { %v1669_v32 = vmax.f32 %v1516_v27, %v1580_v28  ;;  %1278 = vst.msk [vmem:[#allocation2 + $0xf0] sm:$0xff] %vm1247_vm1, %v953_v29  ;;  %v6376_v28 = vld [vmem:[#allocation3 + $0x67] sm:$0xff]  ;;  %v383_v29 = vld [vmem:[%s5822_s29 + $0x1a0] sm:$0xff] }
 0x18a   : > { %v1701_v34 = vmax.f32 %v1637_v31, %v1669_v32  ;;  %5135 = vmatmul.msk.f32.gmra.mxu0 %vm461_vm0, %v377_v30  ;;  %v1235_v51 = vpop.f32.mrf.mxu3 }
 0x18b   : > { %1372 = vst.msk [vmem:[#allocation2 + $0x3e0] sm:$0xff] %vm1247_vm1, %v1235_v51 }
 0x18c   : > { %v1737_v37 = vadd.f32 %v5981_v2, %v1701_v34 }
 0x18d   : > { %v5488_v39 = vpop.permute.xlu1 %5487 }
 0x18e   : > { %v5490_v41 = vunpack.i.h.bf16 %v5488_v39  ;;  %v5489_v42 = vunpack.i.l.bf16 %v5488_v39  ;;  %v1769_v43 = vmax.f32 %v1737_v37, 0.0 }
 0x18f   : > { %v956_v44 = vpop.f32.mrf.mxu0 }
 0x190   : > { %1279 = vst.msk [vmem:[#allocation2 + $0xf8] sm:$0xff] %vm1247_vm1, %v956_v44  ;;  %v2099_v48 = vsel %vm1247_vm1, %v1875_v40, %v5489_v42  ;;  %v2735_v49 = vsel %vm1247_vm1, %v6326_v46, %v5490_v41  ;;  %v6395_v41 = vld [vmem:[#allocation3 + $0x6f] sm:$0xff] }
 0x191   : > { %2269 = vmatmul.f32.gmra.mxu1 %v2099_v48  ;;  %2908 = vmatmul.f32.gmra.mxu3 %v2735_v49  ;;  %1848 = vst.msk [vmem:[#allocation3 + $0x88] sm:$0xff] %vm1247_vm1, %v1769_v43 }
 0x192   : > { %5136 = vmatmul.msk.f32.gmra.mxu0 %vm461_vm0, %v378_v47  ;;  %v1238_v3 = vpop.f32.mrf.mxu3  ;;  %v385_v47 = vld [vmem:[%s5822_s29 + $0x1b0] sm:$0xff] }
 0x193   : > { %1373 = vst.msk [vmem:[#allocation2 + $0x3e8] sm:$0xff] %vm1247_vm1, %v1238_v3 }
 0x197   : > { %v1518_v18 = vld [vmem:[#allocation2 + $0xf0] ss:$2 sm:$0xff]  ;;  %v1582_v56 = vld [vmem:[#allocation2 + $0xf1] ss:$2 sm:$0xff]  ;;  %v959_v57 = vpop.f32.mrf.mxu0 }
 0x198   : > { %v1670_v60 = vmax.f32 %v1518_v18, %v1582_v56  ;;  %1280 = vst.msk [vmem:[#allocation2 + $0x100] sm:$0xff] %vm1247_vm1, %v959_v57  ;;  %v6339_v61 = vld [vmem:[#allocation3 + $0x88] sm:$0xff]  ;;  %v386_v57 = vld [vmem:[%s5822_s29 + $0x1b8] sm:$0xff] }
 0x199   : > { %v5506_v62 = vpack.i.bf16 %v6339_v61, %v6176_v52  ;;  %v6348_v52 = vld [vmem:[#allocation3 + $0x4f] sm:$0xff] }
 0x19a   : > { %v1702_v63 = vmax.f32 %v1638_v59, %v1670_v60  ;;  %5137 = vmatmul.msk.f32.gmra.mxu0 %vm461_vm0, %v379_v58  ;;  %v1241_v13 = vpop.f32.mrf.mxu3 }
 0x19b   : > { %5507 = vrot.lane.b32.xlu0 %v5506_v62, %s5709_s25  ;;  %1374 = vst.msk [vmem:[#allocation2 + $0x3f0] sm:$0xff] %vm1247_vm1, %v1241_v13 }
 0x19c   : > { %v1738_v1 = vadd.f32 %v5981_v2, %v1702_v63 }
 0x19e   : > { %v5493_v4 = vpop.permute.xlu1 %5492  ;;  %v1770_v7 = vmax.f32 %v1738_v1, 0.0 }
 0x19f   : > { %v5495_v5 = vunpack.i.h.bf16 %v5493_v4  ;;  %v5494_v6 = vunpack.i.l.bf16 %v5493_v4  ;;  %v962_v9 = vpop.f32.mrf.mxu0 }
 0x1a0   : > { %1281 = vst.msk [vmem:[#allocation2 + $0x108] sm:$0xff] %vm1247_vm1, %v962_v9 }
 0x1a1   : > { %v2100_v11 = vsel %vm1247_vm1, %v6263_v36, %v5494_v6  ;;  %v2736_v2 = vsel %vm1247_vm1, %v6348_v52, %v5495_v5  ;;  %1849 = vst.msk [vmem:[#allocation3 + $0x90] sm:$0xff] %vm1247_vm1, %v1770_v7 }
 0x1a2   : > { %2272 = vmatmul.f32.gmra.mxu1 %v2100_v11  ;;  %2911 = vmatmul.f32.gmra.mxu3 %v2736_v2  ;;  %v1244_v19 = vpop.f32.mrf.mxu3  ;;  %v388_v11 = vld [vmem:[%s5822_s29 + $0x1c8] sm:$0xff]  ;;  %v2380_v2 = vpop.f32.mrf.mxu2 }
 0x1a3   : > { %5138 = vmatmul.msk.f32.gmra.mxu0 %vm461_vm0, %v380_v10  ;;  %1375 = vst.msk [vmem:[#allocation2 + $0x3f8] sm:$0xff] %vm1247_vm1, %v1244_v19  ;;  %v390_v19 = vld [vmem:[%s5822_s29 + $0x1d8] sm:$0xff] }
 0x1a7   : > { %v965_v14 = vpop.f32.mrf.mxu0  ;;  %v1456_v37 = vld [vmem:[#allocation2 + $0x101] ss:$2 sm:$0xff] }
 0x1a8   : > { %1282 = vst.msk [vmem:[#allocation2 + $0x110] sm:$0xff] %vm1247_vm1, %v965_v14  ;;  %v1946_v36 = vld [vmem:[#allocation3 + $0x89] sm:$0xff]  ;;  %v1947_v22 = vld [vmem:[#allocation3 + $0x91] sm:$0xff] }
 0x1a9   : > { %v6362_v15 = vld [vmem:[#allocation3 + $0x90] sm:$0xff]  ;;  %5225 = vmatmul.msk.f32.gmra.mxu2 %vm1247_vm1, %v1946_v36  ;;  %v389_v14 = vld [vmem:[%s5822_s29 + $0x1d0] sm:$0xff] }
 0x1aa   : > { %v5511_v16 = vpack.i.bf16 %v6362_v15, %v6276_v54  ;;  %v1154_v54 = vpop.f32.mrf.mxu1 }
 0x1ab   : > { %5139 = vmatmul.msk.f32.gmra.mxu0 %vm461_vm0, %v381_v24  ;;  %1345 = vst.msk [vmem:[#allocation2 + $0x308] sm:$0xff] %vm1247_vm1, %v1154_v54  ;;  %v392_v54 = vld [vmem:[%s5822_s29 + $0x1e8] sm:$0xff] }
 0x1ac   : > { %5512 = vrot.lane.b32.xlu1 %v5511_v16, %s5709_s25 }
 0x1af   : > { %v968_v20 = vpop.f32.mrf.mxu0 }
 0x1b0   : > { %1283 = vst.msk [vmem:[#allocation2 + $0x118] sm:$0xff] %vm1247_vm1, %v968_v20 }
 0x1b1   : > { %5226 = vmatmul.msk.f32.gmra.mxu2 %vm1247_vm1, %v1947_v22  ;;  %v391_v22 = vld [vmem:[%s5822_s29 + $0x1e0] sm:$0xff] }
 0x1b2   : > { %v1157_v32 = vpop.f32.mrf.mxu1 }
 0x1b3   : > { %5140 = vmatmul.msk.f32.gmra.mxu0 %vm461_vm0, %v382_v21  ;;  %1346 = vst.msk [vmem:[#allocation2 + $0x310] sm:$0xff] %vm1247_vm1, %v1157_v32 }
 0x1b5   : > { %v5498_v23 = vpop.permute.xlu2 %5497 }
 0x1b6   : > { %v5500_v25 = vunpack.i.h.bf16 %v5498_v23  ;;  %v5499_v26 = vunpack.i.l.bf16 %v5498_v23 }
 0x1b7   : > { %v971_v27 = vpop.f32.mrf.mxu0  ;;  %v1394_v58 = vld [vmem:[#allocation2 + $0x110] ss:$2 sm:$0xff]  ;;  %v1458_v59 = vld [vmem:[#allocation2 + $0x111] ss:$2 sm:$0xff] }
 0x1b8   : > { %1284 = vst.msk [vmem:[#allocation2 + $0x120] sm:$0xff] %vm1247_vm1, %v971_v27  ;;  %v2101_v30 = vsel %vm1247_vm1, %v6287_v0, %v5499_v26  ;;  %v2737_v31 = vsel %vm1247_vm1, %v6376_v28, %v5500_v25  ;;  %v1392_v0 = vld [vmem:[#allocation2 + $0x100] ss:$2 sm:$0xff]  ;;  %v1640_v1 = vmax.f32 %v1394_v58, %v1458_v59 }
 0x1b9   : > { %2275 = vmatmul.f32.gmra.mxu1 %v2101_v30  ;;  %2914 = vmatmul.f32.gmra.mxu3 %v2737_v31  ;;  %v1639_v48 = vmax.f32 %v1392_v0, %v1456_v37  ;;  %v393_v30 = vld [vmem:[%s5822_s29 + $0x1f0] sm:$0xff]  ;;  %v2383_v37 = vpop.f32.mrf.mxu2 }
 0x1bb   : > { %5141 = vmatmul.msk.f32.gmra.mxu0 %vm461_vm0, %v383_v29 }
 0x1bf   : > { %v974_v34 = vpop.f32.mrf.mxu0 }
 0x1c0   : > { %1285 = vst.msk [vmem:[#allocation2 + $0x128] sm:$0xff] %vm1247_vm1, %v974_v34 }
 0x1c3   : > { %5142 = vmatmul.msk.f32.gmra.mxu0 %vm461_vm0, %v384_v35 }
 0x1c6   : > { %v5503_v38 = vpop.permute.xlu2 %5502 }
 0x1c7   : > { %v5505_v39 = vunpack.i.h.bf16 %v5503_v38  ;;  %v5504_v40 = vunpack.i.l.bf16 %v5503_v38  ;;  %v1520_v42 = vld [vmem:[#allocation2 + $0x120] ss:$2 sm:$0xff]  ;;  %v1584_v43 = vld [vmem:[#allocation2 + $0x121] ss:$2 sm:$0xff]  ;;  %v977_v44 = vpop.f32.mrf.mxu0 }
 0x1c8   : > { %v1671_v49 = vmax.f32 %v1520_v42, %v1584_v43  ;;  %1286 = vst.msk [vmem:[#allocation2 + $0x130] sm:$0xff] %vm1247_vm1, %v977_v44 }
 0x1c9   : > { %v2102_v50 = vsel %vm1247_vm1, %v6326_v46, %v5504_v40  ;;  %v2738_v51 = vsel %vm1247_vm1, %v6395_v41, %v5505_v39 }
 0x1ca   : > { %2278 = vmatmul.f32.gmra.mxu1 %v2102_v50  ;;  %2917 = vmatmul.f32.gmra.mxu3 %v2738_v51  ;;  %v1703_v53 = vmax.f32 %v1639_v48, %v1671_v49  ;;  %v394_v48 = vld [vmem:[%s5822_s29 + $0x1f8] sm:$0xff] }
 0x1cb   : > { %5143 = vmatmul.msk.f32.gmra.mxu0 %vm461_vm0, %v385_v47  ;;  %v6457_v47 = vld [vmem:[#allocation3 + $0x87] sm:$0xff] }
 0x1cc   : > { %v1739_v18 = vadd.f32 %v6413_v55, %v1703_v53 }
 0x1ce   : > { %v1771_v46 = vmax.f32 %v1739_v18, 0.0 }
 0x1cf   : > { %v980_v56 = vpop.f32.mrf.mxu0 }
 0x1d0   : > { %1287 = vst.msk [vmem:[#allocation2 + $0x138] sm:$0xff] %vm1247_vm1, %v980_v56 }
 0x1d1   : > { %1850 = vst.msk [vmem:[#allocation3 + $0xa8] sm:$0xff] %vm1247_vm1, %v1771_v46 }
 0x1d3   : > { %5144 = vmatmul.msk.f32.gmra.mxu0 %vm461_vm0, %v386_v57  ;;  %v395_v57 = vld [vmem:[%s5822_s29 + $0x200] sm:$0xff] }
 0x1d7   : > { %v1522_v60 = vld [vmem:[#allocation2 + $0x130] ss:$2 sm:$0xff]  ;;  %v1586_v62 = vld [vmem:[#allocation2 + $0x131] ss:$2 sm:$0xff]  ;;  %v983_v63 = vpop.f32.mrf.mxu0 }
 0x1d8   : > { %v1672_v3 = vmax.f32 %v1522_v60, %v1586_v62  ;;  %1288 = vst.msk [vmem:[#allocation2 + $0x140] sm:$0xff] %vm1247_vm1, %v983_v63  ;;  %v6422_v4 = vld [vmem:[#allocation3 + $0xa8] sm:$0xff] }
 0x1d9   : > { %v5516_v5 = vpack.i.bf16 %v6422_v4, %v6296_v8 }
 0x1da   : > { %v1704_v6 = vmax.f32 %v1640_v1, %v1672_v3  ;;  %v2386_v1 = vpop.f32.mrf.mxu2 }
 0x1db   : > { %5145 = vmatmul.msk.f32.gmra.mxu0 %vm461_vm0, %v387_v33  ;;  %5517 = vrot.lane.b32.xlu2 %v5516_v5, %s5709_s25 }
 0x1dc   : > { %v1740_v7 = vadd.f32 %v6413_v55, %v1704_v6 }
 0x1de   : > { %v1772_v9 = vmax.f32 %v1740_v7, 0.0 }
 0x1df   : > { %v986_v10 = vpop.f32.mrf.mxu0  ;;  %v2267_v12 = vpop.f32.mrf.mxu1 }
 0x1e0   : > { %1289 = vst.msk [vmem:[#allocation2 + $0x148] sm:$0xff] %vm1247_vm1, %v986_v10  ;;  %v2381_v13 = vadd.f32 %v2380_v2, %v2267_v12  ;;  %v396_v2 = vld [vmem:[%s5822_s29 + $0x208] sm:$0xff] }
 0x1e1   : > { %1851 = vst.msk [vmem:[#allocation3 + $0xb0] sm:$0xff] %vm1247_vm1, %v1772_v9 }
 0x1e2   : > { %2477 = vst.msk [vmem:[#allocation4] sm:$0xff] %vm2476_vm3, %v2381_v13 }
 0x1e3   : > { %5146 = vmatmul.msk.f32.gmra.mxu0 %vm461_vm0, %v388_v11  ;;  %v6477_v11 = vld [vmem:[#allocation3 + $0x8f] sm:$0xff] }
 0x1e7   : > { %v989_v8 = vpop.f32.mrf.mxu0  ;;  %v1396_v23 = vld [vmem:[#allocation2 + $0x140] ss:$2 sm:$0xff]  ;;  %v1460_v25 = vld [vmem:[#allocation2 + $0x141] ss:$2 sm:$0xff] }
 0x1e8   : > { %1290 = vst.msk [vmem:[#allocation2 + $0x150] sm:$0xff] %vm1247_vm1, %v989_v8  ;;  %v1948_v24 = vld [vmem:[#allocation3 + $0xa9] sm:$0xff]  ;;  %v1949_v20 = vld [vmem:[#allocation3 + $0xb1] sm:$0xff]  ;;  %v1641_v31 = vmax.f32 %v1396_v23, %v1460_v25 }
 0x1e9   : > { %v6436_v36 = vld [vmem:[#allocation3 + $0xb0] sm:$0xff]  ;;  %5227 = vmatmul.msk.f32.gmra.mxu2 %vm1247_vm1, %v1948_v24  ;;  %v397_v8 = vld [vmem:[%s5822_s29 + $0x210] sm:$0xff] }
 0x1ea   : > { %v5521_v16 = vpack.i.bf16 %v6436_v36, %v6339_v61  ;;  %v6501_v25 = vld [vmem:[#allocation3 + $0xa7] sm:$0xff] }
 0x1eb   : > { %5147 = vmatmul.msk.f32.gmra.mxu0 %vm461_vm0, %v389_v14 }
 0x1ec   : > { %5522 = vrot.lane.b32.xlu0 %v5521_v16, %s5709_s25 }
 0x1ef   : > { %v992_v17 = vpop.f32.mrf.mxu0 }
 0x1f0   : > { %1291 = vst.msk [vmem:[#allocation2 + $0x158] sm:$0xff] %vm1247_vm1, %v992_v17  ;;  %v398_v17 = vld [vmem:[%s5822_s29 + $0x218] sm:$0xff] }
 0x1f1   : > { %5228 = vmatmul.msk.f32.gmra.mxu2 %vm1247_vm1, %v1949_v20 }
 0x1f3   : > { %5148 = vmatmul.msk.f32.gmra.mxu0 %vm461_vm0, %v390_v19 }
 0x1f7   : > { %v995_v21 = vpop.f32.mrf.mxu0  ;;  %v1398_v51 = vld [vmem:[#allocation2 + $0x150] ss:$2 sm:$0xff]  ;;  %v1462_v53 = vld [vmem:[#allocation2 + $0x151] ss:$2 sm:$0xff] }
 0x1f8   : > { %1292 = vst.msk [vmem:[#allocation2 + $0x160] sm:$0xff] %vm1247_vm1, %v995_v21  ;;  %v1642_v58 = vmax.f32 %v1398_v51, %v1462_v53  ;;  %v2389_v21 = vpop.f32.mrf.mxu2  ;;  %v402_v51 = vld [vmem:[%s5822_s29 + $0x238] sm:$0xff] }
 0x1fb   : > { %5149 = vmatmul.msk.f32.gmra.mxu0 %vm461_vm0, %v391_v22 }
 0x1ff   : > { %v998_v61 = vpop.f32.mrf.mxu0 }
 0x200   : > { %1293 = vst.msk [vmem:[#allocation2 + $0x168] sm:$0xff] %vm1247_vm1, %v998_v61 }
 0x203   : > { %5150 = vmatmul.msk.f32.gmra.mxu0 %vm461_vm0, %v392_v54 }
 0x207   : > { %v1524_v26 = vld [vmem:[#allocation2 + $0x160] ss:$2 sm:$0xff]  ;;  %v1588_v27 = vld [vmem:[#allocation2 + $0x161] ss:$2 sm:$0xff]  ;;  %v1001_v29 = vpop.f32.mrf.mxu0 }
 0x208   : > { %v1673_v32 = vmax.f32 %v1524_v26, %v1588_v27  ;;  %1294 = vst.msk [vmem:[#allocation2 + $0x170] sm:$0xff] %vm1247_vm1, %v1001_v29  ;;  %v399_v26 = vld [vmem:[%s5822_s29 + $0x220] sm:$0xff] }
 0x20a   : > { %v1705_v34 = vmax.f32 %v1641_v31, %v1673_v32  ;;  %v400_v31 = vld [vmem:[%s5822_s29 + $0x228] sm:$0xff] }
 0x20b   : > { %5151 = vmatmul.msk.f32.gmra.mxu0 %vm461_vm0, %v393_v30 }
 0x20c   : > { %v1741_v35 = vadd.f32 %v6413_v55, %v1705_v34 }
 0x20d   : > { %v5508_v0 = vpop.permute.xlu0 %5507 }
 0x20e   : > { %v5510_v38 = vunpack.i.h.bf16 %v5508_v0  ;;  %v5509_v39 = vunpack.i.l.bf16 %v5508_v0  ;;  %v2270_v40 = vpop.f32.mrf.mxu1  ;;  %v1773_v42 = vmax.f32 %v1741_v35, 0.0  ;;  %v2392_v35 = vpop.f32.mrf.mxu2 }
 0x20f   : > { %v2384_v43 = vadd.f32 %v2383_v37, %v2270_v40  ;;  %v1004_v44 = vpop.f32.mrf.mxu0  ;;  %v401_v40 = vld [vmem:[%s5822_s29 + $0x230] sm:$0xff] }
 0x210   : > { %1295 = vst.msk [vmem:[#allocation2 + $0x178] sm:$0xff] %vm1247_vm1, %v1004_v44  ;;  %v2103_v49 = vsel %vm1247_vm1, %v6348_v52, %v5509_v39  ;;  %v2739_v50 = vsel %vm1247_vm1, %v6457_v47, %v5510_v38 }
 0x211   : > { %2478 = vst.msk [vmem:[#allocation4 + $0x8] sm:$0xff] %vm2476_vm3, %v2384_v43  ;;  %2281 = vmatmul.f32.gmra.mxu1 %v2103_v49  ;;  %2920 = vmatmul.f32.gmra.mxu3 %v2739_v50 }
 0x212   : > { %1852 = vst.msk [vmem:[#allocation3 + $0xc8] sm:$0xff] %vm1247_vm1, %v1773_v42 }
 0x213   : > { %5152 = vmatmul.msk.f32.gmra.mxu0 %vm461_vm0, %v394_v48 }
 0x217   : > { %v1526_v18 = vld [vmem:[#allocation2 + $0x170] ss:$2 sm:$0xff]  ;;  %v1590_v46 = vld [vmem:[#allocation2 + $0x171] ss:$2 sm:$0xff]  ;;  %v1007_v56 = vpop.f32.mrf.mxu0 }
 0x218   : > { %v1674_v59 = vmax.f32 %v1526_v18, %v1590_v46  ;;  %1296 = vst.msk [vmem:[#allocation2 + $0x180] sm:$0xff] %vm1247_vm1, %v1007_v56 }
 0x219   : > { %v6470_v52 = vld [vmem:[#allocation3 + $0xc8] sm:$0xff] }
 0x21a   : > { %v1706_v60 = vmax.f32 %v1642_v58, %v1674_v59  ;;  %v5526_v62 = vpack.i.bf16 %v6470_v52, %v6362_v15  ;;  %v403_v58 = vld [vmem:[%s5822_s29 + $0x240] sm:$0xff] }
 0x21b   : > { %5153 = vmatmul.msk.f32.gmra.mxu0 %vm461_vm0, %v395_v57 }
 0x21c   : > { %5527 = vrot.lane.b32.xlu1 %v5526_v62, %s5709_s25  ;;  %v1742_v63 = vadd.f32 %v6413_v55, %v1706_v60 }
 0x21e   : > { %v5513_v33 = vpop.permute.xlu1 %5512  ;;  %v1774_v7 = vmax.f32 %v1742_v63, 0.0 }
 0x21f   : > { %v5515_v3 = vunpack.i.h.bf16 %v5513_v33  ;;  %v5514_v5 = vunpack.i.l.bf16 %v5513_v33  ;;  %v2273_v6 = vpop.f32.mrf.mxu1 }
 0x220   : > { %v2387_v9 = vadd.f32 %v2386_v1, %v2273_v6  ;;  %v1010_v10 = vpop.f32.mrf.mxu0  ;;  %1853 = vst.msk [vmem:[#allocation3 + $0xd0] sm:$0xff] %vm1247_vm1, %v1774_v7 }
 0x221   : > { %1297 = vst.msk [vmem:[#allocation2 + $0x188] sm:$0xff] %vm1247_vm1, %v1010_v10  ;;  %v2104_v15 = vsel %vm1247_vm1, %v6376_v28, %v5514_v5  ;;  %v2740_v12 = vsel %vm1247_vm1, %v6477_v11, %v5515_v3  ;;  %v6532_v10 = vld [vmem:[#allocation3 + $0xaf] sm:$0xff] }
 0x222   : > { %2479 = vst.msk [vmem:[#allocation4 + $0x10] sm:$0xff] %vm2476_vm3, %v2387_v9  ;;  %2284 = vmatmul.f32.gmra.mxu1 %v2104_v15  ;;  %2923 = vmatmul.f32.gmra.mxu3 %v2740_v12 }
 0x223   : > { %5154 = vmatmul.msk.f32.gmra.mxu0 %vm461_vm0, %v396_v2  ;;  %v404_v2 = vld [vmem:[%s5822_s29 + $0x248] sm:$0xff] }
 0x227   : > { %v1950_v14 = vld [vmem:[#allocation3 + $0xc9] sm:$0xff]  ;;  %v1951_v19 = vld [vmem:[#allocation3 + $0xd1] sm:$0xff] }
 0x228   : > { %v1013_v13 = vpop.f32.mrf.mxu0  ;;  %v6490_v24 = vld [vmem:[#allocation3 + $0xd0] sm:$0xff]  ;;  %5229 = vmatmul.msk.f32.gmra.mxu2 %vm1247_vm1, %v1950_v14  ;;  %v1400_v32 = vld [vmem:[#allocation2 + $0x180] ss:$2 sm:$0xff]  ;;  %v1464_v34 = vld [vmem:[#allocation2 + $0x181] ss:$2 sm:$0xff] }
 0x229   : > { %1298 = vst.msk [vmem:[#allocation2 + $0x190] sm:$0xff] %vm1247_vm1, %v1013_v13  ;;  %v5531_v28 = vpack.i.bf16 %v6490_v24, %v6422_v4  ;;  %v1643_v42 = vmax.f32 %v1400_v32, %v1464_v34  ;;  %v405_v13 = vld [vmem:[%s5822_s29 + $0x250] sm:$0xff]  ;;  %v2395_v32 = vpop.f32.mrf.mxu2 }
 0x22b   : > { %5155 = vmatmul.msk.f32.gmra.mxu0 %vm461_vm0, %v397_v8  ;;  %5532 = vrot.lane.b32.xlu2 %v5531_v28, %s5709_s25 }
 0x230   : > { %v1016_v16 = vpop.f32.mrf.mxu0  ;;  %5230 = vmatmul.msk.f32.gmra.mxu2 %vm1247_vm1, %v1951_v19 }
 0x231   : > { %1299 = vst.msk [vmem:[#allocation2 + $0x198] sm:$0xff] %vm1247_vm1, %v1016_v16  ;;  %v406_v16 = vld [vmem:[%s5822_s29 + $0x258] sm:$0xff] }
 0x233   : > { %5156 = vmatmul.msk.f32.gmra.mxu0 %vm461_vm0, %v398_v17 }
 0x235   : > { %v5518_v20 = vpop.permute.xlu2 %5517 }
 0x236   : > { %v5520_v22 = vunpack.i.h.bf16 %v5518_v20  ;;  %v5519_v61 = vunpack.i.l.bf16 %v5518_v20  ;;  %v2276_v54 = vpop.f32.mrf.mxu1  ;;  %v407_v20 = vld [vmem:[%s5822_s29 + $0x260] sm:$0xff] }
 0x237   : > { %v2390_v23 = vadd.f32 %v2389_v21, %v2276_v54  ;;  %v408_v21 = vld [vmem:[%s5822_s29 + $0x268] sm:$0xff] }
 0x238   : > { %v1019_v4 = vpop.f32.mrf.mxu0  ;;  %v2105_v27 = vsel %vm1247_vm1, %v6395_v41, %v5519_v61  ;;  %v2741_v29 = vsel %vm1247_vm1, %v6501_v25, %v5520_v22  ;;  %v1402_v53 = vld [vmem:[#allocation2 + $0x190] ss:$2 sm:$0xff]  ;;  %v1466_v18 = vld [vmem:[#allocation2 + $0x191] ss:$2 sm:$0xff] }
 0x239   : > { %1300 = vst.msk [vmem:[#allocation2 + $0x1a0] sm:$0xff] %vm1247_vm1, %v1019_v4  ;;  %2287 = vmatmul.f32.gmra.mxu1 %v2105_v27  ;;  %2926 = vmatmul.f32.gmra.mxu3 %v2741_v29  ;;  %v1644_v59 = vmax.f32 %v1402_v53, %v1466_v18 }
 0x23a   : > { %2480 = vst.msk [vmem:[#allocation4 + $0x18] sm:$0xff] %vm2476_vm3, %v2390_v23 }
 0x23b   : > { %5157 = vmatmul.msk.f32.gmra.mxu0 %vm461_vm0, %v399_v26  ;;  %v409_v26 = vld [vmem:[%s5822_s29 + $0x270] sm:$0xff] }
 0x240   : > { %v1022_v30 = vpop.f32.mrf.mxu0 }
 0x241   : > { %1301 = vst.msk [vmem:[#allocation2 + $0x1a8] sm:$0xff] %vm1247_vm1, %v1022_v30 }
 0x243   : > { %5158 = vmatmul.msk.f32.gmra.mxu0 %vm461_vm0, %v400_v31 }
 0x247   : > { %v2279_v41 = vpop.f32.mrf.mxu1 }
 0x248   : > { %v1528_v0 = vld [vmem:[#allocation2 + $0x1a0] ss:$2 sm:$0xff]  ;;  %v1592_v37 = vld [vmem:[#allocation2 + $0x1a1] ss:$2 sm:$0xff]  ;;  %v2393_v38 = vadd.f32 %v2392_v35, %v2279_v41  ;;  %v1025_v39 = vpop.f32.mrf.mxu0 }
 0x249   : > { %v1675_v43 = vmax.f32 %v1528_v0, %v1592_v37  ;;  %1302 = vst.msk [vmem:[#allocation2 + $0x1b0] sm:$0xff] %vm1247_vm1, %v1025_v39 }
 0x24a   : > { %2481 = vst.msk [vmem:[#allocation4 + $0x20] sm:$0xff] %vm2476_vm3, %v2393_v38 }
 0x24b   : > { %v1707_v44 = vmax.f32 %v1643_v42, %v1675_v43  ;;  %5159 = vmatmul.msk.f32.gmra.mxu0 %vm461_vm0, %v401_v40  ;;  %v6566_v40 = vld [vmem:[#allocation3 + $0xc7] sm:$0xff]  ;;  %v410_v42 = vld [vmem:[%s5822_s29 + $0x278] sm:$0xff] }
 0x24d   : > { %v1743_v48 = vadd.f32 %v6413_v55, %v1707_v44 }
 0x24f   : > { %v1775_v49 = vmax.f32 %v1743_v48, 0.0 }
 0x250   : > { %v1028_v50 = vpop.f32.mrf.mxu0 }
 0x251   : > { %1303 = vst.msk [vmem:[#allocation2 + $0x1b8] sm:$0xff] %vm1247_vm1, %v1028_v50 }
 0x252   : > { %1854 = vst.msk [vmem:[#allocation3 + $0xe8] sm:$0xff] %vm1247_vm1, %v1775_v49 }
 0x253   : > { %5160 = vmatmul.msk.f32.gmra.mxu0 %vm461_vm0, %v402_v51 }
 0x258   : > { %v1530_v46 = vld [vmem:[#allocation2 + $0x1b0] ss:$2 sm:$0xff]  ;;  %v1594_v56 = vld [vmem:[#allocation2 + $0x1b1] ss:$2 sm:$0xff]  ;;  %v1031_v57 = vpop.f32.mrf.mxu0 }
 0x259   : > { %v1676_v60 = vmax.f32 %v1530_v46, %v1594_v56  ;;  %1304 = vst.msk [vmem:[#allocation2 + $0x1c0] sm:$0xff] %vm1247_vm1, %v1031_v57  ;;  %v6525_v62 = vld [vmem:[#allocation3 + $0xe8] sm:$0xff] }
 0x25a   : > { %v5536_v63 = vpack.i.bf16 %v6525_v62, %v6436_v36 }
 0x25b   : > { %v1708_v33 = vmax.f32 %v1644_v59, %v1676_v60  ;;  %5161 = vmatmul.msk.f32.gmra.mxu0 %vm461_vm0, %v403_v58  ;;  %v6577_v58 = vld [vmem:[#allocation3 + $0xcf] sm:$0xff]  ;;  %v411_v59 = vld [vmem:[%s5822_s29 + $0x280] sm:$0xff] }
 0x25c   : > { %5537 = vrot.lane.b32.xlu0 %v5536_v63, %s5709_s25 }
 0x25d   : > { %v1744_v1 = vadd.f32 %v6413_v55, %v1708_v33 }
 0x25e   : > { %v5523_v3 = vpop.permute.xlu0 %5522 }
 0x25f   : > { %v5525_v5 = vunpack.i.h.bf16 %v5523_v3  ;;  %v5524_v6 = vunpack.i.l.bf16 %v5523_v3  ;;  %v1776_v7 = vmax.f32 %v1744_v1, 0.0 }
 0x260   : > { %v1034_v9 = vpop.f32.mrf.mxu0 }
 0x261   : > { %1305 = vst.msk [vmem:[#allocation2 + $0x1c8] sm:$0xff] %vm1247_vm1, %v1034_v9  ;;  %v2106_v36 = vsel %vm1247_vm1, %v6457_v47, %v5524_v6  ;;  %v2742_v15 = vsel %vm1247_vm1, %v6532_v10, %v5525_v5 }
 0x262   : > { %2290 = vmatmul.f32.gmra.mxu1 %v2106_v36  ;;  %2929 = vmatmul.f32.gmra.mxu3 %v2742_v15  ;;  %1855 = vst.msk [vmem:[#allocation3 + $0xf0] sm:$0xff] %vm1247_vm1, %v1776_v7  ;;  %v412_v36 = vld [vmem:[%s5822_s29 + $0x288] sm:$0xff]  ;;  %v413_v15 = vld [vmem:[%s5822_s29 + $0x290] sm:$0xff] }
 0x263   : > { %5162 = vmatmul.msk.f32.gmra.mxu0 %vm461_vm0, %v404_v2 }
 0x268   : > { %v1037_v12 = vpop.f32.mrf.mxu0  ;;  %v1404_v22 = vld [vmem:[#allocation2 + $0x1c0] ss:$2 sm:$0xff]  ;;  %v1468_v61 = vld [vmem:[#allocation2 + $0x1c1] ss:$2 sm:$0xff] }
 0x269   : > { %1306 = vst.msk [vmem:[#allocation2 + $0x1d0] sm:$0xff] %vm1247_vm1, %v1037_v12  ;;  %v1952_v8 = vld [vmem:[#allocation3 + $0xe9] sm:$0xff]  ;;  %v1953_v17 = vld [vmem:[#allocation3 + $0xf1] sm:$0xff]  ;;  %v1645_v27 = vmax.f32 %v1404_v22, %v1468_v61  ;;  %v416_v22 = vld [vmem:[%s5822_s29 + $0x2a8] sm:$0xff] }
 0x26a   : > { %v6544_v14 = vld [vmem:[#allocation3 + $0xf0] sm:$0xff]  ;;  %5231 = vmatmul.msk.f32.gmra.mxu2 %vm1247_vm1, %v1952_v8 }
 0x26b   : > { %v5541_v47 = vpack.i.bf16 %v6544_v14, %v6470_v52  ;;  %5163 = vmatmul.msk.f32.gmra.mxu0 %vm461_vm0, %v405_v13 }
 0x26d   : > { %5542 = vrot.lane.b32.xlu1 %v5541_v47, %s5709_s25 }
 0x270   : > { %v1040_v28 = vpop.f32.mrf.mxu0 }
 0x271   : > { %1307 = vst.msk [vmem:[#allocation2 + $0x1d8] sm:$0xff] %vm1247_vm1, %v1040_v28  ;;  %v414_v28 = vld [vmem:[%s5822_s29 + $0x298] sm:$0xff] }
 0x272   : > { %5232 = vmatmul.msk.f32.gmra.mxu2 %vm1247_vm1, %v1953_v17 }
 0x273   : > { %5164 = vmatmul.msk.f32.gmra.mxu0 %vm461_vm0, %v406_v16 }
 0x278   : > { %v1043_v19 = vpop.f32.mrf.mxu0  ;;  %v1406_v49 = vld [vmem:[#allocation2 + $0x1d0] ss:$2 sm:$0xff]  ;;  %v1470_v50 = vld [vmem:[#allocation2 + $0x1d1] ss:$2 sm:$0xff] }
 0x279   : > { %1308 = vst.msk [vmem:[#allocation2 + $0x1e0] sm:$0xff] %vm1247_vm1, %v1043_v19  ;;  %v1646_v57 = vmax.f32 %v1406_v49, %v1470_v50 }
 0x27b   : > { %5165 = vmatmul.msk.f32.gmra.mxu0 %vm461_vm0, %v407_v20 }
 0x280   : > { %v1046_v52 = vpop.f32.mrf.mxu0 }
 0x281   : > { %1309 = vst.msk [vmem:[#allocation2 + $0x1e8] sm:$0xff] %vm1247_vm1, %v1046_v52 }
 0x283   : > { %5166 = vmatmul.msk.f32.gmra.mxu0 %vm461_vm0, %v408_v21 }
 0x285   : > { %v5533_v48 = vpop.permute.xlu2 %5532 }
 0x286   : > { %v5535_v51 = vunpack.i.h.bf16 %v5533_v48  ;;  %v5534_v53 = vunpack.i.l.bf16 %v5533_v48 }
 0x288   : > { %v1532_v54 = vld [vmem:[#allocation2 + $0x1e0] ss:$2 sm:$0xff]  ;;  %v1596_v23 = vld [vmem:[#allocation2 + $0x1e1] ss:$2 sm:$0xff]  ;;  %v1049_v4 = vpop.f32.mrf.mxu0  ;;  %v2108_v60 = vsel %vm1247_vm1, %v6501_v25, %v5534_v53  ;;  %v2744_v63 = vsel %vm1247_vm1, %v6577_v58, %v5535_v51  ;;  %v2398_v25 = vpop.f32.mrf.mxu2 }
 0x289   : > { %v1677_v29 = vmax.f32 %v1532_v54, %v1596_v23  ;;  %1310 = vst.msk [vmem:[#allocation2 + $0x1f0] sm:$0xff] %vm1247_vm1, %v1049_v4 }
 0x28b   : > { %v1709_v30 = vmax.f32 %v1645_v27, %v1677_v29  ;;  %5167 = vmatmul.msk.f32.gmra.mxu0 %vm461_vm0, %v409_v26 }
 0x28d   : > { %v1745_v31 = vadd.f32 %v6413_v55, %v1709_v30  ;;  %v417_v30 = vld [vmem:[%s5822_s29 + $0x2b0] sm:$0xff] }
 0x28e   : > { %v5528_v34 = vpop.permute.xlu1 %5527  ;;  %v2282_v35 = vpop.f32.mrf.mxu1 }
 0x28f   : > { %v1777_v41 = vmax.f32 %v1745_v31, 0.0  ;;  %v5530_v0 = vunpack.i.h.bf16 %v5528_v34  ;;  %v5529_v37 = vunpack.i.l.bf16 %v5528_v34  ;;  %v2396_v38 = vadd.f32 %v2395_v32, %v2282_v35 }
 0x290   : > { %v1052_v39 = vpop.f32.mrf.mxu0  ;;  %v2401_v17 = vpop.f32.mrf.mxu2 }
 0x291   : > { %1311 = vst.msk [vmem:[#allocation2 + $0x1f8] sm:$0xff] %vm1247_vm1, %v1052_v39  ;;  %v2107_v43 = vsel %vm1247_vm1, %v6477_v11, %v5529_v37  ;;  %v2743_v44 = vsel %vm1247_vm1, %v6566_v40, %v5530_v0 }
 0x292   : > { %2482 = vst.msk [vmem:[#allocation4 + $0x28] sm:$0xff] %vm2476_vm3, %v2396_v38  ;;  %2293 = vmatmul.f32.gmra.mxu1 %v2107_v43  ;;  %2932 = vmatmul.f32.gmra.mxu3 %v2743_v44  ;;  %v6620_v38 = vld [vmem:[#allocation3 + $0xe7] sm:$0xff]  ;;  %v418_v43 = vld [vmem:[%s5822_s29 + $0x2b8] sm:$0xff] }
 0x293   : > { %1856 = vst.msk [vmem:[#allocation3 + $0x108] sm:$0xff] %vm1247_vm1, %v1777_v41  ;;  %5168 = vmatmul.msk.f32.gmra.mxu0 %vm461_vm0, %v410_v42 }
 0x298   : > { %v1534_v18 = vld [vmem:[#allocation2 + $0x1f0] ss:$2 sm:$0xff]  ;;  %v1598_v46 = vld [vmem:[#allocation2 + $0x1f1] ss:$2 sm:$0xff]  ;;  %v1055_v56 = vpop.f32.mrf.mxu0 }
 0x299   : > { %v1678_v11 = vmax.f32 %v1534_v18, %v1598_v46  ;;  %1312 = vst.msk [vmem:[#allocation2 + $0x200] sm:$0xff] %vm1247_vm1, %v1055_v56 }
 0x29a   : > { %v6584_v33 = vld [vmem:[#allocation3 + $0x108] sm:$0xff]  ;;  %2296 = vmatmul.f32.gmra.mxu1 %v2108_v60  ;;  %2935 = vmatmul.f32.gmra.mxu3 %v2744_v63  ;;  %v2404_v60 = vpop.f32.mrf.mxu2 }
 0x29b   : > { %v1710_v1 = vmax.f32 %v1646_v57, %v1678_v11  ;;  %v5546_v3 = vpack.i.bf16 %v6584_v33, %v6490_v24  ;;  %5169 = vmatmul.msk.f32.gmra.mxu0 %vm461_vm0, %v411_v59 }
 0x29d   : > { %5547 = vrot.lane.b32.xlu2 %v5546_v3, %s5709_s25  ;;  %v1746_v5 = vadd.f32 %v6413_v55, %v1710_v1 }
 0x29f   : > { %v2285_v6 = vpop.f32.mrf.mxu1  ;;  %v1778_v7 = vmax.f32 %v1746_v5, 0.0 }
 0x2a0   : > { %v2399_v9 = vadd.f32 %v2398_v25, %v2285_v6  ;;  %v1058_v2 = vpop.f32.mrf.mxu0  ;;  %v6639_v6 = vld [vmem:[#allocation3 + $0xef] sm:$0xff] }
 0x2a1   : > { %1313 = vst.msk [vmem:[#allocation2 + $0x208] sm:$0xff] %vm1247_vm1, %v1058_v2 }
 0x2a2   : > { %2483 = vst.msk [vmem:[#allocation4 + $0x30] sm:$0xff] %vm2476_vm3, %v2399_v9 }
 0x2a3   : > { %1857 = vst.msk [vmem:[#allocation3 + $0x110] sm:$0xff] %vm1247_vm1, %v1778_v7  ;;  %5170 = vmatmul.msk.f32.gmra.mxu0 %vm461_vm0, %v412_v36 }
 0x2a8   : > { %v1061_v24 = vpop.f32.mrf.mxu0  ;;  %v1408_v61 = vld [vmem:[#allocation2 + $0x200] ss:$2 sm:$0xff]  ;;  %v1472_v54 = vld [vmem:[#allocation2 + $0x201] ss:$2 sm:$0xff] }
 0x2a9   : > { %1314 = vst.msk [vmem:[#allocation2 + $0x210] sm:$0xff] %vm1247_vm1, %v1061_v24  ;;  %v1647_v27 = vmax.f32 %v1408_v61, %v1472_v54  ;;  %v1618_v61 = vld [vmem:[#allocation2 + $0x331] ss:$2 sm:$0xff]  ;;  %v1432_v54 = vld [vmem:[#allocation2 + $0x380] ss:$2 sm:$0xff] }
 0x2aa   : > { %v1954_v12 = vld [vmem:[#allocation3 + $0x109] sm:$0xff]  ;;  %v1955_v16 = vld [vmem:[#allocation3 + $0x111] sm:$0xff] }
 0x2ab   : > { %v6598_v13 = vld [vmem:[#allocation3 + $0x110] sm:$0xff]  ;;  %5233 = vmatmul.msk.f32.gmra.mxu2 %vm1247_vm1, %v1954_v12  ;;  %5171 = vmatmul.msk.f32.gmra.mxu0 %vm461_vm0, %v413_v15 }
 0x2ac   : > { %v5551_v8 = vpack.i.bf16 %v6598_v13, %v6525_v62  ;;  %v415_v62 = vld [vmem:[%s5822_s29 + $0x2a0] sm:$0xff] }
 0x2ae   : > { %5552 = vrot.lane.b32.xlu0 %v5551_v8, %s5709_s25 }
 0x2b0   : > { %v1064_v47 = vpop.f32.mrf.mxu0 }
 0x2b1   : > { %1315 = vst.msk [vmem:[#allocation2 + $0x218] sm:$0xff] %vm1247_vm1, %v1064_v47 }
 0x2b3   : > { %5234 = vmatmul.msk.f32.gmra.mxu2 %vm1247_vm1, %v1955_v16  ;;  %5172 = vmatmul.msk.f32.gmra.mxu0 %vm461_vm0, %v414_v28 }
 0x2b6   : > { %v2288_v19 = vpop.f32.mrf.mxu1 }
 0x2b7   : > { %v2402_v20 = vadd.f32 %v2401_v17, %v2288_v19  ;;  %v6658_v17 = vld [vmem:[#allocation3 + $0x107] sm:$0xff] }
 0x2b8   : > { %v1067_v52 = vpop.f32.mrf.mxu0  ;;  %v1410_v44 = vld [vmem:[#allocation2 + $0x210] ss:$2 sm:$0xff]  ;;  %v1474_v48 = vld [vmem:[#allocation2 + $0x211] ss:$2 sm:$0xff] }
 0x2b9   : > { %1316 = vst.msk [vmem:[#allocation2 + $0x220] sm:$0xff] %vm1247_vm1, %v1067_v52  ;;  %v1648_v46 = vmax.f32 %v1410_v44, %v1474_v48 }
 0x2ba   : > { %2484 = vst.msk [vmem:[#allocation4 + $0x38] sm:$0xff] %vm2476_vm3, %v2402_v20 }
 0x2bb   : > { %5173 = vmatmul.msk.f32.gmra.mxu0 %vm461_vm0, %v415_v62  ;;  %v1552_v62 = vld [vmem:[#allocation2 + $0x320] ss:$2 sm:$0xff] }
 0x2c0   : > { %v1070_v21 = vpop.f32.mrf.mxu0 }
 0x2c1   : > { %1317 = vst.msk [vmem:[#allocation2 + $0x228] sm:$0xff] %vm1247_vm1, %v1070_v21  ;;  %v1616_v21 = vld [vmem:[#allocation2 + $0x321] ss:$2 sm:$0xff] }
 0x2c3   : > { %5174 = vmatmul.msk.f32.gmra.mxu0 %vm461_vm0, %v416_v22  ;;  %v1554_v22 = vld [vmem:[#allocation2 + $0x330] ss:$2 sm:$0xff] }
 0x2c8   : > { %v1536_v23 = vld [vmem:[#allocation2 + $0x220] ss:$2 sm:$0xff]  ;;  %v1600_v4 = vld [vmem:[#allocation2 + $0x221] ss:$2 sm:$0xff]  ;;  %v1073_v26 = vpop.f32.mrf.mxu0 }
 0x2c9   : > { %v1679_v29 = vmax.f32 %v1536_v23, %v1600_v4  ;;  %1318 = vst.msk [vmem:[#allocation2 + $0x230] sm:$0xff] %vm1247_vm1, %v1073_v26  ;;  %v1496_v23 = vld [vmem:[#allocation2 + $0x381] ss:$2 sm:$0xff]  ;;  %v1560_v4 = vld [vmem:[#allocation2 + $0x3a0] ss:$2 sm:$0xff] }
 0x2ca   : > { %v1624_v26 = vld [vmem:[#allocation2 + $0x3a1] ss:$2 sm:$0xff] }
 0x2cb   : > { %v1711_v31 = vmax.f32 %v1647_v27, %v1679_v29  ;;  %5175 = vmatmul.msk.f32.gmra.mxu0 %vm461_vm0, %v417_v30  ;;  %v1424_v27 = vld [vmem:[#allocation2 + $0x300] ss:$2 sm:$0xff]  ;;  %v1488_v29 = vld [vmem:[#allocation2 + $0x301] ss:$2 sm:$0xff]  ;;  %v1426_v30 = vld [vmem:[#allocation2 + $0x310] ss:$2 sm:$0xff] }
 0x2cd   : > { %v1747_v32 = vadd.f32 %v6413_v55, %v1711_v31 }
 0x2ce   : > { %v5538_v34 = vpop.permute.xlu0 %5537 }
 0x2cf   : > { %v1779_v35 = vmax.f32 %v1747_v32, 0.0  ;;  %v5540_v41 = vunpack.i.h.bf16 %v5538_v34  ;;  %v5539_v0 = vunpack.i.l.bf16 %v5538_v34  ;;  %v1659_v34 = vmax.f32 %v1432_v54, %v1496_v23  ;;  %v1620_v54 = vld [vmem:[#allocation2 + $0x361] ss:$2 sm:$0xff]  ;;  %v1422_v23 = vld [vmem:[#allocation2 + $0x2d0] ss:$2 sm:$0xff] }
 0x2d0   : > { %v1076_v37 = vpop.f32.mrf.mxu0 }
 0x2d1   : > { %1858 = vst.msk [vmem:[#allocation3 + $0x128] sm:$0xff] %vm1247_vm1, %v1779_v35  ;;  %v2109_v39 = vsel %vm1247_vm1, %v6532_v10, %v5539_v0  ;;  %v2745_v42 = vsel %vm1247_vm1, %v6620_v38, %v5540_v41  ;;  %v419_v10 = vld [vmem:[%s5822_s29 + $0x2c0] sm:$0xff]  ;;  %v1691_v35 = vmax.f32 %v1560_v4, %v1624_v26  ;;  %v1687_v41 = vmax.f32 %v1552_v62, %v1616_v21  ;;  %v1428_v21 = vld [vmem:[#allocation2 + $0x340] ss:$2 sm:$0xff]  ;;  %s5710_s29 = smov 32  }
 0x2d2   : > { %1319 = vst.msk [vmem:[#allocation2 + $0x238] sm:$0xff] %vm1247_vm1, %v1076_v37  ;;  %2299 = vmatmul.f32.gmra.mxu1 %v2109_v39  ;;  %2938 = vmatmul.f32.gmra.mxu3 %v2745_v42  ;;  %v1688_v0 = vmax.f32 %v1554_v22, %v1618_v61  ;;  %v1655_v37 = vmax.f32 %v1424_v27, %v1488_v29  ;;  %v1492_v22 = vld [vmem:[#allocation2 + $0x341] ss:$2 sm:$0xff]  ;;  %v1556_v61 = vld [vmem:[#allocation2 + $0x360] ss:$2 sm:$0xff] }
 0x2d3   : > { %5176 = vmatmul.msk.f32.gmra.mxu0 %vm461_vm0, %v418_v43  ;;  %v1486_v27 = vld [vmem:[#allocation2 + $0x2d1] ss:$2 sm:$0xff]  ;;  %v1550_v29 = vld [vmem:[#allocation2 + $0x2f0] ss:$2 sm:$0xff] }
 0x2d8   : > { %v1079_v49 = vpop.f32.mrf.mxu0  ;;  %v6630_v50 = vld [vmem:[#allocation3 + $0x128] sm:$0xff] }
 0x2d9   : > { %v1538_v51 = vld [vmem:[#allocation2 + $0x230] ss:$2 sm:$0xff]  ;;  %v1602_v53 = vld [vmem:[#allocation2 + $0x231] ss:$2 sm:$0xff]  ;;  %1320 = vst.msk [vmem:[#allocation2 + $0x240] sm:$0xff] %vm1247_vm1, %v1079_v49  ;;  %v5556_v18 = vpack.i.bf16 %v6630_v50, %v6544_v14 }
 0x2da   : > { %v1680_v56 = vmax.f32 %v1538_v51, %v1602_v53  ;;  %v1430_v51 = vld [vmem:[#allocation2 + $0x350] ss:$2 sm:$0xff]  ;;  %v1494_v53 = vld [vmem:[#allocation2 + $0x351] ss:$2 sm:$0xff] }
 0x2db   : > { %5557 = vrot.lane.b32.xlu1 %v5556_v18, %s5709_s25  ;;  %5177 = vmatmul.msk.f32.gmra.mxu0 %vm461_vm0, %v419_v10  ;;  %v1558_v10 = vld [vmem:[#allocation2 + $0x370] ss:$2 sm:$0xff]  ;;  %v1622_v18 = vld [vmem:[#allocation2 + $0x371] ss:$2 sm:$0xff] }
 0x2dc   : > { %v1712_v57 = vmax.f32 %v1648_v46, %v1680_v56  ;;  %v1434_v46 = vld [vmem:[#allocation2 + $0x390] ss:$2 sm:$0xff]  ;;  %v1498_v56 = vld [vmem:[#allocation2 + $0x391] ss:$2 sm:$0xff] }
 0x2de   : > { %v1748_v11 = vadd.f32 %v6413_v55, %v1712_v57  ;;  %v1723_v57 = vmax.f32 %v1659_v34, %v1691_v35  ;;  %v1657_v35 = vmax.f32 %v1428_v21, %v1492_v22 }
 0x2df   : > { %v5543_v59 = vpop.permute.xlu1 %5542  ;;  %v2291_v3 = vpop.f32.mrf.mxu1 }
 0x2e0   : > { %v5545_v63 = vunpack.i.h.bf16 %v5543_v59  ;;  %v5544_v1 = vunpack.i.l.bf16 %v5543_v59  ;;  %v2405_v5 = vadd.f32 %v2404_v60, %v2291_v3  ;;  %v1082_v25 = vpop.f32.mrf.mxu0  ;;  %v1780_v7 = vmax.f32 %v1748_v11, 0.0  ;;  %v1562_v59 = vld [vmem:[#allocation2 + $0x3b0] ss:$2 sm:$0xff]  ;;  %v1626_v60 = vld [vmem:[#allocation2 + $0x3b1] ss:$2 sm:$0xff] }
 0x2e1   : > { %1321 = vst.msk [vmem:[#allocation2 + $0x248] sm:$0xff] %vm1247_vm1, %v1082_v25  ;;  %v1566_v25 = vld [vmem:[#allocation2 + $0x3f0] ss:$2 sm:$0xff] }
 0x2e2   : > { %v2110_v14 = vsel %vm1247_vm1, %v6566_v40, %v5544_v1  ;;  %v2746_v9 = vsel %vm1247_vm1, %v6639_v6, %v5545_v63  ;;  %2485 = vst.msk [vmem:[#allocation4 + $0x40] sm:$0xff] %vm2476_vm3, %v2405_v5  ;;  %v1438_v63 = vld [vmem:[#allocation2 + $0x3d0] ss:$2 sm:$0xff]  ;;  %v1719_v1 = vmax.f32 %v1655_v37, %v1687_v41  ;;  %v1502_v5 = vld [vmem:[#allocation2 + $0x3d1] ss:$2 sm:$0xff]  ;;  %v1689_v41 = vmax.f32 %v1556_v61, %v1620_v54 }
 0x2e3   : > { %2302 = vmatmul.f32.gmra.mxu1 %v2110_v14  ;;  %2941 = vmatmul.f32.gmra.mxu3 %v2746_v9  ;;  %1859 = vst.msk [vmem:[#allocation3 + $0x130] sm:$0xff] %vm1247_vm1, %v1780_v7  ;;  %v1630_v7 = vld [vmem:[#allocation2 + $0x3f1] ss:$2 sm:$0xff]  ;;  %v1658_v9 = vmax.f32 %v1430_v51, %v1494_v53 }
 0x2e4   : > { %v5320_v54 = vld [vmem:[%s7905_s3 + $0x1f8] sm:$0xff] }
 0x2e5   : > { %3586 = vmatpush.msra.mxu1 %v5320_v54  ;;  %v1548_v54 = vld [vmem:[#allocation2 + $0x2e0] ss:$2 sm:$0xff] }
 0x2e8   : > { %v1085_v2 = vpop.f32.mrf.mxu0  ;;  %v1412_v31 = vld [vmem:[#allocation2 + $0x240] ss:$2 sm:$0xff]  ;;  %v1476_v32 = vld [vmem:[#allocation2 + $0x241] ss:$2 sm:$0xff] }
 0x2e9   : > { %1322 = vst.msk [vmem:[#allocation2 + $0x250] sm:$0xff] %vm1247_vm1, %v1085_v2  ;;  %v1649_v48 = vmax.f32 %v1412_v31, %v1476_v32  ;;  %v1690_v2 = vmax.f32 %v1558_v10, %v1622_v18 }
 0x2ea   : > { %v1956_v36 = vld [vmem:[#allocation3 + $0x129] sm:$0xff]  ;;  %v1957_v12 = vld [vmem:[#allocation3 + $0x131] sm:$0xff] }
 0x2eb   : > { %v6649_v24 = vld [vmem:[#allocation3 + $0x130] sm:$0xff]  ;;  %5235 = vmatmul.msk.f32.gmra.mxu2 %vm1247_vm1, %v1956_v36  ;;  %v1660_v36 = vmax.f32 %v1434_v46, %v1498_v56  ;;  %v1722_v4 = vmax.f32 %v1658_v9, %v1690_v2 }
 0x2ec   : > { %v5561_v40 = vpack.i.bf16 %v6649_v24, %v6584_v33 }
 0x2ee   : > { %5562 = vrot.lane.b32.xlu2 %v5561_v40, %s5709_s25  ;;  %v1759_v40 = vadd.f32 %v6413_v55, %v1723_v57 }
 0x2f0   : > { %v1088_v15 = vpop.f32.mrf.mxu0  ;;  %v1791_v34 = vmax.f32 %v1759_v40, 0.0 }
 0x2f1   : > { %1323 = vst.msk [vmem:[#allocation2 + $0x258] sm:$0xff] %vm1247_vm1, %v1088_v15  ;;  %v1692_v15 = vmax.f32 %v1562_v59, %v1626_v60  ;;  %v5272_v60 = vld [vmem:[%s7905_s3 + $0x178] sm:$0xff] }
 0x2f2   : > { %1870 = vst.msk [vmem:[#allocation3 + $0x1e8] sm:$0xff] %vm1247_vm1, %v1791_v34  ;;  %3007 = vmatpush.msra.mxu2 %v5272_v60 }
 0x2f3   : > { %5236 = vmatmul.msk.f32.gmra.mxu2 %vm1247_vm1, %v1957_v12  ;;  %v1724_v26 = vmax.f32 %v1660_v36, %v1692_v15 }
 0x2f7   : > { %v5548_v8 = vpop.permute.xlu2 %5547 }
 0x2f8   : > { %v5550_v47 = vunpack.i.h.bf16 %v5548_v8  ;;  %v5549_v28 = vunpack.i.l.bf16 %v5548_v8  ;;  %v1091_v16 = vpop.f32.mrf.mxu0  ;;  %v1662_v8 = vmax.f32 %v1438_v63, %v1502_v5  ;;  %v5328_v63 = vld [vmem:[%s7905_s3 + $0x238] sm:$0xff] }
 0x2f9   : > { %1324 = vst.msk [vmem:[#allocation2 + $0x260] sm:$0xff] %vm1247_vm1, %v1091_v16  ;;  %3707 = vmatpush.msra.mxu3 %v5328_v63 }
 0x2fa   : > { %v2111_v19 = vsel %vm1247_vm1, %v6577_v58, %v5549_v28  ;;  %v2747_v20 = vsel %vm1247_vm1, %v6658_v17, %v5550_v47  ;;  %v1490_v58 = vld [vmem:[#allocation2 + $0x311] ss:$2 sm:$0xff]  ;;  %v1694_v47 = vmax.f32 %v1566_v25, %v1630_v7  ;;  %v1755_v28 = vadd.f32 %v6413_v55, %v1719_v1 }
 0x2fb   : > { %2305 = vmatmul.f32.gmra.mxu1 %v2111_v19  ;;  %2944 = vmatmul.f32.gmra.mxu3 %v2747_v20  ;;  %v1656_v39 = vmax.f32 %v1426_v30, %v1490_v58  ;;  %v2407_v19 = vpop.f32.mrf.mxu2  ;;  %v1614_v30 = vld [vmem:[#allocation2 + $0x2f1] ss:$2 sm:$0xff]  ;;  %v1721_v1 = vmax.f32 %v1657_v35, %v1689_v41 }
 0x2fc   : > { %v1726_v58 = vmax.f32 %v1662_v8, %v1694_v47  ;;  %v1787_v31 = vmax.f32 %v1755_v28, 0.0  ;;  %v1686_v37 = vmax.f32 %v1550_v29, %v1614_v30  ;;  %v6698_v28 = vld [vmem:[#allocation3 + $0x10f] sm:$0xff] }
 0x2fd   : > { %v1720_v3 = vmax.f32 %v1656_v39, %v1688_v0  ;;  %v1654_v0 = vmax.f32 %v1422_v23, %v1486_v27  ;;  %v1414_v39 = vld [vmem:[#allocation2 + $0x250] ss:$2 sm:$0xff]  ;;  %v1757_v2 = vadd.f32 %v6413_v55, %v1721_v1  ;;  %v1564_v27 = vld [vmem:[#allocation2 + $0x3e0] ss:$2 sm:$0xff]  ;;  %v1628_v29 = vld [vmem:[#allocation2 + $0x3e1] ss:$2 sm:$0xff] }
 0x2fe   : > { %1866 = vst.msk [vmem:[#allocation3 + $0x1a8] sm:$0xff] %vm1247_vm1, %v1787_v31  ;;  %v5271_v31 = vld [vmem:[%s7905_s3 + $0x170] sm:$0xff] }
 0x2ff   : > { %v1756_v16 = vadd.f32 %v6413_v55, %v1720_v3  ;;  %v1718_v3 = vmax.f32 %v1654_v0, %v1686_v37  ;;  %3008 = vmatpush.msra.mxu2 %v5271_v31  ;;  %v6731_v37 = vld [vmem:[%s7904_s2] ss:$0 sm:$0xff]  ;;  %v6743_v1 = vld [vmem:[#allocation3 + $0x127] sm:$0xff] }
 0x300   : > { %v1094_v52 = vpop.f32.mrf.mxu0 }
 0x301   : > { %1325 = vst.msk [vmem:[#allocation2 + $0x268] sm:$0xff] %vm1247_vm1, %v1094_v52  ;;  %v1788_v32 = vmax.f32 %v1756_v16, 0.0  ;;  %v1754_v40 = vadd.f32 %v6413_v55, %v1718_v3 }
 0x303   : > { %1867 = vst.msk [vmem:[#allocation3 + $0x1b0] sm:$0xff] %vm1247_vm1, %v1788_v32  ;;  %v5319_v32 = vld [vmem:[%s7905_s3 + $0x1f0] sm:$0xff] }
 0x304   : > { %3587 = vmatpush.msra.mxu1 %v5319_v32 }
 0x308   : > { %v1540_v42 = vld [vmem:[#allocation2 + $0x260] ss:$2 sm:$0xff]  ;;  %v1604_v43 = vld [vmem:[#allocation2 + $0x261] ss:$2 sm:$0xff]  ;;  %v1097_v44 = vpop.f32.mrf.mxu0 }
 0x309   : > { %v1681_v49 = vmax.f32 %v1540_v42, %v1604_v43  ;;  %1326 = vst.msk [vmem:[#allocation2 + $0x270] sm:$0xff] %vm1247_vm1, %v1097_v44  ;;  %v1478_v42 = vld [vmem:[#allocation2 + $0x251] ss:$2 sm:$0xff]  ;;  %v1758_v43 = vadd.f32 %v6413_v55, %v1722_v4  ;;  %v1760_v44 = vadd.f32 %v6413_v55, %v1724_v26  ;;  %v1436_v4 = vld [vmem:[#allocation2 + $0x3c0] ss:$2 sm:$0xff] }
 0x30a   : > { %v1500_v26 = vld [vmem:[#allocation2 + $0x3c1] ss:$2 sm:$0xff] }
 0x30b   : > { %v1713_v11 = vmax.f32 %v1649_v48, %v1681_v49  ;;  %v1762_v48 = vadd.f32 %v6413_v55, %v1726_v58  ;;  %v2410_v49 = vpop.f32.mrf.mxu2  ;;  %v1792_v25 = vmax.f32 %v1760_v44, 0.0  ;;  %v1790_v7 = vmax.f32 %v1758_v43, 0.0 }
 0x30c   : > { %v1661_v30 = vmax.f32 %v1436_v4, %v1500_v26  ;;  %v1693_v58 = vmax.f32 %v1564_v27, %v1628_v29 }
 0x30d   : > { %v1749_v14 = vadd.f32 %v6413_v55, %v1713_v11  ;;  %v1650_v11 = vmax.f32 %v1414_v39, %v1478_v42  ;;  %1871 = vst.msk [vmem:[#allocation3 + $0x1f0] sm:$0xff] %vm1247_vm1, %v1792_v25 }
 0x30e   : > { %1869 = vst.msk [vmem:[#allocation3 + $0x1d0] sm:$0xff] %vm1247_vm1, %v1790_v7  ;;  %v1725_v35 = vmax.f32 %v1661_v30, %v1693_v58 }
 0x30f   : > { %v1781_v12 = vmax.f32 %v1749_v14, 0.0  ;;  %v2294_v20 = vpop.f32.mrf.mxu1  ;;  %v1794_v14 = vmax.f32 %v1762_v48, 0.0 }
 0x310   : > { %v2408_v52 = vadd.f32 %v2407_v19, %v2294_v20  ;;  %v1100_v62 = vpop.f32.mrf.mxu0  ;;  %v1789_v20 = vmax.f32 %v1757_v2, 0.0  ;;  %v1761_v39 = vadd.f32 %v6731_v37, %v1725_v35 }
 0x311   : > { %1860 = vst.msk [vmem:[#allocation3 + $0x148] sm:$0xff] %vm1247_vm1, %v1781_v12 }
 0x312   : > { %1327 = vst.msk [vmem:[#allocation2 + $0x278] sm:$0xff] %vm1247_vm1, %v1100_v62 }
 0x313   : > { %2486 = vst.msk [vmem:[#allocation4 + $0x48] sm:$0xff] %vm2476_vm3, %v2408_v52  ;;  %v2413_v60 = vpop.f32.mrf.mxu2 }
 0x314   : > { %1873 = vst.msk [vmem:[#allocation3 + $0x210] sm:$0xff] %vm1247_vm1, %v1794_v14 }
 0x315   : > { %1868 = vst.msk [vmem:[#allocation3 + $0x1c8] sm:$0xff] %vm1247_vm1, %v1789_v20 }
 0x317   : > { %v2297_v51 = vpop.f32.mrf.mxu1 }
 0x318   : > { %v6678_v53 = vld [vmem:[#allocation3 + $0x148] sm:$0xff]  ;;  %v2411_v46 = vadd.f32 %v2410_v49, %v2297_v51  ;;  %v1103_v56 = vpop.f32.mrf.mxu0 }
 0x319   : > { %v1542_v10 = vld [vmem:[#allocation2 + $0x270] ss:$2 sm:$0xff]  ;;  %v1606_v18 = vld [vmem:[#allocation2 + $0x271] ss:$2 sm:$0xff]  ;;  %v5566_v57 = vpack.i.bf16 %v6678_v53, %v6598_v13  ;;  %1328 = vst.msk [vmem:[#allocation2 + $0x280] sm:$0xff] %vm1247_vm1, %v1103_v56  ;;  %v5327_v51 = vld [vmem:[%s7905_s3 + $0x230] sm:$0xff] }
 0x31a   : > { %v1682_v59 = vmax.f32 %v1542_v10, %v1606_v18  ;;  %2487 = vst.msk [vmem:[#allocation4 + $0x50] sm:$0xff] %vm2476_vm3, %v2411_v46  ;;  %v5318_v10 = vld [vmem:[%s7905_s3 + $0x1e8] sm:$0xff]  ;;  %3708 = vmatpush.msra.mxu3 %v5327_v51  ;;  %v1793_v46 = vmax.f32 %v1761_v39, 0.0  ;;  %v5316_v39 = vld [vmem:[%s7905_s3 + $0x1d8] sm:$0xff] }
 0x31b   : > { %5567 = vrot.lane.b32.xlu0 %v5566_v57, %s5709_s25  ;;  %3588 = vmatpush.msra.mxu1 %v5318_v10  ;;  %v2416_v4 = vpop.f32.mrf.mxu2  ;;  %v6800_v10 = vld [vmem:[#allocation3 + $0x1f0] sm:$0xff] }
 0x31c   : > { %v1714_v5 = vmax.f32 %v1650_v11, %v1682_v59  ;;  %1872 = vst.msk [vmem:[#allocation3 + $0x208] sm:$0xff] %vm1247_vm1, %v1793_v46 }
 0x31e   : > { %v1750_v9 = vadd.f32 %v6413_v55, %v1714_v5  ;;  %v1786_v55 = vmax.f32 %v1754_v40, 0.0  ;;  %v5270_v40 = vld [vmem:[%s7905_s3 + $0x168] sm:$0xff] }
 0x31f   : > { %3009 = vmatpush.msra.mxu2 %v5270_v40  ;;  %v5325_v40 = vld [vmem:[%s7905_s3 + $0x220] sm:$0xff] }
 0x320   : > { %v5553_v36 = vpop.permute.xlu0 %5552  ;;  %v1782_v8 = vmax.f32 %v1750_v9, 0.0  ;;  %v1106_v47 = vpop.f32.mrf.mxu0  ;;  %1865 = vst.msk [vmem:[#allocation3 + $0x190] sm:$0xff] %vm1247_vm1, %v1786_v55 }
 0x321   : > { %v5555_v15 = vunpack.i.h.bf16 %v5553_v36  ;;  %v5554_v12 = vunpack.i.l.bf16 %v5553_v36  ;;  %1329 = vst.msk [vmem:[#allocation2 + $0x288] sm:$0xff] %vm1247_vm1, %v1106_v47 }
 0x322   : > { %1861 = vst.msk [vmem:[#allocation3 + $0x150] sm:$0xff] %vm1247_vm1, %v1782_v8 }
 0x323   : > { %v2112_v16 = vsel %vm1247_vm1, %v6620_v38, %v5554_v12  ;;  %v2748_v19 = vsel %vm1247_vm1, %v6698_v28, %v5555_v15  ;;  %v6758_v15 = vld [vmem:[#allocation3 + $0x12f] sm:$0xff] }
 0x324   : > { %2308 = vmatmul.f32.gmra.mxu1 %v2112_v16  ;;  %2947 = vmatmul.f32.gmra.mxu3 %v2748_v19 }
 0x327   : > { %v6774_v31 = vld [vmem:[#allocation3 + $0x190] sm:$0xff] }
 0x328   : > { %v1109_v52 = vpop.f32.mrf.mxu0  ;;  %v1416_v41 = vld [vmem:[#allocation2 + $0x280] ss:$2 sm:$0xff]  ;;  %v1480_v0 = vld [vmem:[#allocation2 + $0x281] ss:$2 sm:$0xff] }
 0x329   : > { %1330 = vst.msk [vmem:[#allocation2 + $0x290] sm:$0xff] %vm1247_vm1, %v1109_v52  ;;  %v1958_v62 = vld [vmem:[#allocation3 + $0x149] sm:$0xff]  ;;  %v1959_v61 = vld [vmem:[#allocation3 + $0x151] sm:$0xff]  ;;  %v1651_v48 = vmax.f32 %v1416_v41, %v1480_v0 }
 0x32a   : > { %v6709_v21 = vld [vmem:[#allocation3 + $0x150] sm:$0xff]  ;;  %5237 = vmatmul.msk.f32.gmra.mxu2 %vm1247_vm1, %v1958_v62 }
 0x32b   : > { %v5571_v38 = vpack.i.bf16 %v6709_v21, %v6630_v50 }
 0x32d   : > { %5572 = vrot.lane.b32.xlu1 %v5571_v38, %s5709_s25 }
 0x330   : > { %v1112_v22 = vpop.f32.mrf.mxu0 }
 0x331   : > { %1331 = vst.msk [vmem:[#allocation2 + $0x298] sm:$0xff] %vm1247_vm1, %v1112_v22 }
 0x332   : > { %5238 = vmatmul.msk.f32.gmra.mxu2 %vm1247_vm1, %v1959_v61 }
 0x338   : > { %v1115_v23 = vpop.f32.mrf.mxu0  ;;  %v1418_v47 = vld [vmem:[#allocation2 + $0x290] ss:$2 sm:$0xff]  ;;  %v1482_v16 = vld [vmem:[#allocation2 + $0x291] ss:$2 sm:$0xff] }
 0x339   : > { %1332 = vst.msk [vmem:[#allocation2 + $0x2a0] sm:$0xff] %vm1247_vm1, %v1115_v23  ;;  %v1652_v38 = vmax.f32 %v1418_v47, %v1482_v16  ;;  %v1612_v23 = vld [vmem:[#allocation2 + $0x2e1] ss:$2 sm:$0xff] }
 0x33a   : > { %v1685_v32 = vmax.f32 %v1548_v54, %v1612_v23  ;;  %v3243_v47 = vld [vmem:[#allocation3 + $0x68] sm:$0xff] }
 0x340   : > { %v1118_v34 = vpop.f32.mrf.mxu0 }
 0x341   : > { %1333 = vst.msk [vmem:[#allocation2 + $0x2a8] sm:$0xff] %vm1247_vm1, %v1118_v34 }
 0x348   : > { %v1544_v42 = vld [vmem:[#allocation2 + $0x2a0] ss:$2 sm:$0xff]  ;;  %v1608_v43 = vld [vmem:[#allocation2 + $0x2a1] ss:$2 sm:$0xff]  ;;  %v1121_v44 = vpop.f32.mrf.mxu0  ;;  %v5563_v14 = vpop.permute.xlu2 %5562 }
 0x349   : > { %v1683_v49 = vmax.f32 %v1544_v42, %v1608_v43  ;;  %1334 = vst.msk [vmem:[#allocation2 + $0x2b0] sm:$0xff] %vm1247_vm1, %v1121_v44  ;;  %v5565_v2 = vunpack.i.h.bf16 %v5563_v14  ;;  %v5564_v36 = vunpack.i.l.bf16 %v5563_v14  ;;  %v6785_v43 = vld [vmem:[#allocation3 + $0x1c8] sm:$0xff]  ;;  %v6827_v14 = vld [vmem:[#allocation3 + $0x1b0] sm:$0xff] }
 0x34a   : > { %v5621_v46 = vpack.i.bf16 %v6800_v10, %v6785_v43 }
 0x34b   : > { %v1715_v18 = vmax.f32 %v1651_v48, %v1683_v49  ;;  %v2114_v12 = vsel %vm1247_vm1, %v6658_v17, %v5564_v36  ;;  %v2750_v8 = vsel %vm1247_vm1, %v6758_v15, %v5565_v2  ;;  %v5326_v17 = vld [vmem:[%s7905_s3 + $0x228] sm:$0xff]  ;;  %v5606_v48 = vpack.i.bf16 %v6785_v43, %v6774_v31 }
 0x34c   : > { %3709 = vmatpush.msra.mxu3 %v5326_v17  ;;  %v3241_v17 = vld [vmem:[#allocation3 + $0x48] sm:$0xff] }
 0x34d   : > { %v5558_v56 = vpop.permute.xlu1 %5557  ;;  %v1751_v57 = vadd.f32 %v6731_v37, %v1715_v18 }
 0x34e   : > { %v5560_v11 = vunpack.i.h.bf16 %v5558_v56  ;;  %v5559_v59 = vunpack.i.l.bf16 %v5558_v56  ;;  %3710 = vmatpush.msra.mxu3 %v5325_v40  ;;  %v3248_v40 = vld [vmem:[#allocation3 + $0xb0] sm:$0xff] }
 0x34f   : > { %v2300_v63 = vpop.f32.mrf.mxu1  ;;  %v1783_v3 = vmax.f32 %v1751_v57, 0.0 }
 0x350   : > { %v2414_v5 = vadd.f32 %v2413_v60, %v2300_v63  ;;  %v2113_v25 = vsel %vm1247_vm1, %v6639_v6, %v5559_v59  ;;  %v2749_v7 = vsel %vm1247_vm1, %v6743_v1, %v5560_v11  ;;  %v1124_v9 = vpop.f32.mrf.mxu0  ;;  %v5317_v6 = vld [vmem:[%s7905_s3 + $0x1e0] sm:$0xff]  ;;  %v6810_v11 = vld [vmem:[#allocation3 + $0x1a8] sm:$0xff] }
 0x351   : > { %2311 = vmatmul.f32.gmra.mxu1 %v2113_v25  ;;  %2950 = vmatmul.f32.gmra.mxu3 %v2749_v7  ;;  %1862 = vst.msk [vmem:[#allocation3 + $0x168] sm:$0xff] %vm1247_vm1, %v1783_v3  ;;  %v5269_v60 = vld [vmem:[%s7905_s3 + $0x160] sm:$0xff]  ;;  %v5315_v63 = vld [vmem:[%s7905_s3 + $0x1d0] sm:$0xff]  ;;  %v2419_v3 = vpop.f32.mrf.mxu2  ;;  %v6825_v7 = vld [vmem:[#allocation3 + $0x1d0] sm:$0xff] }
 0x352   : > { %2488 = vst.msk [vmem:[#allocation4 + $0x58] sm:$0xff] %vm2476_vm3, %v2414_v5  ;;  %3589 = vmatpush.msra.mxu1 %v5317_v6  ;;  %3010 = vmatpush.msra.mxu2 %v5269_v60  ;;  %v5611_v36 = vpack.i.bf16 %v6825_v7, %v6810_v11  ;;  %v6845_v6 = vld [vmem:[#allocation3 + $0x1e8] sm:$0xff] }
 0x353   : > { %1335 = vst.msk [vmem:[#allocation2 + $0x2b8] sm:$0xff] %vm1247_vm1, %v1124_v9  ;;  %v5616_v16 = vpack.i.bf16 %v6845_v6, %v6827_v14 }
 0x354   : > { %3590 = vmatpush.msra.mxu1 %v5316_v39  ;;  %v6902_v39 = vld [vmem:[#allocation3 + $0x1c9] sm:$0xff] }
 0x356   : > { %3591 = vmatpush.msra.mxu1 %v5315_v63 }
 0x358   : > { %v1127_v19 = vpop.f32.mrf.mxu0  ;;  %v6764_v55 = vld [vmem:[#allocation3 + $0x168] sm:$0xff] }
 0x359   : > { %2314 = vmatmul.f32.gmra.mxu1 %v2114_v12  ;;  %2953 = vmatmul.f32.gmra.mxu3 %v2750_v8  ;;  %1336 = vst.msk [vmem:[#allocation2 + $0x2c0] sm:$0xff] %vm1247_vm1, %v1127_v19  ;;  %v5576_v20 = vpack.i.bf16 %v6764_v55, %v6649_v24  ;;  %v5591_v35 = vpack.i.bf16 %v6774_v31, %v6764_v55  ;;  %v6847_v12 = vld [vmem:[#allocation3 + $0x208] sm:$0xff]  ;;  %v6849_v8 = vld [vmem:[#allocation3 + $0x191] sm:$0xff] }
 0x35a   : > { %v1546_v52 = vld [vmem:[#allocation2 + $0x2b0] ss:$2 sm:$0xff]  ;;  %v1610_v62 = vld [vmem:[#allocation2 + $0x2b1] ss:$2 sm:$0xff]  ;;  %v5626_v19 = vpack.i.bf16 %v6847_v12, %v6825_v7 }
 0x35b   : > { %v1684_v22 = vmax.f32 %v1546_v52, %v1610_v62  ;;  %5577 = vrot.lane.b32.xlu2 %v5576_v20, %s5709_s25  ;;  %v5314_v20 = vld [vmem:[%s7905_s3 + $0x1c8] sm:$0xff]  ;;  %v6863_v52 = vld [vmem:[#allocation3 + $0x210] sm:$0xff] }
 0x35c   : > { %3592 = vmatpush.msra.mxu1 %v5314_v20  ;;  %v6865_v62 = vld [vmem:[#allocation3 + $0x1a9] sm:$0xff]  ;;  %v6939_v20 = vld [vmem:[#allocation3 + $0x1f1] sm:$0xff] }
 0x35d   : > { %v1716_v61 = vmax.f32 %v1652_v38, %v1684_v22  ;;  %v3246_v38 = vld [vmem:[#allocation3 + $0x90] sm:$0xff]  ;;  %v5631_v22 = vpack.i.bf16 %v6863_v52, %v6845_v6 }
 0x35f   : > { %v1752_v27 = vadd.f32 %v6731_v37, %v1716_v61 }
 0x360   : > { %v2303_v26 = vpop.f32.mrf.mxu1  ;;  %v1420_v30 = vld [vmem:[#allocation2 + $0x2c0] ss:$2 sm:$0xff]  ;;  %v1484_v58 = vld [vmem:[#allocation2 + $0x2c1] ss:$2 sm:$0xff] }
 0x361   : > { %v2417_v29 = vadd.f32 %v2416_v4, %v2303_v26  ;;  %v1653_v34 = vmax.f32 %v1420_v30, %v1484_v58  ;;  %v1784_v41 = vmax.f32 %v1752_v27, 0.0  ;;  %v6874_v4 = vld [vmem:[#allocation3 + $0x147] sm:$0xff]  ;;  %v3242_v58 = vld [vmem:[#allocation3 + $0x50] sm:$0xff] }
 0x362   : > { %v3249_v30 = vld [vmem:[#allocation3 + $0xc8] sm:$0xff] }
 0x363   : > { %2489 = vst.msk [vmem:[#allocation4 + $0x60] sm:$0xff] %vm2476_vm3, %v2417_v29  ;;  %v1717_v0 = vmax.f32 %v1653_v34, %v1685_v32  ;;  %5592 = vrot.lane.b32.xlu2 %v5591_v35, %s5709_s25  ;;  %v6880_v29 = vld [vmem:[#allocation3 + $0x1b1] sm:$0xff]  ;;  %v5267_v35 = vld [vmem:[%s7905_s3 + $0x150] sm:$0xff] }
 0x364   : > { %1863 = vst.msk [vmem:[#allocation3 + $0x170] sm:$0xff] %vm1247_vm1, %v1784_v41  ;;  %v5268_v32 = vld [vmem:[%s7905_s3 + $0x158] sm:$0xff]  ;;  %v5266_v41 = vld [vmem:[%s7905_s3 + $0x148] sm:$0xff] }
 0x365   : > { %v1753_v42 = vadd.f32 %v6731_v37, %v1717_v0  ;;  %v3244_v34 = vld [vmem:[#allocation3 + $0x70] sm:$0xff]  ;;  %3011 = vmatpush.msra.mxu2 %v5268_v32  ;;  %v5265_v0 = vld [vmem:[%s7905_s3 + $0x140] sm:$0xff] }
 0x367   : > { %v1785_v44 = vmax.f32 %v1753_v42, 0.0  ;;  %3012 = vmatpush.msra.mxu2 %v5267_v35  ;;  %v5642_v42 = vld [vmem:[#allocation3 + $0xf0] sm:$0xff] }
 0x369   : > { %1864 = vst.msk [vmem:[#allocation3 + $0x188] sm:$0xff] %vm1247_vm1, %v1785_v44  ;;  %3013 = vmatpush.msra.mxu2 %v5266_v41  ;;  %v3245_v44 = vld [vmem:[#allocation3 + $0x88] sm:$0xff] }
 0x36b   : > { %v6790_v49 = vld [vmem:[#allocation3 + $0x169] sm:$0xff]  ;;  %5607 = vrot.lane.b32.xlu2 %v5606_v48, %s5709_s25  ;;  %v6808_v57 = vld [vmem:[#allocation3 + $0x171] sm:$0xff]  ;;  %3014 = vmatpush.msra.mxu2 %v5265_v0 }
 0x36c   : > { %v6792_v51 = vld [vmem:[#allocation3 + $0x170] sm:$0xff]  ;;  %5239 = vmatmul.msk.f32.gmra.mxu2 %vm1247_vm1, %v6790_v49 }
 0x36d   : > { %v5581_v37 = vpack.i.bf16 %v6792_v51, %v6678_v53  ;;  %v5596_v59 = vpack.i.bf16 %v6810_v11, %v6792_v51  ;;  %v5324_v48 = vld [vmem:[%s7905_s3 + $0x218] sm:$0xff] }
 0x36e   : > { %3711 = vmatpush.msra.mxu3 %v5324_v48 }
 0x36f   : > { %5582 = vrot.lane.b32.xlu0 %v5581_v37, %s5709_s25  ;;  %v3247_v37 = vld [vmem:[#allocation3 + $0xa8] sm:$0xff] }
 0x370   : > { %v6802_v18 = vld [vmem:[#allocation3 + $0x188] sm:$0xff] }
 0x371   : > { %v5586_v56 = vpack.i.bf16 %v6802_v18, %v6709_v21  ;;  %v6830_v9 = vld [vmem:[#allocation3 + $0x189] sm:$0xff]  ;;  %v5601_v2 = vpack.i.bf16 %v6827_v14, %v6802_v18 }
 0x373   : > { %5622 = vrot.lane.b32.xlu2 %v5621_v46, %s5709_s25  ;;  %5587 = vrot.lane.b32.xlu1 %v5586_v56, %s5709_s25  ;;  %v2422_v56 = vpop.f32.mrf.mxu2 }
 0x374   : > { %5240 = vmatmul.msk.f32.gmra.mxu2 %vm1247_vm1, %v6808_v57 }
 0x377   : > { %5597 = vrot.lane.b32.xlu0 %v5596_v59, %s5709_s25 }
 0x378   : > { %v2306_v5 = vpop.f32.mrf.mxu1 }
 0x379   : > { %v2420_v25 = vadd.f32 %v2419_v3, %v2306_v5  ;;  %v6912_v5 = vld [vmem:[#allocation3 + $0x14f] sm:$0xff] }
 0x37b   : > { %2490 = vst.msk [vmem:[#allocation4 + $0x68] sm:$0xff] %vm2476_vm3, %v2420_v25  ;;  %2064 = vrot.lane.b32.xlu2 %v6800_v10, %s5709_s25  ;;  %5602 = vrot.lane.b32.xlu1 %v5601_v2, %s5709_s25 }
 0x37c   : > { %5241 = vmatmul.msk.f32.gmra.mxu2 %vm1247_vm1, %v6830_v9 }
 0x37f   : > { %5612 = vrot.lane.b32.xlu0 %v5611_v36, %s5709_s25  ;;  %v6919_v36 = vld [vmem:[#allocation3 + $0x1d1] sm:$0xff] }
 0x383   : > { %3341 = vrot.lane.b32.xlu2 %v3243_v47, %s5709_s25  ;;  %5617 = vrot.lane.b32.xlu1 %v5616_v16, %s5709_s25  ;;  %v3250_v47 = vld [vmem:[#allocation3 + $0xd0] sm:$0xff] }
 0x384   : > { %5242 = vmatmul.msk.f32.gmra.mxu2 %vm1247_vm1, %v6849_v8  ;;  %v6930_v16 = vld [vmem:[#allocation3 + $0x1e9] sm:$0xff] }
 0x387   : > { %5627 = vrot.lane.b32.xlu0 %v5626_v19, %s5709_s25  ;;  %v2425_v19 = vpop.f32.mrf.mxu2 }
 0x38b   : > { %3347 = vrot.lane.b32.xlu2 %v3246_v38, %s5709_s25  ;;  %5632 = vrot.lane.b32.xlu1 %v5631_v22, %s5709_s25  ;;  %v5311_v38 = vld [vmem:[%s7905_s3 + $0x1b0] sm:$0xff] }
 0x38c   : > { %5243 = vmatmul.msk.f32.gmra.mxu2 %vm1247_vm1, %v6865_v62 }
 0x38d   : > { %v5568_v61 = vpop.permute.xlu0 %5567 }
 0x38e   : > { %v5570_v54 = vunpack.i.h.bf16 %v5568_v61  ;;  %v5569_v23 = vunpack.i.l.bf16 %v5568_v61 }
 0x38f   : > { %3337 = vrot.lane.b32.xlu0 %v3241_v17, %s5709_s25  ;;  %v6952_v17 = vld [vmem:[#allocation3 + $0x167] sm:$0xff]  ;;  %v2428_v61 = vpop.f32.mrf.mxu2 }
 0x390   : > { %v2115_v26 = vsel %vm1247_vm1, %v6698_v28, %v5569_v23  ;;  %v2751_v27 = vsel %vm1247_vm1, %v6874_v4, %v5570_v54  ;;  %v5313_v28 = vld [vmem:[%s7905_s3 + $0x1c0] sm:$0xff]  ;;  %v6958_v23 = vpop.f32.mrf.mxu3 }
 0x391   : > { %2317 = vmatmul.f32.gmra.mxu1 %v2115_v26  ;;  %2956 = vmatmul.f32.gmra.mxu3 %v2751_v27  ;;  %v2574_v27 = vld [vmem:[#allocation3 + $0x31] sm:$0xff] }
 0x392   : > { %3593 = vmatpush.msra.mxu1 %v5313_v28 }
 0x393   : > { %3353 = vrot.lane.b32.xlu2 %v3249_v30, %s5709_s25  ;;  %3339 = vrot.lane.b32.xlu1 %v3242_v58, %s5709_s25  ;;  %v6988_v30 = vld [vmem:[#allocation3 + $0x49] sm:$0xff]  ;;  %v7001_v58 = vld [vmem:[#allocation3 + $0x51] sm:$0xff] }
 0x394   : > { %5244 = vmatmul.msk.f32.gmra.mxu2 %vm1247_vm1, %v6880_v29 }
 0x397   : > { %3343 = vrot.lane.b32.xlu0 %v3244_v34, %s5709_s25  ;;  %v6972_v26 = vpop.f32.mrf.mxu2  ;;  %v7017_v34 = vld [vmem:[#allocation3 + $0x69] sm:$0xff] }
 0x39b   : > { %3359 = vrot.lane.b32.xlu2 %v5642_v42, %s5709_s25  ;;  %3345 = vrot.lane.b32.xlu1 %v3245_v44, %s5709_s25  ;;  %v7028_v42 = vld [vmem:[#allocation3 + $0x16f] sm:$0xff] }
 0x39c   : > { %5245 = vmatmul.msk.f32.gmra.mxu2 %vm1247_vm1, %v6902_v39 }
 0x39f   : > { %3349 = vrot.lane.b32.xlu0 %v3247_v37, %s5709_s25  ;;  %v5573_v46 = vpop.permute.xlu1 %5572 }
 0x3a0   : > { %v5575_v59 = vunpack.i.h.bf16 %v5573_v46  ;;  %v5574_v60 = vunpack.i.l.bf16 %v5573_v46  ;;  %v5308_v46 = vld [vmem:[%s7905_s3 + $0x198] sm:$0xff] }
 0x3a1   : > { %v2309_v63 = vpop.f32.mrf.mxu1 }
 0x3a2   : > { %v2423_v3 = vadd.f32 %v2422_v56, %v2309_v63  ;;  %v2116_v25 = vsel %vm1247_vm1, %v6743_v1, %v5574_v60  ;;  %v2752_v2 = vsel %vm1247_vm1, %v6912_v5, %v5575_v59  ;;  %v5312_v1 = vld [vmem:[%s7905_s3 + $0x1b8] sm:$0xff]  ;;  %v7045_v63 = vld [vmem:[#allocation3 + $0x187] sm:$0xff] }
 0x3a3   : > { %2320 = vmatmul.f32.gmra.mxu1 %v2116_v25  ;;  %2959 = vmatmul.f32.gmra.mxu3 %v2752_v2  ;;  %7919 = vst [vmem:[#allocation11_spill] sm:$0xff] %v7045_v63 }
 0x3a4   : > { %2491 = vst.msk [vmem:[#allocation4 + $0x70] sm:$0xff] %vm2476_vm3, %v2423_v3  ;;  %5246 = vmatmul.msk.f32.gmra.mxu2 %vm1247_vm1, %v6919_v36  ;;  %3365 = vrot.lane.b32.xlu2 %v6630_v50, %s5709_s25  ;;  %v3251_v50 = vld [vmem:[#allocation3 + $0xe8] sm:$0xff] }
 0x3a5   : > { %3351 = vrot.lane.b32.xlu1 %v3248_v40, %s5709_s25  ;;  %3594 = vmatpush.msra.mxu1 %v5312_v1  ;;  %v7053_v1 = vld [vmem:[#allocation3 + $0x89] sm:$0xff] }
 0x3a7   : > { %3355 = vrot.lane.b32.xlu0 %v3250_v47, %s5709_s25  ;;  %3595 = vmatpush.msra.mxu1 %v5311_v38  ;;  %v7059_v38 = vld [vmem:[#allocation3 + $0x18f] sm:$0xff] }
 0x3a8   : > { %7920 = vst [vmem:[#allocation12_spill] sm:$0xff] %v7059_v38 }
 0x3ac   : > { %5247 = vmatmul.msk.f32.gmra.mxu2 %vm1247_vm1, %v6930_v16  ;;  %3371 = vrot.lane.b32.xlu2 %v6709_v21, %s5709_s25 }
 0x3ad   : > { %3357 = vrot.lane.b32.xlu1 %v3251_v50, %s5709_s25 }
 0x3af   : > { %3361 = vrot.lane.b32.xlu0 %v6584_v33, %s5709_s25 }
 0x3b4   : > { %5248 = vmatmul.msk.f32.gmra.mxu2 %vm1247_vm1, %v6939_v20  ;;  %3377 = vrot.lane.b32.xlu2 %v6802_v18, %s5709_s25 }
 0x3b5   : > { %3363 = vrot.lane.b32.xlu1 %v6598_v13, %s5709_s25  ;;  %v5578_v33 = vpop.permute.xlu2 %5577  ;;  %v2573_v13 = vld [vmem:[#allocation3 + $0x29] sm:$0xff] }
 0x3b6   : > { %v5580_v21 = vunpack.i.h.bf16 %v5578_v33  ;;  %v5579_v22 = vunpack.i.l.bf16 %v5578_v33 }
 0x3b7   : > { %3367 = vrot.lane.b32.xlu0 %v6649_v24, %s5709_s25  ;;  %v5323_v24 = vld [vmem:[%s7905_s3 + $0x210] sm:$0xff] }
 0x3b8   : > { %v2117_v18 = vsel %vm1247_vm1, %v6758_v15, %v5579_v22  ;;  %v2753_v54 = vsel %vm1247_vm1, %v6952_v17, %v5580_v21  ;;  %3712 = vmatpush.msra.mxu3 %v5323_v24  ;;  %v6970_v15 = vpop.f32.mrf.mxu3 }
 0x3b9   : > { %2323 = vmatmul.f32.gmra.mxu1 %v2117_v18  ;;  %2962 = vmatmul.f32.gmra.mxu3 %v2753_v54  ;;  %v5307_v18 = vld [vmem:[%s7905_s3 + $0x190] sm:$0xff] }
 0x3bc   : > { %5273 = vmatmul.msk.f32.vlgmr.msra.gmra.mxu2 %vm1247_vm1, %v2573_v13  ;;  %3383 = vrot.lane.b32.xlu2 %v6827_v14, %s5709_s25  ;;  %v6986_v14 = vpop.f32.mrf.mxu2 }
 0x3bd   : > { %3369 = vrot.lane.b32.xlu1 %v6678_v53, %s5709_s25  ;;  %v5310_v53 = vld [vmem:[%s7905_s3 + $0x1a8] sm:$0xff]  ;;  %v5593_v40 = vpop.permute.xlu2 %5592 }
 0x3be   : > { %3596 = vmatpush.msra.mxu1 %v5310_v53  ;;  %v5595_v47 = vunpack.i.h.bf16 %v5593_v40  ;;  %v5594_v50 = vunpack.i.l.bf16 %v5593_v40  ;;  %v2535_v40 = vld [vmem:[#allocation3 + $0x1c7] sm:$0xff] }
 0x3bf   : > { %3373 = vrot.lane.b32.xlu0 %v6764_v55, %s5709_s25 }
 0x3c0   : > { %v6984_v55 = vpop.f32.mrf.mxu3  ;;  %v2120_v33 = vsel %vm1247_vm1, %v6952_v17, %v5594_v50  ;;  %v2756_v21 = vsel %vm1247_vm1, %v7059_v38, %v5595_v47  ;;  %v7076_v17 = vld [vmem:[#allocation3 + $0x1a7] sm:$0xff] }
 0x3c1   : > { %7921 = vst [vmem:[#allocation13_spill] sm:$0xff] %v7076_v17 }
 0x3c4   : > { %5274 = vmatmul.msk.f32.gmra.mxu2 %vm1247_vm1, %v2574_v27  ;;  %3389 = vrot.lane.b32.xlu2 %v6845_v6, %s5709_s25  ;;  %v7005_v32 = vpop.f32.mrf.mxu2 }
 0x3c5   : > { %3375 = vrot.lane.b32.xlu1 %v6792_v51, %s5709_s25 }
 0x3c7   : > { %3379 = vrot.lane.b32.xlu0 %v6774_v31, %s5709_s25 }
 0x3c8   : > { %v6999_v6 = vpop.f32.mrf.mxu3 }
 0x3cc   : > { %5275 = vmatmul.msk.f32.gmra.mxu2 %vm1247_vm1, %v6988_v30  ;;  %3395 = vrot.lane.b32.xlu2 %v6863_v52, %s5709_s25 }
 0x3cd   : > { %3381 = vrot.lane.b32.xlu1 %v6810_v11, %s5709_s25 }
 0x3ce   : > { %v2312_v31 = vpop.f32.mrf.mxu1 }
 0x3cf   : > { %3385 = vrot.lane.b32.xlu0 %v6785_v43, %s5709_s25  ;;  %v2426_v51 = vadd.f32 %v2425_v19, %v2312_v31  ;;  %v5309_v43 = vld [vmem:[%s7905_s3 + $0x1a0] sm:$0xff] }
 0x3d0   : > { %3597 = vmatpush.msra.mxu1 %v5309_v43  ;;  %v7015_v28 = vpop.f32.mrf.mxu3  ;;  %v7084_v43 = vld [vmem:[#allocation3 + $0xa9] sm:$0xff] }
 0x3d1   : > { %2492 = vst.msk [vmem:[#allocation4 + $0x78] sm:$0xff] %vm2476_vm3, %v2426_v51 }
 0x3d2   : > { %3598 = vmatpush.msra.mxu1 %v5308_v46  ;;  %v5608_v46 = vpop.permute.xlu2 %5607 }
 0x3d4   : > { %5276 = vmatmul.msk.f32.gmra.mxu2 %vm1247_vm1, %v7001_v58  ;;  %3599 = vmatpush.msra.mxu1 %v5307_v18 }
 0x3d5   : > { %3387 = vrot.lane.b32.xlu1 %v6825_v7, %s5709_s25  ;;  %v7021_v7 = vpop.f32.mrf.mxu2 }
 0x3d6   : > { %v2315_v11 = vpop.f32.mrf.mxu1 }
 0x3d7   : > { %3391 = vrot.lane.b32.xlu0 %v6800_v10, %s5709_s25  ;;  %v2429_v52 = vadd.f32 %v2428_v61, %v2315_v11  ;;  %v5322_v10 = vld [vmem:[%s7905_s3 + $0x208] sm:$0xff]  ;;  %v7067_v61 = vld [vmem:[#allocation3 + $0x91] sm:$0xff] }
 0x3d8   : > { %3713 = vmatpush.msra.mxu3 %v5322_v10  ;;  %v7030_v44 = vpop.f32.mrf.mxu3  ;;  %v5321_v11 = vld [vmem:[%s7905_s3 + $0x200] sm:$0xff] }
 0x3d9   : > { %2493 = vst.msk [vmem:[#allocation4 + $0x80] sm:$0xff] %vm2476_vm3, %v2429_v52 }
 0x3da   : > { %3714 = vmatpush.msra.mxu3 %v5321_v11 }
 0x3dc   : > { %5277 = vmatmul.msk.f32.gmra.mxu2 %vm1247_vm1, %v7017_v34 }
 0x3dd   : > { %3393 = vrot.lane.b32.xlu1 %v6847_v12, %s5709_s25  ;;  %v7036_v12 = vld [vmem:[#allocation3 + $0x71] sm:$0xff]  ;;  %v7043_v56 = vpop.f32.mrf.mxu2 }
 0x3e0   : > { %v7051_v2 = vpop.f32.mrf.mxu3 }
 0x3e1   : > { %v5583_v35 = vpop.permute.xlu0 %5582 }
 0x3e2   : > { %v5585_v41 = vunpack.i.h.bf16 %v5583_v35  ;;  %v5584_v0 = vunpack.i.l.bf16 %v5583_v35 }
 0x3e4   : > { %v2118_v48 = vsel %vm1247_vm1, %v6874_v4, %v5584_v0  ;;  %v2754_v37 = vsel %vm1247_vm1, %v7028_v42, %v5585_v41  ;;  %5278 = vmatmul.msk.f32.gmra.mxu2 %vm1247_vm1, %v7036_v12  ;;  %v2534_v41 = vld [vmem:[#allocation3 + $0x1af] sm:$0xff] }
 0x3e5   : > { %2326 = vmatmul.f32.gmra.mxu1 %v2118_v48  ;;  %2965 = vmatmul.f32.gmra.mxu3 %v2754_v37  ;;  %v5588_v59 = vpop.permute.xlu1 %5587 }
 0x3e6   : > { %v5590_v60 = vunpack.i.h.bf16 %v5588_v59  ;;  %v5589_v4 = vunpack.i.l.bf16 %v5588_v59  ;;  %v7098_v59 = vld [vmem:[#allocation3 + $0xb1] sm:$0xff] }
 0x3e8   : > { %v2119_v3 = vsel %vm1247_vm1, %v6912_v5, %v5589_v4  ;;  %v2755_v25 = vsel %vm1247_vm1, %v7045_v63, %v5590_v60  ;;  %v7061_v5 = vpop.f32.mrf.mxu3  ;;  %v5306_v60 = vld [vmem:[%s7905_s3 + $0x188] sm:$0xff]  ;;  %v5610_v4 = vunpack.i.h.bf16 %v5608_v46 }
 0x3e9   : > { %v5598_v22 = vpop.permute.xlu0 %5597  ;;  %3600 = vmatpush.msra.mxu1 %v5306_v60 }
 0x3ea   : > { %v5600_v54 = vunpack.i.h.bf16 %v5598_v22  ;;  %v5599_v13 = vunpack.i.l.bf16 %v5598_v22  ;;  %v7112_v22 = vld [vmem:[#allocation3 + $0xc9] sm:$0xff] }
 0x3ec   : > { %5279 = vmatmul.msk.f32.gmra.mxu2 %vm1247_vm1, %v7053_v1  ;;  %v2121_v53 = vsel %vm1247_vm1, %v7028_v42, %v5599_v13  ;;  %v2757_v31 = vsel %vm1247_vm1, %v7076_v17, %v5600_v54 }
 0x3ed   : > { %2329 = vmatmul.f32.gmra.mxu1 %v2119_v3  ;;  %2968 = vmatmul.f32.gmra.mxu3 %v2755_v25  ;;  %v5603_v51 = vpop.permute.xlu1 %5602  ;;  %v5609_v3 = vunpack.i.l.bf16 %v5608_v46 }
 0x3ee   : > { %v5605_v52 = vunpack.i.h.bf16 %v5603_v51  ;;  %v5604_v10 = vunpack.i.l.bf16 %v5603_v51  ;;  %v2536_v51 = vld [vmem:[#allocation3 + $0x1cf] sm:$0xff] }
 0x3ef   : > { %v7057_v19 = vpop.f32.mrf.mxu2  ;;  %v2123_v50 = vsel %vm1247_vm1, %v7059_v38, %v5609_v3  ;;  %v2537_v3 = vld [vmem:[#allocation3 + $0x1e7] sm:$0xff]  ;;  %v2540_v38 = vld [vmem:[#allocation3 + $0x20f] sm:$0xff] }
 0x3f0   : > { %v7078_v27 = vpop.f32.mrf.mxu3  ;;  %v2122_v48 = vsel %vm1247_vm1, %v7045_v63, %v5604_v10  ;;  %v2758_v37 = vsel %vm1247_vm1, %v2534_v41, %v5605_v52 }
 0x3f4   : > { %5280 = vmatmul.msk.f32.gmra.mxu2 %vm1247_vm1, %v7067_v61 }
 0x3f5   : > { %2332 = vmatmul.f32.gmra.mxu1 %v2120_v33  ;;  %2971 = vmatmul.f32.gmra.mxu3 %v2756_v21  ;;  %v2759_v33 = vsel %vm1247_vm1, %v2535_v40, %v5610_v4  ;;  %v5613_v21 = vpop.permute.xlu0 %5612  ;;  %v5618_v10 = vpop.permute.xlu1 %5617 }
 0x3f6   : > { %v5615_v54 = vunpack.i.h.bf16 %v5613_v21  ;;  %v5614_v13 = vunpack.i.l.bf16 %v5613_v21  ;;  %v5620_v46 = vunpack.i.h.bf16 %v5618_v10  ;;  %v5619_v60 = vunpack.i.l.bf16 %v5618_v10  ;;  %v5623_v21 = vpop.permute.xlu2 %5622 }
 0x3f7   : > { %v7074_v24 = vpop.f32.mrf.mxu2 }
 0x3f8   : > { %v7093_v0 = vpop.f32.mrf.mxu3  ;;  %v2124_v11 = vsel %vm1247_vm1, %v7076_v17, %v5614_v13  ;;  %v2760_v52 = vsel %vm1247_vm1, %v2536_v51, %v5615_v54  ;;  %v5625_v13 = vunpack.i.h.bf16 %v5623_v21 }
 0x3fc   : > { %5281 = vmatmul.msk.f32.gmra.mxu2 %vm1247_vm1, %v7084_v43 }
 0x3fd   : > { %2335 = vmatmul.f32.gmra.mxu1 %v2121_v53  ;;  %2974 = vmatmul.f32.gmra.mxu3 %v2757_v31 }
 0x3ff   : > { %v7091_v35 = vpop.f32.mrf.mxu2 }
 0x400   : > { %v7107_v47 = vpop.f32.mrf.mxu3 }
 0x404   : > { %5282 = vmatmul.msk.f32.gmra.mxu2 %vm1247_vm1, %v7098_v59 }
 0x405   : > { %2338 = vmatmul.f32.gmra.mxu1 %v2122_v48  ;;  %2977 = vmatmul.f32.gmra.mxu3 %v2758_v37  ;;  %v7123_v48 = vld [vmem:[#allocation3 + $0xd1] sm:$0xff] }
 0x407   : > { %v7105_v25 = vpop.f32.mrf.mxu2 }
 0x408   : > { %v7125_v37 = vpop.f32.mrf.mxu3 }
 0x40c   : > { %5283 = vmatmul.msk.f32.gmra.mxu2 %vm1247_vm1, %v7112_v22 }
 0x40d   : > { %2341 = vmatmul.f32.gmra.mxu1 %v2123_v50  ;;  %2980 = vmatmul.f32.gmra.mxu3 %v2759_v33  ;;  %v2125_v50 = vsel %vm1247_vm1, %v2534_v41, %v5619_v60  ;;  %v2761_v33 = vsel %vm1247_vm1, %v2537_v3, %v5620_v46  ;;  %v2538_v41 = vld [vmem:[#allocation3 + $0x1ef] sm:$0xff]  ;;  %v5628_v60 = vpop.permute.xlu0 %5627 }
 0x40e   : > { %v2318_v18 = vpop.f32.mrf.mxu1  ;;  %v2762_v46 = vsel %vm1247_vm1, %v2538_v41, %v5625_v13  ;;  %v5629_v45 = vunpack.i.l.bf16 %v5628_v60  ;;  %v5633_v13 = vpop.permute.xlu1 %5632 }
 0x40f   : > { %v7116_v53 = vpop.f32.mrf.mxu2  ;;  %v2432_v31 = vadd.f32 %v6972_v26, %v2318_v18  ;;  %v5305_v26 = vld [vmem:[%s7905_s3 + $0x180] sm:$0xff]  ;;  %v7136_v18 = vld [vmem:[#allocation3 + $0xe9] sm:$0xff]  ;;  %v5634_v17 = vunpack.i.l.bf16 %v5633_v13 }
 0x410   : > { %3601 = vmatpush.msra.mxu1 %v5305_v26  ;;  %v7138_v54 = vpop.f32.mrf.mxu3 }
 0x411   : > { %2494 = vst.msk [vmem:[#allocation4 + $0x88] sm:$0xff] %vm2476_vm3, %v2432_v31  ;;  %v5624_v31 = vunpack.i.l.bf16 %v5623_v21  ;;  %v5630_v21 = vunpack.i.h.bf16 %v5628_v60  ;;  %v2128_v63 = vsel %vm1247_vm1, %v2537_v3, %v5634_v17 }
 0x413   : > { %v2126_v26 = vsel %vm1247_vm1, %v2535_v40, %v5624_v31  ;;  %v7158_v31 = vld [vmem:[#allocation3 + $0x109] sm:$0xff] }
 0x414   : > { %5284 = vmatmul.msk.f32.gmra.mxu2 %vm1247_vm1, %v7123_v48 }
 0x415   : > { %2344 = vmatmul.f32.gmra.mxu1 %v2124_v11  ;;  %2983 = vmatmul.f32.gmra.mxu3 %v2760_v52 }
 0x417   : > { %v7132_v4 = vpop.f32.mrf.mxu2 }
 0x41c   : > { %5285 = vmatmul.msk.f32.gmra.mxu2 %vm1247_vm1, %v7136_v18 }
 0x41d   : > { %2347 = vmatmul.f32.gmra.mxu1 %v2125_v50  ;;  %2986 = vmatmul.f32.gmra.mxu3 %v2761_v33  ;;  %v7148_v50 = vld [vmem:[#allocation3 + $0xf1] sm:$0xff]  ;;  %v7150_v33 = vpop.f32.mrf.mxu3 }
 0x41f   : > { %v7142_v11 = vpop.f32.mrf.mxu2 }
 0x420   : > { %v2321_v52 = vpop.f32.mrf.mxu1 }
 0x421   : > { %v2435_v10 = vadd.f32 %v6986_v14, %v2321_v52  ;;  %v2539_v52 = vld [vmem:[#allocation3 + $0x207] sm:$0xff] }
 0x422   : > { %v2763_v40 = vsel %vm1247_vm1, %v2539_v52, %v5630_v21 }
 0x423   : > { %2495 = vst.msk [vmem:[#allocation4 + $0x90] sm:$0xff] %vm2476_vm3, %v2435_v10  ;;  %v2127_v10 = vsel %vm1247_vm1, %v2536_v51, %v5629_v45  ;;  %v7168_v51 = vld [vmem:[#allocation3 + $0x111] sm:$0xff] }
 0x424   : > { %5286 = vmatmul.msk.f32.gmra.mxu2 %vm1247_vm1, %v7148_v50 }
 0x425   : > { %2350 = vmatmul.f32.gmra.mxu1 %v2126_v26  ;;  %2989 = vmatmul.f32.gmra.mxu3 %v2762_v46  ;;  %v7160_v26 = vpop.f32.mrf.mxu3  ;;  %v5635_v46 = vunpack.i.h.bf16 %v5633_v13 }
 0x427   : > { %v7154_v14 = vpop.f32.mrf.mxu2  ;;  %v2764_v45 = vsel %vm1247_vm1, %v2540_v38, %v5635_v46  ;;  %v3338_v46 = vpop.permute.xlu0 %3337 }
 0x42c   : > { %5287 = vmatmul.msk.f32.gmra.mxu2 %vm1247_vm1, %v7158_v31 }
 0x42d   : > { %2353 = vmatmul.f32.gmra.mxu1 %v2127_v10  ;;  %2992 = vmatmul.f32.gmra.mxu3 %v2763_v40  ;;  %v7170_v21 = vpop.f32.mrf.mxu3  ;;  %v2065_v10 = vpop.permute.xlu2 %2064 }
 0x42e   : > { %v2129_v17 = vsel %vm1247_vm1, %v2538_v41, %v2065_v10  ;;  %v7190_v10 = vld [vmem:[#allocation3 + $0x131] sm:$0xff] }
 0x42f   : > { %v7164_v60 = vpop.f32.mrf.mxu2 }
 0x434   : > { %5288 = vmatmul.msk.f32.gmra.mxu2 %vm1247_vm1, %v7168_v51 }
 0x435   : > { %2356 = vmatmul.f32.gmra.mxu1 %v2128_v63  ;;  %2995 = vmatmul.f32.gmra.mxu3 %v2764_v45  ;;  %v7179_v63 = vld [vmem:[#allocation3 + $0x129] sm:$0xff]  ;;  %v7183_v38 = vpop.f32.mrf.mxu3 }
 0x436   : > { %v2324_v40 = vpop.f32.mrf.mxu1 }
 0x437   : > { %v7174_v52 = vpop.f32.mrf.mxu2  ;;  %v2438_v13 = vadd.f32 %v7005_v32, %v2324_v40  ;;  %v3112_v32 = vld [vmem:[#allocation4] sm:$0xff] }
 0x438   : > { %v3209_v40 = vld [vmem:[#allocation3 + $0x47] sm:$0xff] }
 0x439   : > { %2496 = vst.msk [vmem:[#allocation4 + $0x98] sm:$0xff] %vm2476_vm3, %v2438_v13  ;;  %v3433_v41 = vsel %vm1247_vm1, %v3209_v40, %v3338_v46  ;;  %v3210_v46 = vld [vmem:[#allocation3 + $0x4f] sm:$0xff] }
 0x43c   : > { %5289 = vmatmul.msk.f32.gmra.mxu2 %vm1247_vm1, %v7179_v63 }
 0x43d   : > { %2359 = vmatmul.f32.gmra.mxu1 %v2129_v17  ;;  %5329 = vmatmul.msk.f32.vlgmr.msra.gmra.mxu3 %vm1247_vm1, %v6988_v30  ;;  %v7196_v30 = vpop.f32.mrf.mxu3 }
 0x43f   : > { %v3016_v3 = vpop.f32.mrf.mxu2 }
 0x440   : > { %v3017_v45 = vadd.f32 %v3016_v3, %v6958_v23  ;;  %v3340_v23 = vpop.permute.xlu1 %3339 }
 0x441   : > { %v3434_v40 = vsel %vm1247_vm1, %v3210_v46, %v3340_v23  ;;  %v3211_v23 = vld [vmem:[#allocation3 + $0x67] sm:$0xff]  ;;  %v7212_v46 = vld [vmem:[#allocation3 + $0x151] sm:$0xff] }
 0x442   : > { %v3144_v13 = vadd.f32 %v3112_v32, %v3017_v45  ;;  %v3113_v45 = vld [vmem:[#allocation4 + $0x8] sm:$0xff] }
 0x444   : > { %3176 = vst.msk [vmem:[#allocation4] sm:$0xff] %vm2476_vm3, %v3144_v13  ;;  %5290 = vmatmul.msk.f32.gmra.mxu2 %vm1247_vm1, %v7190_v10  ;;  %v7201_v13 = vld [vmem:[#allocation3 + $0x149] sm:$0xff] }
 0x445   : > { %3602 = vmatmul.f32.vlgmr.msra.gmra.mxu1 %v3433_v41  ;;  %5330 = vmatmul.msk.f32.gmra.mxu3 %vm1247_vm1, %v7001_v58  ;;  %v7207_v58 = vpop.f32.mrf.mxu3 }
 0x447   : > { %v3019_v17 = vpop.f32.mrf.mxu2 }
 0x448   : > { %v3020_v3 = vadd.f32 %v3019_v17, %v6970_v15  ;;  %v3342_v15 = vpop.permute.xlu2 %3341 }
 0x44a   : > { %v3145_v32 = vadd.f32 %v3113_v45, %v3020_v3  ;;  %v3114_v3 = vld [vmem:[#allocation4 + $0x10] sm:$0xff] }
 0x44c   : > { %3177 = vst.msk [vmem:[#allocation4 + $0x8] sm:$0xff] %vm2476_vm3, %v3145_v32  ;;  %5291 = vmatmul.msk.f32.gmra.mxu2 %vm1247_vm1, %v7201_v13  ;;  %v3435_v32 = vsel %vm1247_vm1, %v3211_v23, %v3342_v15  ;;  %v3212_v15 = vld [vmem:[#allocation3 + $0x6f] sm:$0xff] }
 0x44d   : > { %3605 = vmatmul.f32.gmra.mxu1 %v3434_v40  ;;  %5331 = vmatmul.msk.f32.gmra.mxu3 %vm1247_vm1, %v7017_v34  ;;  %v7218_v34 = vpop.f32.mrf.mxu3 }
 0x44f   : > { %v3022_v41 = vpop.f32.mrf.mxu2 }
 0x450   : > { %v3023_v17 = vadd.f32 %v3022_v41, %v6984_v55  ;;  %v3344_v55 = vpop.permute.xlu0 %3343 }
 0x452   : > { %v3146_v45 = vadd.f32 %v3114_v3, %v3023_v17  ;;  %v3115_v17 = vld [vmem:[#allocation4 + $0x18] sm:$0xff] }
 0x454   : > { %3178 = vst.msk [vmem:[#allocation4 + $0x10] sm:$0xff] %vm2476_vm3, %v3146_v45  ;;  %5292 = vmatmul.msk.f32.gmra.mxu2 %vm1247_vm1, %v7212_v46  ;;  %v3436_v45 = vsel %vm1247_vm1, %v3212_v15, %v3344_v55  ;;  %v3213_v15 = vld [vmem:[#allocation3 + $0x87] sm:$0xff] }
 0x455   : > { %3608 = vmatmul.f32.gmra.mxu1 %v3435_v32  ;;  %5332 = vmatmul.msk.f32.gmra.mxu3 %vm1247_vm1, %v7036_v12  ;;  %v7227_v12 = vpop.f32.mrf.mxu3  ;;  %v3346_v32 = vpop.permute.xlu1 %3345 }
 0x457   : > { %v3025_v40 = vpop.f32.mrf.mxu2 }
 0x458   : > { %v3026_v41 = vadd.f32 %v3025_v40, %v6999_v6  ;;  %v3116_v40 = vld [vmem:[#allocation4 + $0x20] sm:$0xff] }
 0x45a   : > { %v3147_v3 = vadd.f32 %v3115_v17, %v3026_v41 }
 0x45c   : > { %3179 = vst.msk [vmem:[#allocation4 + $0x18] sm:$0xff] %vm2476_vm3, %v3147_v3  ;;  %5293 = vmatmul.msk.f32.gmra.mxu2 %vm1247_vm1, %v6790_v49  ;;  %v3437_v3 = vsel %vm1247_vm1, %v3213_v15, %v3346_v32 }
 0x45d   : > { %3611 = vmatmul.f32.gmra.mxu1 %v3436_v45  ;;  %5333 = vmatmul.msk.f32.gmra.mxu3 %vm1247_vm1, %v7053_v1 }
 0x45f   : > { %v3028_v23 = vpop.f32.mrf.mxu2 }
 0x460   : > { %v3029_v6 = vadd.f32 %v3028_v23, %v7015_v28  ;;  %v3348_v28 = vpop.permute.xlu2 %3347  ;;  %v3117_v23 = vld [vmem:[#allocation4 + $0x28] sm:$0xff] }
 0x462   : > { %v2327_v41 = vpop.f32.mrf.mxu1  ;;  %v3148_v17 = vadd.f32 %v3116_v40, %v3029_v6  ;;  %v3214_v6 = vld [vmem:[#allocation3 + $0x8f] sm:$0xff] }
 0x463   : > { %v2441_v55 = vadd.f32 %v7021_v7, %v2327_v41  ;;  %v3438_v41 = vsel %vm1247_vm1, %v3214_v6, %v3348_v28 }
 0x464   : > { %3180 = vst.msk [vmem:[#allocation4 + $0x20] sm:$0xff] %vm2476_vm3, %v3148_v17  ;;  %5294 = vmatmul.msk.f32.gmra.mxu2 %vm1247_vm1, %v6808_v57 }
 0x465   : > { %3614 = vmatmul.f32.gmra.mxu1 %v3437_v3  ;;  %5334 = vmatmul.msk.f32.gmra.mxu3 %vm1247_vm1, %v7067_v61  ;;  %2497 = vst.msk [vmem:[#allocation4 + $0xa0] sm:$0xff] %vm2476_vm3, %v2441_v55  ;;  %v3118_v55 = vld [vmem:[#allocation4 + $0x30] sm:$0xff]  ;;  %v3215_v3 = vld [vmem:[#allocation3 + $0xa7] sm:$0xff] }
 0x467   : > { %v3031_v1 = vpop.f32.mrf.mxu2 }
 0x468   : > { %v7238_v49 = vpop.f32.mrf.mxu3  ;;  %v3032_v7 = vadd.f32 %v3031_v1, %v7030_v44  ;;  %v3350_v44 = vpop.permute.xlu0 %3349 }
 0x469   : > { %v3439_v1 = vsel %vm1247_vm1, %v3215_v3, %v3350_v44  ;;  %v3120_v44 = vld [vmem:[#allocation4 + $0x40] sm:$0xff]  ;;  %v3121_v3 = vld [vmem:[#allocation4 + $0x48] sm:$0xff] }
 0x46a   : > { %v2330_v45 = vpop.f32.mrf.mxu1  ;;  %v3149_v40 = vadd.f32 %v3117_v23, %v3032_v7 }
 0x46b   : > { %v2444_v32 = vadd.f32 %v7043_v56, %v2330_v45  ;;  %v3119_v45 = vld [vmem:[#allocation4 + $0x38] sm:$0xff] }
 0x46c   : > { %3181 = vst.msk [vmem:[#allocation4 + $0x28] sm:$0xff] %vm2476_vm3, %v3149_v40  ;;  %5295 = vmatmul.msk.f32.gmra.mxu2 %vm1247_vm1, %v6830_v9 }
 0x46d   : > { %2498 = vst.msk [vmem:[#allocation4 + $0xa8] sm:$0xff] %vm2476_vm3, %v2444_v32  ;;  %3617 = vmatmul.f32.gmra.mxu1 %v3438_v41  ;;  %5335 = vmatmul.msk.f32.gmra.mxu3 %vm1247_vm1, %v7084_v43  ;;  %v3216_v32 = vld [vmem:[#allocation3 + $0xaf] sm:$0xff] }
 0x46f   : > { %v3034_v61 = vpop.f32.mrf.mxu2 }
 0x470   : > { %v7249_v57 = vpop.f32.mrf.mxu3  ;;  %v3035_v56 = vadd.f32 %v3034_v61, %v7051_v2  ;;  %v3352_v2 = vpop.permute.xlu1 %3351 }
 0x471   : > { %v3440_v40 = vsel %vm1247_vm1, %v3216_v32, %v3352_v2 }
 0x472   : > { %v2333_v17 = vpop.f32.mrf.mxu1  ;;  %v3150_v28 = vadd.f32 %v3118_v55, %v3035_v56  ;;  %v3217_v56 = vld [vmem:[#allocation3 + $0xc7] sm:$0xff] }
 0x473   : > { %v2447_v15 = vadd.f32 %v7057_v19, %v2333_v17 }
 0x474   : > { %3182 = vst.msk [vmem:[#allocation4 + $0x30] sm:$0xff] %vm2476_vm3, %v3150_v28  ;;  %5296 = vmatmul.msk.f32.gmra.mxu2 %vm1247_vm1, %v6849_v8 }
 0x475   : > { %2499 = vst.msk [vmem:[#allocation4 + $0xb0] sm:$0xff] %vm2476_vm3, %v2447_v15  ;;  %3620 = vmatmul.f32.gmra.mxu1 %v3439_v1  ;;  %5336 = vmatmul.msk.f32.gmra.mxu3 %vm1247_vm1, %v7098_v59  ;;  %v3218_v1 = vld [vmem:[#allocation3 + $0xcf] sm:$0xff] }
 0x477   : > { %v3037_v43 = vpop.f32.mrf.mxu2 }
 0x478   : > { %v7260_v9 = vpop.f32.mrf.mxu3  ;;  %v3038_v19 = vadd.f32 %v3037_v43, %v7061_v5  ;;  %v3354_v5 = vpop.permute.xlu2 %3353 }
 0x479   : > { %v3441_v55 = vsel %vm1247_vm1, %v3217_v56, %v3354_v5  ;;  %v3123_v5 = vld [vmem:[#allocation4 + $0x58] sm:$0xff]  ;;  %v3124_v56 = vld [vmem:[#allocation4 + $0x60] sm:$0xff] }
 0x47a   : > { %v2336_v7 = vpop.f32.mrf.mxu1  ;;  %v3151_v6 = vadd.f32 %v3119_v45, %v3038_v19 }
 0x47b   : > { %v2450_v23 = vadd.f32 %v7074_v24, %v2336_v7  ;;  %v3122_v7 = vld [vmem:[#allocation4 + $0x50] sm:$0xff] }
 0x47c   : > { %3183 = vst.msk [vmem:[#allocation4 + $0x38] sm:$0xff] %vm2476_vm3, %v3151_v6  ;;  %5297 = vmatmul.msk.f32.gmra.mxu2 %vm1247_vm1, %v6865_v62 }
 0x47d   : > { %2500 = vst.msk [vmem:[#allocation4 + $0xb8] sm:$0xff] %vm2476_vm3, %v2450_v23  ;;  %3623 = vmatmul.f32.gmra.mxu1 %v3440_v40  ;;  %5337 = vmatmul.msk.f32.gmra.mxu3 %vm1247_vm1, %v7112_v22  ;;  %v3219_v23 = vld [vmem:[#allocation3 + $0xe7] sm:$0xff] }
 0x47f   : > { %v3040_v59 = vpop.f32.mrf.mxu2 }
 0x480   : > { %v7271_v8 = vpop.f32.mrf.mxu3  ;;  %v3041_v24 = vadd.f32 %v3040_v59, %v7078_v27  ;;  %v3356_v27 = vpop.permute.xlu0 %3355 }
 0x481   : > { %v3442_v43 = vsel %vm1247_vm1, %v3218_v1, %v3356_v27  ;;  %v3222_v1 = vld [vmem:[#allocation3 + $0x10f] sm:$0xff] }
 0x482   : > { %v2339_v41 = vpop.f32.mrf.mxu1  ;;  %v3152_v17 = vadd.f32 %v3120_v44, %v3041_v24  ;;  %v3220_v24 = vld [vmem:[#allocation3 + $0xef] sm:$0xff] }
 0x483   : > { %v2453_v61 = vadd.f32 %v7091_v35, %v2339_v41 }
 0x484   : > { %3184 = vst.msk [vmem:[#allocation4 + $0x40] sm:$0xff] %vm2476_vm3, %v3152_v17  ;;  %5298 = vmatmul.msk.f32.gmra.mxu2 %vm1247_vm1, %v6880_v29 }
 0x485   : > { %2501 = vst.msk [vmem:[#allocation4 + $0xc0] sm:$0xff] %vm2476_vm3, %v2453_v61  ;;  %3626 = vmatmul.f32.gmra.mxu1 %v3441_v55  ;;  %5338 = vmatmul.msk.f32.gmra.mxu3 %vm1247_vm1, %v7123_v48  ;;  %v3221_v55 = vld [vmem:[#allocation3 + $0x107] sm:$0xff] }
 0x487   : > { %v3043_v22 = vpop.f32.mrf.mxu2 }
 0x488   : > { %v7282_v62 = vpop.f32.mrf.mxu3  ;;  %v3044_v35 = vadd.f32 %v3043_v22, %v7093_v0  ;;  %v3358_v0 = vpop.permute.xlu1 %3357 }
 0x489   : > { %v3443_v6 = vsel %vm1247_vm1, %v3219_v23, %v3358_v0 }
 0x48a   : > { %v2342_v15 = vpop.f32.mrf.mxu1  ;;  %v3153_v2 = vadd.f32 %v3121_v3, %v3044_v35  ;;  %v3125_v3 = vld [vmem:[#allocation4 + $0x68] sm:$0xff] }
 0x48b   : > { %v2456_v28 = vadd.f32 %v7105_v25, %v2342_v15 }
 0x48c   : > { %3185 = vst.msk [vmem:[#allocation4 + $0x48] sm:$0xff] %vm2476_vm3, %v3153_v2  ;;  %5299 = vmatmul.msk.f32.gmra.mxu2 %vm1247_vm1, %v6902_v39 }
 0x48d   : > { %2502 = vst.msk [vmem:[#allocation4 + $0xc8] sm:$0xff] %vm2476_vm3, %v2456_v28  ;;  %3629 = vmatmul.f32.gmra.mxu1 %v3442_v43  ;;  %5339 = vmatmul.msk.f32.gmra.mxu3 %vm1247_vm1, %v7136_v18  ;;  %v3272_v43 = vld [vmem:[#allocation3 + $0x230] sm:$0xff] }
 0x48e   : > { %3399 = vrot.lane.b32.xlu1 %v3272_v43, %s5709_s25 }
 0x48f   : > { %v3046_v48 = vpop.f32.mrf.mxu2 }
 0x490   : > { %v7293_v29 = vpop.f32.mrf.mxu3  ;;  %v3047_v25 = vadd.f32 %v3046_v48, %v7107_v47  ;;  %v3360_v47 = vpop.permute.xlu2 %3359 }
 0x491   : > { %v3444_v44 = vsel %vm1247_vm1, %v3220_v24, %v3360_v47 }
 0x492   : > { %v2345_v19 = vpop.f32.mrf.mxu1  ;;  %v3154_v32 = vadd.f32 %v3122_v7, %v3047_v25 }
 0x493   : > { %v2459_v45 = vadd.f32 %v7116_v53, %v2345_v19  ;;  %v3126_v19 = vld [vmem:[#allocation4 + $0x70] sm:$0xff] }
 0x494   : > { %3186 = vst.msk [vmem:[#allocation4 + $0x50] sm:$0xff] %vm2476_vm3, %v3154_v32  ;;  %5300 = vmatmul.msk.f32.gmra.mxu2 %vm1247_vm1, %v6919_v36  ;;  %v7347_v32 = vld [vmem:[#allocation3 + $0x211] sm:$0xff] }
 0x495   : > { %2503 = vst.msk [vmem:[#allocation4 + $0xd0] sm:$0xff] %vm2476_vm3, %v2459_v45  ;;  %3632 = vmatmul.f32.gmra.mxu1 %v3443_v6  ;;  %5340 = vmatmul.msk.f32.gmra.mxu3 %vm1247_vm1, %v7148_v50  ;;  %v3223_v45 = vld [vmem:[#allocation3 + $0x127] sm:$0xff] }
 0x497   : > { %v3049_v18 = vpop.f32.mrf.mxu2 }
 0x498   : > { %v7304_v39 = vpop.f32.mrf.mxu3  ;;  %v3050_v53 = vadd.f32 %v3049_v18, %v7125_v37  ;;  %v3362_v37 = vpop.permute.xlu0 %3361 }
 0x499   : > { %v3445_v22 = vsel %vm1247_vm1, %v3221_v55, %v3362_v37 }
 0x49a   : > { %v2348_v40 = vpop.f32.mrf.mxu1  ;;  %v3155_v41 = vadd.f32 %v3123_v5, %v3050_v53  ;;  %v3127_v53 = vld [vmem:[#allocation4 + $0x78] sm:$0xff]  ;;  %v3224_v5 = vld [vmem:[#allocation3 + $0x12f] sm:$0xff] }
 0x49b   : > { %v2462_v59 = vadd.f32 %v7132_v4, %v2348_v40 }
 0x49c   : > { %3187 = vst.msk [vmem:[#allocation4 + $0x58] sm:$0xff] %vm2476_vm3, %v3155_v41  ;;  %5301 = vmatmul.msk.f32.gmra.mxu2 %vm1247_vm1, %v6930_v16 }
 0x49d   : > { %2504 = vst.msk [vmem:[#allocation4 + $0xd8] sm:$0xff] %vm2476_vm3, %v2462_v59  ;;  %3635 = vmatmul.f32.gmra.mxu1 %v3444_v44  ;;  %5341 = vmatmul.msk.f32.gmra.mxu3 %vm1247_vm1, %v7158_v31  ;;  %v3271_v31 = vld [vmem:[#allocation3 + $0x228] sm:$0xff] }
 0x49e   : > { %3397 = vrot.lane.b32.xlu0 %v3271_v31, %s5709_s25 }
 0x49f   : > { %v3052_v50 = vpop.f32.mrf.mxu2 }
 0x4a0   : > { %v7315_v36 = vpop.f32.mrf.mxu3  ;;  %v3053_v4 = vadd.f32 %v3052_v50, %v7138_v54  ;;  %v3364_v54 = vpop.permute.xlu1 %3363  ;;  %v3128_v50 = vld [vmem:[#allocation4 + $0x80] sm:$0xff] }
 0x4a2   : > { %v2351_v61 = vpop.f32.mrf.mxu1  ;;  %v3156_v27 = vadd.f32 %v3124_v56, %v3053_v4  ;;  %v3225_v4 = vld [vmem:[#allocation3 + $0x147] sm:$0xff] }
 0x4a3   : > { %v2465_v17 = vadd.f32 %v7142_v11, %v2351_v61  ;;  %v3812_v56 = vld [vmem:[#allocation4] sm:$0xff] }
 0x4a4   : > { %3188 = vst.msk [vmem:[#allocation4 + $0x60] sm:$0xff] %vm2476_vm3, %v3156_v27  ;;  %5302 = vmatmul.msk.f32.gmra.mxu2 %vm1247_vm1, %v6939_v20  ;;  %v7333_v20 = vld [vmem:[#allocation3 + $0x209] sm:$0xff] }
 0x4a5   : > { %2505 = vst.msk [vmem:[#allocation4 + $0xe0] sm:$0xff] %vm2476_vm3, %v2465_v17  ;;  %3638 = vmatmul.f32.gmra.mxu1 %v3445_v22  ;;  %5342 = vmatmul.msk.f32.gmra.mxu3 %vm1247_vm1, %v7168_v51  ;;  %v3446_v51 = vsel %vm1247_vm1, %v3222_v1, %v3364_v54  ;;  %v3129_v54 = vld [vmem:[#allocation4 + $0x88] sm:$0xff] }
 0x4a6   : > { %v3291_v1 = vld [vmem:[#allocation3 + $0x169] sm:$0xff] }
 0x4a7   : > { %v3055_v11 = vpop.f32.mrf.mxu2 }
 0x4a8   : > { %v7327_v16 = vpop.f32.mrf.mxu3  ;;  %v3056_v35 = vadd.f32 %v3055_v11, %v7150_v33  ;;  %v3370_v41 = vpop.permute.xlu1 %3369 }
 0x4a9   : > { %v3449_v17 = vsel %vm1247_vm1, %v3225_v4, %v3370_v41  ;;  %v3815_v41 = vld [vmem:[#allocation4 + $0x18] sm:$0xff] }
 0x4aa   : > { %v2354_v15 = vpop.f32.mrf.mxu1  ;;  %v3157_v2 = vadd.f32 %v3125_v3, %v3056_v35  ;;  %v3226_v35 = vld [vmem:[#allocation3 + $0x14f] sm:$0xff] }
 0x4ab   : > { %v2468_v28 = vadd.f32 %v7154_v14, %v2354_v15  ;;  %v3366_v14 = vpop.permute.xlu2 %3365  ;;  %v7922_v15 = vmov 0.0  }
 0x4ac   : > { %3189 = vst.msk [vmem:[#allocation4 + $0x68] sm:$0xff] %vm2476_vm3, %v3157_v2  ;;  %5303 = vmatmul.msk.f32.gmra.mxu2 %vm1247_vm1, %v7333_v20 }
 0x4ad   : > { %2506 = vst.msk [vmem:[#allocation4 + $0xe8] sm:$0xff] %vm2476_vm3, %v2468_v28  ;;  %3641 = vmatmul.f32.gmra.mxu1 %v3446_v51  ;;  %5343 = vmatmul.msk.f32.gmra.mxu3 %vm1247_vm1, %v7179_v63  ;;  %v3447_v63 = vsel %vm1247_vm1, %v3223_v45, %v3366_v14  ;;  %v3813_v28 = vld [vmem:[#allocation4 + $0x8] sm:$0xff] }
 0x4ae   : > { %4033 = vst.msk [vmem:[#allocation5 + $0x10] sm:$0x1] %vm4022_vm4, %v7922_v15  ;;  %v3227_v45 = vld [vmem:[#allocation3 + $0x167] sm:$0xff] }
 0x4af   : > { %v3058_v0 = vpop.f32.mrf.mxu2  ;;  %4023 = vst.msk [vmem:[#allocation5 + $0x7] sm:$0x1] %vm4022_vm4, %v7922_v15 }
 0x4b0   : > { %v7341_v33 = vpop.f32.mrf.mxu3  ;;  %v3059_v48 = vadd.f32 %v3058_v0, %v7160_v26  ;;  %4024 = vst.msk [vmem:[#allocation5 + $0x1f] sm:$0x1] %vm4022_vm4, %v7922_v15 }
 0x4b1   : > { %4025 = vst.msk [vmem:[#allocation5 + $0x37] sm:$0x1] %vm4022_vm4, %v7922_v15 }
 0x4b2   : > { %v2357_v25 = vpop.f32.mrf.mxu1  ;;  %v3158_v23 = vadd.f32 %v3126_v19, %v3059_v48  ;;  %4026 = vst.msk [vmem:[#allocation5 + $0x4f] sm:$0x1] %vm4022_vm4, %v7922_v15  ;;  %v3130_v19 = vld [vmem:[#allocation4 + $0x90] sm:$0xff] }
 0x4b3   : > { %v2471_v7 = vadd.f32 %v7164_v60, %v2357_v25  ;;  %v3368_v60 = vpop.permute.xlu0 %3367  ;;  %v3372_v27 = vpop.permute.xlu2 %3371  ;;  %4027 = vst.msk [vmem:[#allocation5 + $0x67] sm:$0x1] %vm4022_vm4, %v7922_v15  ;;  %v4060_v25 = vld [vmem:[#allocation5 + $0x8] sm:$0xff] }
 0x4b4   : > { %3190 = vst.msk [vmem:[#allocation4 + $0x70] sm:$0xff] %vm2476_vm3, %v3158_v23  ;;  %5304 = vmatmul.msk.f32.gmra.mxu2 %vm1247_vm1, %v7347_v32  ;;  %v3448_v24 = vsel %vm1247_vm1, %v3224_v5, %v3368_v60  ;;  %4084 = vrot.lane.b32.xlu2 %v4060_v25, %s5710_s29  ;;  %v3292_v60 = vld [vmem:[#allocation3 + $0x171] sm:$0xff] }
 0x4b5   : > { %2507 = vst.msk [vmem:[#allocation4 + $0xf0] sm:$0xff] %vm2476_vm3, %v2471_v7  ;;  %3644 = vmatmul.f32.gmra.mxu1 %v3447_v63  ;;  %5344 = vmatmul.msk.f32.gmra.mxu3 %vm1247_vm1, %v7190_v10  ;;  %v4068_v48 = vld [vmem:[#allocation5 + $0x9] sm:$0xff] }
 0x4b6   : > { %4116 = vrot.lane.b32.xlu0 %v4068_v48, %s5709_s25  ;;  %4028 = vst.msk [vmem:[#allocation5 + $0x7f] sm:$0x1] %vm4022_vm4, %v7922_v15  ;;  %v3814_v63 = vld [vmem:[#allocation4 + $0x10] sm:$0xff] }
 0x4b7   : > { %v3061_v6 = vpop.f32.mrf.mxu2  ;;  %4029 = vst.msk [vmem:[#allocation5 + $0x97] sm:$0x1] %vm4022_vm4, %v7922_v15 }
 0x4b8   : > { %v7354_v26 = vpop.f32.mrf.mxu3  ;;  %v3062_v47 = vadd.f32 %v3061_v6, %v7170_v21  ;;  %4030 = vst.msk [vmem:[#allocation5 + $0xaf] sm:$0x1] %vm4022_vm4, %v7922_v15 }
 0x4b9   : > { %4031 = vst.msk [vmem:[#allocation5 + $0xc7] sm:$0x1] %vm4022_vm4, %v7922_v15 }
 0x4ba   : > { %v2360_v18 = vpop.f32.mrf.mxu1  ;;  %v3159_v59 = vadd.f32 %v3127_v53, %v3062_v47  ;;  %4032 = vst.msk [vmem:[#allocation5 + $0xdf] sm:$0x1] %vm4022_vm4, %v7922_v15 }
 0x4bb   : > { %v2474_v40 = vadd.f32 %v7174_v52, %v2360_v18  ;;  %v3374_v51 = vpop.permute.xlu0 %3373  ;;  %v3376_v18 = vpop.permute.xlu1 %3375  ;;  %4034 = vst.msk [vmem:[#allocation5 + $0x28] sm:$0x1] %vm4022_vm4, %v7922_v15 }
 0x4bc   : > { %3191 = vst.msk [vmem:[#allocation4 + $0x78] sm:$0xff] %vm2476_vm3, %v3159_v59  ;;  %v3131_v59 = vld [vmem:[#allocation4 + $0x98] sm:$0xff] }
 0x4bd   : > { %2508 = vst.msk [vmem:[#allocation4 + $0xf8] sm:$0xff] %vm2476_vm3, %v2474_v40  ;;  %3647 = vmatmul.f32.gmra.mxu1 %v3448_v24  ;;  %5345 = vmatmul.msk.f32.gmra.mxu3 %vm1247_vm1, %v7201_v13 }
 0x4be   : > { %4035 = vst.msk [vmem:[#allocation5 + $0x40] sm:$0x1] %vm4022_vm4, %v7922_v15 }
 0x4bf   : > { %v3064_v44 = vpop.f32.mrf.mxu2  ;;  %4036 = vst.msk [vmem:[#allocation5 + $0x58] sm:$0x1] %vm4022_vm4, %v7922_v15 }
 0x4c0   : > { %v3716_v10 = vpop.f32.mrf.mxu3  ;;  %v3065_v21 = vadd.f32 %v3064_v44, %v7183_v38  ;;  %v3452_v44 = vsel %vm1247_vm1, %v7028_v42, %v3376_v18  ;;  %4037 = vst.msk [vmem:[#allocation5 + $0x70] sm:$0x1] %vm4022_vm4, %v7922_v15  ;;  %v3378_v42 = vpop.permute.xlu2 %3377 }
 0x4c1   : > { %4038 = vst.msk [vmem:[#allocation5 + $0x88] sm:$0x1] %vm4022_vm4, %v7922_v15 }
 0x4c2   : > { %v3603_v37 = vpop.f32.mrf.mxu1  ;;  %v3160_v61 = vadd.f32 %v3128_v50, %v3065_v21  ;;  %v3293_v21 = vld [vmem:[#allocation3 + $0x189] sm:$0xff]  ;;  %4039 = vst.msk [vmem:[#allocation5 + $0xa0] sm:$0x1] %vm4022_vm4, %v7922_v15 }
 0x4c3   : > { %v3717_v52 = vadd.f32 %v3716_v10, %v3603_v37  ;;  %4040 = vst.msk [vmem:[#allocation5 + $0xb8] sm:$0x1] %vm4022_vm4, %v7922_v15 }
 0x4c4   : > { %3192 = vst.msk [vmem:[#allocation4 + $0x80] sm:$0xff] %vm2476_vm3, %v3160_v61  ;;  %v3132_v61 = vld [vmem:[#allocation4 + $0xa0] sm:$0xff] }
 0x4c5   : > { %v3844_v55 = vadd.f32 %v3812_v56, %v3717_v52  ;;  %3650 = vmatmul.f32.gmra.mxu1 %v3449_v17  ;;  %5346 = vmatmul.msk.f32.gmra.mxu3 %vm1247_vm1, %v7212_v46  ;;  %v3450_v46 = vsel %vm1247_vm1, %v3226_v35, %v3372_v27  ;;  %v3816_v17 = vld [vmem:[#allocation4 + $0x20] sm:$0xff]  ;;  %4041 = vst.msk [vmem:[#allocation5 + $0xd0] sm:$0x1] %vm4022_vm4, %v7922_v15  ;;  %v4167_v35 = vld [vmem:[%s7907_s5 + $0x58] sm:$0xff] }
 0x4c6   : > { %4042 = vst.msk [vmem:[#allocation5 + $0xe8] sm:$0x1] %vm4022_vm4, %v7922_v15  ;;  %v7439_v15 = vld [vmem:[%s7906_s4] ss:$0 sm:$0xff]  ;;  %4197 = vmatpush.msrb.mxu2 %v4167_v35 }
 0x4c7   : > { %3876 = vst.msk [vmem:[#allocation4] sm:$0xff] %vm2476_vm3, %v3844_v55  ;;  %v3067_v38 = vpop.f32.mrf.mxu2  ;;  %v3294_v55 = vld [vmem:[#allocation3 + $0x191] sm:$0xff] }
 0x4c8   : > { %v3719_v13 = vpop.f32.mrf.mxu3  ;;  %v3068_v22 = vadd.f32 %v3067_v38, %v7196_v30 }
 0x4ca   : > { %v3606_v31 = vpop.f32.mrf.mxu1  ;;  %v3161_v3 = vadd.f32 %v3129_v54, %v3068_v22  ;;  %v7923_v22 = vld [vmem:[#allocation11_spill] sm:$0xff] }
 0x4cb   : > { %v3720_v11 = vadd.f32 %v3719_v13, %v3606_v31  ;;  %v3453_v31 = vsel %vm1247_vm1, %v7923_v22, %v3378_v42  ;;  %v4166_v42 = vld [vmem:[%s7907_s5 + $0x50] sm:$0xff] }
 0x4cc   : > { %3193 = vst.msk [vmem:[#allocation4 + $0x88] sm:$0xff] %vm2476_vm3, %v3161_v3  ;;  %4198 = vmatpush.msrb.mxu2 %v4166_v42 }
 0x4cd   : > { %v3845_v2 = vadd.f32 %v3813_v28, %v3720_v11  ;;  %3653 = vmatmul.f32.gmra.mxu1 %v3450_v46  ;;  %5347 = vmatmul.msk.f32.gmra.mxu3 %vm1247_vm1, %v3291_v1  ;;  %v3380_v1 = vpop.permute.xlu0 %3379 }
 0x4cf   : > { %3877 = vst.msk [vmem:[#allocation4 + $0x8] sm:$0xff] %vm2476_vm3, %v3845_v2  ;;  %v3070_v43 = vpop.f32.mrf.mxu2 }
 0x4d0   : > { %v3722_v30 = vpop.f32.mrf.mxu3  ;;  %v3071_v14 = vadd.f32 %v3070_v43, %v7207_v58  ;;  %v3451_v58 = vsel %vm1247_vm1, %v3227_v45, %v3374_v51 }
 0x4d2   : > { %v3609_v0 = vpop.f32.mrf.mxu1  ;;  %v3162_v23 = vadd.f32 %v3130_v19, %v3071_v14  ;;  %v3133_v14 = vld [vmem:[#allocation4 + $0xa8] sm:$0xff] }
 0x4d3   : > { %v3723_v7 = vadd.f32 %v3722_v30, %v3609_v0  ;;  %v3817_v19 = vld [vmem:[#allocation4 + $0x28] sm:$0xff] }
 0x4d4   : > { %3194 = vst.msk [vmem:[#allocation4 + $0x90] sm:$0xff] %vm2476_vm3, %v3162_v23  ;;  %v3295_v23 = vld [vmem:[#allocation3 + $0x1a9] sm:$0xff] }
 0x4d5   : > { %v3846_v6 = vadd.f32 %v3814_v63, %v3723_v7  ;;  %3656 = vmatmul.f32.gmra.mxu1 %v3451_v58  ;;  %5348 = vmatmul.msk.f32.gmra.mxu3 %vm1247_vm1, %v3292_v60  ;;  %v7924_v7 = vld [vmem:[#allocation12_spill] sm:$0xff] }
 0x4d6   : > { %v3908_v13 = vld [vmem:[#allocation4] ss:$2 sm:$0xff]  ;;  %v3924_v27 = vld [vmem:[#allocation4 + $0x1] ss:$2 sm:$0xff]  ;;  %v3454_v45 = vsel %vm1247_vm1, %v7924_v7, %v3380_v1 }
 0x4d7   : > { %3878 = vst.msk [vmem:[#allocation4 + $0x10] sm:$0xff] %vm2476_vm3, %v3846_v6  ;;  %v3073_v53 = vpop.f32.mrf.mxu2  ;;  %v3971_v3 = vmax.f32 %v3908_v13, %v3924_v27  ;;  %v3382_v6 = vpop.permute.xlu1 %3381  ;;  %v3232_v13 = vld [vmem:[#allocation3 + $0x1af] sm:$0xff]  ;;  %v3233_v1 = vld [vmem:[#allocation3 + $0x1c7] sm:$0xff] }
 0x4d8   : > { %v3725_v47 = vpop.f32.mrf.mxu3  ;;  %v3074_v40 = vadd.f32 %v3073_v53, %v7218_v34 }
 0x4da   : > { %v3612_v5 = vpop.f32.mrf.mxu1  ;;  %v3163_v10 = vadd.f32 %v3131_v59, %v3074_v40  ;;  %v3134_v40 = vld [vmem:[#allocation4 + $0xb0] sm:$0xff] }
 0x4db   : > { %v3726_v24 = vadd.f32 %v3725_v47, %v3612_v5 }
 0x4dc   : > { %3195 = vst.msk [vmem:[#allocation4 + $0x98] sm:$0xff] %vm2476_vm3, %v3163_v10  ;;  %v7925_v10 = vld [vmem:[#allocation13_spill] sm:$0xff] }
 0x4dd   : > { %v3847_v37 = vadd.f32 %v3815_v41, %v3726_v24  ;;  %3659 = vmatmul.f32.gmra.mxu1 %v3452_v44  ;;  %5349 = vmatmul.msk.f32.gmra.mxu3 %vm1247_vm1, %v3293_v21  ;;  %v3818_v24 = vld [vmem:[#allocation4 + $0x30] sm:$0xff]  ;;  %v3455_v41 = vsel %vm1247_vm1, %v7925_v10, %v3382_v6  ;;  %v3821_v10 = vld [vmem:[#allocation4 + $0x48] sm:$0xff] }
 0x4de   : > { %v3296_v44 = vld [vmem:[#allocation3 + $0x1b1] sm:$0xff] }
 0x4df   : > { %3879 = vst.msk [vmem:[#allocation4 + $0x18] sm:$0xff] %vm2476_vm3, %v3847_v37  ;;  %v3076_v50 = vpop.f32.mrf.mxu2  ;;  %v5400_v37 = vld [vmem:[%s7907_s5 + $0x118] sm:$0xff] }
 0x4e0   : > { %v3728_v34 = vpop.f32.mrf.mxu3  ;;  %v3077_v52 = vadd.f32 %v3076_v50, %v7227_v12  ;;  %4594 = vmatpush.msrb.mxu3 %v5400_v37 }
 0x4e2   : > { %v3615_v4 = vpop.f32.mrf.mxu1  ;;  %v3164_v38 = vadd.f32 %v3132_v61, %v3077_v52  ;;  %v3384_v52 = vpop.permute.xlu2 %3383 }
 0x4e3   : > { %v3729_v56 = vadd.f32 %v3728_v34, %v3615_v4  ;;  %v3456_v22 = vsel %vm1247_vm1, %v3232_v13, %v3384_v52  ;;  %v3138_v52 = vld [vmem:[#allocation4 + $0xd0] sm:$0xff] }
 0x4e4   : > { %3196 = vst.msk [vmem:[#allocation4 + $0xa0] sm:$0xff] %vm2476_vm3, %v3164_v38  ;;  %v3819_v38 = vld [vmem:[#allocation4 + $0x38] sm:$0xff] }
 0x4e5   : > { %v3848_v12 = vadd.f32 %v3816_v17, %v3729_v56  ;;  %3662 = vmatmul.f32.gmra.mxu1 %v3453_v31  ;;  %5350 = vmatmul.msk.f32.gmra.mxu3 %vm1247_vm1, %v3294_v55  ;;  %v3135_v17 = vld [vmem:[#allocation4 + $0xb8] sm:$0xff]  ;;  %v3297_v31 = vld [vmem:[#allocation3 + $0x1c9] sm:$0xff] }
 0x4e6   : > { %v3940_v54 = vld [vmem:[#allocation4 + $0x10] ss:$2 sm:$0xff]  ;;  %v3956_v11 = vld [vmem:[#allocation4 + $0x11] ss:$2 sm:$0xff] }
 0x4e7   : > { %3880 = vst.msk [vmem:[#allocation4 + $0x20] sm:$0xff] %vm2476_vm3, %v3848_v12  ;;  %v3979_v28 = vmax.f32 %v3940_v54, %v3956_v11  ;;  %v3079_v2 = vpop.f32.mrf.mxu2  ;;  %v3386_v11 = vpop.permute.xlu0 %3385  ;;  %v3300_v13 = vld [vmem:[#allocation3 + $0x1f1] sm:$0xff] }
 0x4e8   : > { %v3731_v46 = vpop.f32.mrf.mxu3  ;;  %v3080_v51 = vadd.f32 %v3079_v2, %v7238_v49  ;;  %v5380_v49 = vld [vmem:[%s7907_s5 + $0xb8] sm:$0xff] }
 0x4e9   : > { %v3987_v30 = vmax.f32 %v3971_v3, %v3979_v28  ;;  %4387 = vmatpush.msrb.mxu1 %v5380_v49  ;;  %v3136_v28 = vld [vmem:[#allocation4 + $0xc0] sm:$0xff]  ;;  %v3298_v2 = vld [vmem:[#allocation3 + $0x1d1] sm:$0xff]  ;;  %v3388_v49 = vpop.permute.xlu1 %3387 }
 0x4ea   : > { %v3618_v43 = vpop.f32.mrf.mxu1  ;;  %v3165_v25 = vadd.f32 %v3133_v14, %v3080_v51  ;;  %v3820_v14 = vld [vmem:[#allocation4 + $0x40] sm:$0xff] }
 0x4eb   : > { %v3732_v0 = vadd.f32 %v3731_v46, %v3618_v43  ;;  %v3999_v48 = vadd.f32 %v7439_v15, %v3987_v30 }
 0x4ec   : > { %3197 = vst.msk [vmem:[#allocation4 + $0xa8] sm:$0xff] %vm2476_vm3, %v3165_v25 }
 0x4ed   : > { %v3849_v63 = vadd.f32 %v3817_v19, %v3732_v0  ;;  %3665 = vmatmul.f32.gmra.mxu1 %v3454_v45  ;;  %5351 = vmatmul.msk.f32.gmra.mxu3 %vm1247_vm1, %v3295_v23  ;;  %v4007_v58 = vmax.f32 %v3999_v48, 0.0  ;;  %v3457_v0 = vsel %vm1247_vm1, %v3233_v1, %v3386_v11  ;;  %v5399_v23 = vld [vmem:[%s7907_s5 + $0x110] sm:$0xff] }
 0x4ee   : > { %4595 = vmatpush.msrb.mxu3 %v5399_v23  ;;  %v3824_v23 = vld [vmem:[#allocation4 + $0x60] sm:$0xff] }
 0x4ef   : > { %3881 = vst.msk [vmem:[#allocation4 + $0x28] sm:$0xff] %vm2476_vm3, %v3849_v63  ;;  %v3082_v47 = vpop.f32.mrf.mxu2  ;;  %v4165_v63 = vld [vmem:[%s7907_s5 + $0x48] sm:$0xff] }
 0x4f0   : > { %v3734_v60 = vpop.f32.mrf.mxu3  ;;  %4044 = vst.msk [vmem:[#allocation5 + $0x20] sm:$0xff] %vm2476_vm3, %v4007_v58  ;;  %v3083_v18 = vadd.f32 %v3082_v47, %v7249_v57  ;;  %4199 = vmatpush.msrb.mxu2 %v4165_v63 }
 0x4f2   : > { %v3621_v53 = vpop.f32.mrf.mxu1  ;;  %v3166_v59 = vadd.f32 %v3134_v40, %v3083_v18 }
 0x4f3   : > { %v3735_v5 = vadd.f32 %v3734_v60, %v3621_v53  ;;  %v3137_v53 = vld [vmem:[#allocation4 + $0xc8] sm:$0xff] }
 0x4f4   : > { %3198 = vst.msk [vmem:[#allocation4 + $0xb0] sm:$0xff] %vm2476_vm3, %v3166_v59 }
 0x4f5   : > { %v3850_v21 = vadd.f32 %v3818_v24, %v3735_v5  ;;  %3668 = vmatmul.f32.gmra.mxu1 %v3455_v41  ;;  %5352 = vmatmul.msk.f32.gmra.mxu3 %vm1247_vm1, %v3296_v44  ;;  %v3234_v5 = vld [vmem:[#allocation3 + $0x1cf] sm:$0xff] }
 0x4f6   : > { %v3910_v30 = vld [vmem:[#allocation4 + $0x20] ss:$2 sm:$0xff]  ;;  %v3926_v51 = vld [vmem:[#allocation4 + $0x21] ss:$2 sm:$0xff]  ;;  %v3458_v41 = vsel %vm1247_vm1, %v3234_v5, %v3388_v49 }
 0x4f7   : > { %3882 = vst.msk [vmem:[#allocation4 + $0x30] sm:$0xff] %vm2476_vm3, %v3850_v21  ;;  %v4250_v57 = vld [vmem:[#allocation5 + $0x20] sm:$0xff]  ;;  %v3085_v4 = vpop.f32.mrf.mxu2  ;;  %v3972_v7 = vmax.f32 %v3910_v30, %v3926_v51  ;;  %v3299_v44 = vld [vmem:[#allocation3 + $0x1e9] sm:$0xff] }
 0x4f8   : > { %v4069_v34 = vld [vmem:[#allocation5 + $0x21] sm:$0xff]  ;;  %4274 = vrot.lane.b32.xlu0 %v4250_v57, %s5710_s29  ;;  %v3737_v50 = vpop.f32.mrf.mxu3  ;;  %4086 = vrot.lane.b32.xlu1 %v4250_v57, %s5710_s29  ;;  %v3086_v61 = vadd.f32 %v3085_v4, %v7260_v9  ;;  %v3390_v57 = vpop.permute.xlu2 %3389 }
 0x4f9   : > { %4118 = vrot.lane.b32.xlu2 %v4069_v34, %s5709_s25 }
 0x4fa   : > { %v3624_v56 = vpop.f32.mrf.mxu1  ;;  %v3167_v27 = vadd.f32 %v3135_v17, %v3086_v61  ;;  %v3235_v61 = vld [vmem:[#allocation3 + $0x1e7] sm:$0xff]  ;;  %v3822_v17 = vld [vmem:[#allocation4 + $0x50] sm:$0xff] }
 0x4fb   : > { %v3738_v55 = vadd.f32 %v3737_v50, %v3624_v56 }
 0x4fc   : > { %3199 = vst.msk [vmem:[#allocation4 + $0xb8] sm:$0xff] %vm2476_vm3, %v3167_v27 }
 0x4fd   : > { %v3851_v12 = vadd.f32 %v3819_v38, %v3738_v55  ;;  %3671 = vmatmul.f32.gmra.mxu1 %v3456_v22  ;;  %5353 = vmatmul.msk.f32.gmra.mxu3 %vm1247_vm1, %v3297_v31  ;;  %v3459_v55 = vsel %vm1247_vm1, %v3235_v61, %v3390_v57  ;;  %v3825_v57 = vld [vmem:[#allocation4 + $0x68] sm:$0xff] }
 0x4ff   : > { %3883 = vst.msk [vmem:[#allocation4 + $0x38] sm:$0xff] %vm2476_vm3, %v3851_v12  ;;  %v3088_v9 = vpop.f32.mrf.mxu2  ;;  %v5398_v12 = vld [vmem:[%s7907_s5 + $0x108] sm:$0xff] }
 0x500   : > { %v3740_v54 = vpop.f32.mrf.mxu3  ;;  %4306 = vrot.lane.b32.xlu1 %v4069_v34, %s5709_s25  ;;  %v3089_v35 = vadd.f32 %v3088_v9, %v7271_v8  ;;  %v5379_v8 = vld [vmem:[%s7907_s5 + $0xb0] sm:$0xff]  ;;  %4596 = vmatpush.msrb.mxu3 %v5398_v12 }
 0x501   : > { %4388 = vmatpush.msrb.mxu1 %v5379_v8  ;;  %v3237_v8 = vld [vmem:[#allocation3 + $0x207] sm:$0xff]  ;;  %v3240_v12 = vld [vmem:[#allocation3 + $0x22f] sm:$0xff] }
 0x502   : > { %v3627_v3 = vpop.f32.mrf.mxu1  ;;  %v3168_v43 = vadd.f32 %v3136_v28, %v3089_v35 }
 0x503   : > { %v3741_v46 = vadd.f32 %v3740_v54, %v3627_v3  ;;  %v3392_v54 = vpop.permute.xlu0 %3391  ;;  %v3139_v3 = vld [vmem:[#allocation4 + $0xd8] sm:$0xff] }
 0x504   : > { %3200 = vst.msk [vmem:[#allocation4 + $0xc0] sm:$0xff] %vm2476_vm3, %v3168_v43  ;;  %v3394_v43 = vpop.permute.xlu1 %3393 }
 0x505   : > { %v3852_v48 = vadd.f32 %v3820_v14, %v3741_v46  ;;  %3674 = vmatmul.f32.gmra.mxu1 %v3457_v0  ;;  %5354 = vmatmul.msk.f32.gmra.mxu3 %vm1247_vm1, %v3298_v2  ;;  %v3236_v46 = vld [vmem:[#allocation3 + $0x1ef] sm:$0xff]  ;;  %v3823_v2 = vld [vmem:[#allocation4 + $0x58] sm:$0xff]  ;;  %v3461_v63 = vsel %vm1247_vm1, %v3237_v8, %v3394_v43 }
 0x506   : > { %v3942_v25 = vld [vmem:[#allocation4 + $0x30] ss:$2 sm:$0xff]  ;;  %v3958_v19 = vld [vmem:[#allocation4 + $0x31] ss:$2 sm:$0xff]  ;;  %v3460_v30 = vsel %vm1247_vm1, %v3236_v46, %v3392_v54 }
 0x507   : > { %3884 = vst.msk [vmem:[#allocation4 + $0x40] sm:$0xff] %vm2476_vm3, %v3852_v48  ;;  %v3980_v45 = vmax.f32 %v3942_v25, %v3958_v19  ;;  %v3091_v60 = vpop.f32.mrf.mxu2  ;;  %v3140_v25 = vld [vmem:[#allocation4 + $0xe0] sm:$0xff]  ;;  %v5397_v54 = vld [vmem:[%s7907_s5 + $0x100] sm:$0xff]  ;;  %v4159_v8 = vld [vmem:[%s7907_s5 + $0x18] sm:$0xff] }
 0x508   : > { %v3743_v58 = vpop.f32.mrf.mxu3  ;;  %v3092_v47 = vadd.f32 %v3091_v60, %v7282_v62  ;;  %4597 = vmatpush.msrb.mxu3 %v5397_v54 }
 0x509   : > { %v3988_v6 = vmax.f32 %v3972_v7, %v3980_v45 }
 0x50a   : > { %v3630_v18 = vpop.f32.mrf.mxu1  ;;  %v3169_v24 = vadd.f32 %v3137_v53, %v3092_v47  ;;  %v5377_v53 = vld [vmem:[%s7907_s5 + $0xa0] sm:$0xff] }
 0x50b   : > { %v3744_v40 = vadd.f32 %v3743_v58, %v3630_v18  ;;  %v4000_v59 = vadd.f32 %v7439_v15, %v3988_v6 }
 0x50c   : > { %3201 = vst.msk [vmem:[#allocation4 + $0xc8] sm:$0xff] %vm2476_vm3, %v3169_v24 }
 0x50d   : > { %v3853_v21 = vadd.f32 %v3821_v10, %v3744_v40  ;;  %3677 = vmatmul.f32.gmra.mxu1 %v3458_v41  ;;  %5355 = vmatmul.msk.f32.gmra.mxu3 %vm1247_vm1, %v3299_v44  ;;  %v4008_v37 = vmax.f32 %v4000_v59, 0.0  ;;  %v3396_v40 = vpop.permute.xlu2 %3395  ;;  %v3303_v10 = vld [vmem:[#allocation3 + $0x229] sm:$0xff] }
 0x50e   : > { %v3141_v41 = vld [vmem:[#allocation4 + $0xe8] sm:$0xff] }
 0x50f   : > { %3885 = vst.msk [vmem:[#allocation4 + $0x48] sm:$0xff] %vm2476_vm3, %v3853_v21  ;;  %v3094_v34 = vpop.f32.mrf.mxu2  ;;  %v3238_v21 = vld [vmem:[#allocation3 + $0x20f] sm:$0xff] }
 0x510   : > { %v3746_v62 = vpop.f32.mrf.mxu3  ;;  %4045 = vst.msk [vmem:[#allocation5 + $0x38] sm:$0xff] %vm2476_vm3, %v4008_v37  ;;  %v3095_v42 = vadd.f32 %v3094_v34, %v7293_v29  ;;  %v5378_v29 = vld [vmem:[%s7907_s5 + $0xa8] sm:$0xff]  ;;  %v3462_v34 = vsel %vm1247_vm1, %v3238_v21, %v3396_v40  ;;  %v5376_v40 = vld [vmem:[%s7907_s5 + $0x98] sm:$0xff] }
 0x511   : > { %4389 = vmatpush.msrb.mxu1 %v5378_v29  ;;  %v3826_v29 = vld [vmem:[#allocation4 + $0x70] sm:$0xff]  ;;  %v5374_v21 = vld [vmem:[%s7907_s5 + $0x88] sm:$0xff] }
 0x512   : > { %v3633_v50 = vpop.f32.mrf.mxu1  ;;  %v3170_v56 = vadd.f32 %v3138_v52, %v3095_v42  ;;  %v3239_v52 = vld [vmem:[#allocation3 + $0x227] sm:$0xff] }
 0x513   : > { %v3747_v4 = vadd.f32 %v3746_v62, %v3633_v50  ;;  %4390 = vmatpush.msrb.mxu1 %v5377_v53 }
 0x514   : > { %3202 = vst.msk [vmem:[#allocation4 + $0xd0] sm:$0xff] %vm2476_vm3, %v3170_v56 }
 0x515   : > { %v3854_v27 = vadd.f32 %v3822_v17, %v3747_v4  ;;  %3680 = vmatmul.f32.gmra.mxu1 %v3459_v55  ;;  %5356 = vmatmul.msk.f32.gmra.mxu3 %vm1247_vm1, %v3300_v13  ;;  %v3304_v13 = vld [vmem:[#allocation3 + $0x231] sm:$0xff] }
 0x516   : > { %v3928_v7 = vld [vmem:[#allocation4 + $0x41] ss:$2 sm:$0xff]  ;;  %4391 = vmatpush.msrb.mxu1 %v5376_v40  ;;  %v5389_v40 = vld [vmem:[%s7907_s5 + $0xc0] sm:$0xff] }
 0x517   : > { %3886 = vst.msk [vmem:[#allocation4 + $0x50] sm:$0xff] %vm2476_vm3, %v3854_v27  ;;  %v4457_v38 = vld [vmem:[#allocation5 + $0x38] sm:$0xff]  ;;  %v3097_v11 = vpop.f32.mrf.mxu2  ;;  %v3142_v27 = vld [vmem:[#allocation4 + $0xf0] sm:$0xff] }
 0x518   : > { %v4070_v22 = vld [vmem:[#allocation5 + $0x39] sm:$0xff]  ;;  %4481 = vrot.lane.b32.xlu1 %v4457_v38, %s5710_s29  ;;  %v3749_v31 = vpop.f32.mrf.mxu3  ;;  %4088 = vrot.lane.b32.xlu2 %v4457_v38, %s5710_s29  ;;  %v3098_v9 = vadd.f32 %v3097_v11, %v7304_v39 }
 0x519   : > { %4120 = vrot.lane.b32.xlu0 %v4070_v22, %s5709_s25 }
 0x51a   : > { %v3636_v35 = vpop.f32.mrf.mxu1  ;;  %v3171_v1 = vadd.f32 %v3139_v3, %v3098_v9  ;;  %v3400_v9 = vpop.permute.xlu1 %3399 }
 0x51b   : > { %v3750_v28 = vadd.f32 %v3749_v31, %v3636_v35  ;;  %v4163_v35 = vld [vmem:[%s7907_s5 + $0x38] sm:$0xff] }
 0x51c   : > { %3203 = vst.msk [vmem:[#allocation4 + $0xd8] sm:$0xff] %vm2476_vm3, %v3171_v1 }
 0x51d   : > { %v3855_v51 = vadd.f32 %v3823_v2, %v3750_v28  ;;  %3683 = vmatmul.f32.gmra.mxu1 %v3460_v30  ;;  %5357 = vmatmul.msk.f32.gmra.mxu3 %vm1247_vm1, %v7333_v20  ;;  %v3912_v20 = vld [vmem:[#allocation4 + $0x40] ss:$2 sm:$0xff]  ;;  %v3464_v30 = vsel %vm1247_vm1, %v3240_v12, %v3400_v9  ;;  %v3831_v9 = vld [vmem:[#allocation4 + $0x98] sm:$0xff] }
 0x51e   : > { %v3973_v6 = vmax.f32 %v3912_v20, %v3928_v7  ;;  %v4162_v28 = vld [vmem:[%s7907_s5 + $0x30] sm:$0xff]  ;;  %v4085_v7 = vpop.permute.xlu2 %4084 }
 0x51f   : > { %3887 = vst.msk [vmem:[#allocation4 + $0x58] sm:$0xff] %vm2476_vm3, %v3855_v51  ;;  %v3100_v14 = vpop.f32.mrf.mxu2  ;;  %v4161_v51 = vld [vmem:[%s7907_s5 + $0x28] sm:$0xff]  ;;  %v5395_v12 = vld [vmem:[%s7907_s5 + $0xf0] sm:$0xff] }
 0x520   : > { %4308 = vrot.lane.b32.xlu1 %v4070_v22, %s5709_s25  ;;  %v3752_v39 = vpop.f32.mrf.mxu3  ;;  %4513 = vrot.lane.b32.xlu2 %v4070_v22, %s5709_s25  ;;  %v3101_v0 = vadd.f32 %v3100_v14, %v7315_v36  ;;  %v4164_v36 = vld [vmem:[%s7907_s5 + $0x40] sm:$0xff] }
 0x521   : > { %4276 = vrot.lane.b32.xlu0 %v4457_v38, %s5710_s29  ;;  %4200 = vmatpush.msrb.mxu2 %v4164_v36  ;;  %v4157_v36 = vld [vmem:[%s7907_s5 + $0x8] sm:$0xff] }
 0x522   : > { %v3639_v48 = vpop.f32.mrf.mxu1  ;;  %v3172_v45 = vadd.f32 %v3140_v25, %v3101_v0  ;;  %v3827_v0 = vld [vmem:[#allocation4 + $0x78] sm:$0xff] }
 0x523   : > { %v3753_v19 = vadd.f32 %v3752_v39, %v3639_v48  ;;  %4201 = vmatpush.msrb.mxu2 %v4163_v35  ;;  %v3143_v39 = vld [vmem:[#allocation4 + $0xf8] sm:$0xff] }
 0x524   : > { %3204 = vst.msk [vmem:[#allocation4 + $0xe0] sm:$0xff] %vm2476_vm3, %v3172_v45  ;;  %v4158_v45 = vld [vmem:[%s7907_s5 + $0x10] sm:$0xff] }
 0x525   : > { %v3856_v58 = vadd.f32 %v3824_v23, %v3753_v19  ;;  %3686 = vmatmul.f32.gmra.mxu1 %v3461_v63  ;;  %5358 = vmatmul.msk.f32.gmra.mxu3 %vm1247_vm1, %v7347_v32  ;;  %v4052_v19 = vld [vmem:[#allocation5 + $0x7] sm:$0xff] }
 0x526   : > { %v3944_v49 = vld [vmem:[#allocation4 + $0x50] ss:$2 sm:$0xff]  ;;  %v3960_v60 = vld [vmem:[#allocation4 + $0x51] ss:$2 sm:$0xff]  ;;  %4202 = vmatpush.msrb.mxu2 %v4162_v28  ;;  %v3828_v63 = vld [vmem:[#allocation4 + $0x80] sm:$0xff] }
 0x527   : > { %3888 = vst.msk [vmem:[#allocation4 + $0x60] sm:$0xff] %vm2476_vm3, %v3856_v58  ;;  %v3981_v47 = vmax.f32 %v3944_v49, %v3960_v60  ;;  %v3103_v32 = vpop.f32.mrf.mxu2  ;;  %v4140_v58 = vsel %vm2476_vm3, %v4052_v19, %v4085_v7 }
 0x528   : > { %v3755_v18 = vpop.f32.mrf.mxu3  ;;  %v3104_v59 = vadd.f32 %v3103_v32, %v7327_v16  ;;  %v3398_v16 = vpop.permute.xlu0 %3397  ;;  %4203 = vmatpush.msrb.mxu2 %v4161_v51  ;;  %v5394_v51 = vld [vmem:[%s7907_s5 + $0xe8] sm:$0xff] }
 0x529   : > { %v3989_v5 = vmax.f32 %v3973_v6, %v3981_v47  ;;  %v3463_v55 = vsel %vm1247_vm1, %v3239_v52, %v3398_v16  ;;  %v5373_v52 = vld [vmem:[%s7907_s5 + $0x80] sm:$0xff] }
 0x52a   : > { %v3642_v24 = vpop.f32.mrf.mxu1  ;;  %v3173_v62 = vadd.f32 %v3141_v41, %v3104_v59  ;;  %v5375_v41 = vld [vmem:[%s7907_s5 + $0x90] sm:$0xff] }
 0x52b   : > { %v3756_v44 = vadd.f32 %v3755_v18, %v3642_v24  ;;  %v4001_v37 = vadd.f32 %v7439_v15, %v3989_v5  ;;  %v5396_v24 = vld [vmem:[%s7907_s5 + $0xf8] sm:$0xff]  ;;  %4392 = vmatpush.msrb.mxu1 %v5375_v41 }
 0x52c   : > { %3205 = vst.msk [vmem:[#allocation4 + $0xe8] sm:$0xff] %vm2476_vm3, %v3173_v62  ;;  %4598 = vmatpush.msrb.mxu3 %v5396_v24 }
 0x52d   : > { %v3857_v42 = vadd.f32 %v3825_v57, %v3756_v44  ;;  %3689 = vmatmul.f32.gmra.mxu1 %v3462_v34  ;;  %5359 = vmatmul.msk.f32.gmra.mxu3 %vm1247_vm1, %v3303_v10  ;;  %v4009_v50 = vmax.f32 %v4001_v37, 0.0  ;;  %v4156_v10 = vld [vmem:[%s7907_s5] sm:$0xff] }
 0x52e   : > { %4393 = vmatpush.msrb.mxu1 %v5374_v21  ;;  %4599 = vmatpush.msrb.mxu3 %v5395_v12  ;;  %v3834_v21 = vld [vmem:[#allocation4 + $0xb0] sm:$0xff] }
 0x52f   : > { %3889 = vst.msk [vmem:[#allocation4 + $0x68] sm:$0xff] %vm2476_vm3, %v3857_v42  ;;  %v3106_v61 = vpop.f32.mrf.mxu2  ;;  %v3829_v42 = vld [vmem:[#allocation4 + $0x88] sm:$0xff] }
 0x530   : > { %v3758_v4 = vpop.f32.mrf.mxu3  ;;  %4046 = vst.msk [vmem:[#allocation5 + $0x50] sm:$0xff] %vm2476_vm3, %v4009_v50  ;;  %v3107_v56 = vadd.f32 %v3106_v61, %v7341_v33  ;;  %v4117_v47 = vpop.permute.xlu0 %4116  ;;  %4394 = vmatpush.msrb.mxu1 %v5373_v52  ;;  %4600 = vmatpush.msrb.mxu3 %v5394_v51 }
 0x531   : > { %v4148_v32 = vsel %vm1247_vm1, %v4140_v58, %v4117_v47 }
 0x532   : > { %v3645_v17 = vpop.f32.mrf.mxu1  ;;  %v3174_v22 = vadd.f32 %v3142_v27, %v3107_v56  ;;  %v5371_v56 = vld [vmem:[%s7907_s5 + $0x70] sm:$0xff]  ;;  %v3830_v27 = vld [vmem:[#allocation4 + $0x90] sm:$0xff] }
 0x533   : > { %v3759_v38 = vadd.f32 %v3758_v4, %v3645_v17  ;;  %v5372_v4 = vld [vmem:[%s7907_s5 + $0x78] sm:$0xff] }
 0x534   : > { %3206 = vst.msk [vmem:[#allocation4 + $0xf0] sm:$0xff] %vm2476_vm3, %v3174_v22  ;;  %4395 = vmatpush.msrb.mxu1 %v5372_v4  ;;  %v5369_v22 = vld [vmem:[%s7907_s5 + $0x60] sm:$0xff] }
 0x535   : > { %v3858_v31 = vadd.f32 %v3826_v29, %v3759_v38  ;;  %3692 = vmatmul.f32.gmra.mxu1 %v3463_v55  ;;  %5360 = vmatmul.msk.f32.gmra.mxu3 %vm1247_vm1, %v3304_v13  ;;  %v5370_v13 = vld [vmem:[%s7907_s5 + $0x68] sm:$0xff] }
 0x536   : > { %v3914_v49 = vld [vmem:[#allocation4 + $0x60] ss:$2 sm:$0xff]  ;;  %v3930_v60 = vld [vmem:[#allocation4 + $0x61] ss:$2 sm:$0xff]  ;;  %4396 = vmatpush.msrb.mxu1 %v5371_v56 }
 0x537   : > { %3890 = vst.msk [vmem:[#allocation4 + $0x70] sm:$0xff] %vm2476_vm3, %v3858_v31  ;;  %v4458_v33 = vld [vmem:[#allocation5 + $0x50] sm:$0xff]  ;;  %v3109_v46 = vpop.f32.mrf.mxu2  ;;  %v3974_v5 = vmax.f32 %v3914_v49, %v3930_v60 }
 0x538   : > { %v4071_v11 = vld [vmem:[#allocation5 + $0x51] sm:$0xff]  ;;  %4483 = vrot.lane.b32.xlu1 %v4458_v33, %s5710_s29  ;;  %v3761_v3 = vpop.f32.mrf.mxu3  ;;  %4090 = vrot.lane.b32.xlu2 %v4458_v33, %s5710_s29  ;;  %v3110_v1 = vadd.f32 %v3109_v46, %v7354_v26 }
 0x539   : > { %4122 = vrot.lane.b32.xlu0 %v4071_v11, %s5709_s25  ;;  %v4160_v26 = vld [vmem:[%s7907_s5 + $0x20] sm:$0xff]  ;;  %4397 = vmatpush.msrb.mxu1 %v5370_v13 }
 0x53a   : > { %v3648_v2 = vpop.f32.mrf.mxu1  ;;  %v3175_v14 = vadd.f32 %v3143_v39, %v3110_v1  ;;  %4204 = vmatpush.msrb.mxu2 %v4160_v26  ;;  %v3832_v1 = vld [vmem:[#allocation4 + $0xa0] sm:$0xff] }
 0x53b   : > { %v3762_v43 = vadd.f32 %v3761_v3, %v3648_v2  ;;  %4398 = vmatpush.msrb.mxu1 %v5369_v22 }
 0x53c   : > { %3207 = vst.msk [vmem:[#allocation4 + $0xf8] sm:$0xff] %vm2476_vm3, %v3175_v14  ;;  %4205 = vmatpush.msrb.mxu2 %v4159_v8  ;;  %v5391_v8 = vld [vmem:[%s7907_s5 + $0xd0] sm:$0xff] }
 0x53d   : > { %v3859_v48 = vadd.f32 %v3827_v0, %v3762_v43  ;;  %3695 = vmatmul.f32.gmra.mxu1 %v3464_v30  ;;  %v5393_v0 = vld [vmem:[%s7907_s5 + $0xe0] sm:$0xff] }
 0x53e   : > { %4206 = vmatpush.msrb.mxu2 %v4158_v45  ;;  %4601 = vmatpush.msrb.mxu3 %v5393_v0  ;;  %v5390_v45 = vld [vmem:[%s7907_s5 + $0xc8] sm:$0xff] }
 0x53f   : > { %3891 = vst.msk [vmem:[#allocation4 + $0x78] sm:$0xff] %vm2476_vm3, %v3859_v48 }
 0x540   : > { %4310 = vrot.lane.b32.xlu1 %v4071_v11, %s5709_s25  ;;  %v3764_v25 = vpop.f32.mrf.mxu3  ;;  %4515 = vrot.lane.b32.xlu2 %v4071_v11, %s5709_s25 }
 0x541   : > { %4278 = vrot.lane.b32.xlu0 %v4458_v33, %s5710_s29  ;;  %4207 = vmatpush.msrb.mxu2 %v4157_v36 }
 0x542   : > { %v3651_v20 = vpop.f32.mrf.mxu1 }
 0x543   : > { %v3765_v23 = vadd.f32 %v3764_v25, %v3651_v20  ;;  %4208 = vmatpush.msrb.mxu2 %v4156_v10  ;;  %v5392_v25 = vld [vmem:[%s7907_s5 + $0xd8] sm:$0xff] }
 0x544   : > { %5361 = vmatmul.msk.f32.vlgmr.msrb.gmra.mxu2 %vm4168_vm5, %v4148_v32  ;;  %4602 = vmatpush.msrb.mxu3 %v5392_v25 }
 0x545   : > { %v3860_v6 = vadd.f32 %v3828_v63, %v3765_v23  ;;  %v4242_v23 = vld [vmem:[#allocation5 + $0x1f] sm:$0xff] }
 0x546   : > { %v3946_v18 = vld [vmem:[#allocation4 + $0x70] ss:$2 sm:$0xff]  ;;  %v3962_v53 = vld [vmem:[#allocation4 + $0x71] ss:$2 sm:$0xff]  ;;  %4603 = vmatpush.msrb.mxu3 %v5391_v8 }
 0x547   : > { %3892 = vst.msk [vmem:[#allocation4 + $0x80] sm:$0xff] %vm2476_vm3, %v3860_v6  ;;  %v3982_v59 = vmax.f32 %v3946_v18, %v3962_v53  ;;  %v3833_v6 = vld [vmem:[#allocation4 + $0xa8] sm:$0xff] }
 0x548   : > { %v3767_v44 = vpop.f32.mrf.mxu3  ;;  %4604 = vmatpush.msrb.mxu3 %v5390_v45  ;;  %v3838_v45 = vld [vmem:[#allocation4 + $0xd0] sm:$0xff] }
 0x549   : > { %v3990_v37 = vmax.f32 %v3974_v5, %v3982_v59 }
 0x54a   : > { %v3654_v62 = vpop.f32.mrf.mxu1  ;;  %4605 = vmatpush.msrb.mxu3 %v5389_v40 }
 0x54b   : > { %v3768_v57 = vadd.f32 %v3767_v44, %v3654_v62  ;;  %v4002_v34 = vadd.f32 %v7439_v15, %v3990_v37 }
 0x54d   : > { %v3861_v50 = vadd.f32 %v3829_v42, %v3768_v57  ;;  %v4010_v16 = vmax.f32 %v4002_v34, 0.0 }
 0x54f   : > { %3893 = vst.msk [vmem:[#allocation4 + $0x88] sm:$0xff] %vm2476_vm3, %v3861_v50 }
 0x550   : > { %v3770_v61 = vpop.f32.mrf.mxu3  ;;  %4047 = vst.msk [vmem:[#allocation5 + $0x68] sm:$0xff] %vm2476_vm3, %v4010_v16  ;;  %v3835_v16 = vld [vmem:[#allocation4 + $0xb8] sm:$0xff] }
 0x552   : > { %v3657_v17 = vpop.f32.mrf.mxu1 }
 0x553   : > { %v3771_v55 = vadd.f32 %v3770_v61, %v3657_v17  ;;  %v4119_v60 = vpop.permute.xlu2 %4118 }
 0x555   : > { %v3862_v38 = vadd.f32 %v3830_v27, %v3771_v55  ;;  %v3836_v27 = vld [vmem:[#allocation4 + $0xc0] sm:$0xff] }
 0x556   : > { %v3916_v2 = vld [vmem:[#allocation4 + $0x80] ss:$2 sm:$0xff]  ;;  %v3932_v30 = vld [vmem:[#allocation4 + $0x81] ss:$2 sm:$0xff] }
 0x557   : > { %3894 = vst.msk [vmem:[#allocation4 + $0x90] sm:$0xff] %vm2476_vm3, %v3862_v38  ;;  %v4467_v29 = vld [vmem:[#allocation5 + $0x69] sm:$0xff]  ;;  %v3975_v48 = vmax.f32 %v3916_v2, %v3932_v30 }
 0x558   : > { %v4459_v31 = vld [vmem:[#allocation5 + $0x68] sm:$0xff]  ;;  %4517 = vrot.lane.b32.xlu0 %v4467_v29, %s5709_s25  ;;  %v3773_v54 = vpop.f32.mrf.mxu3 }
 0x559   : > { %4485 = vrot.lane.b32.xlu2 %v4459_v31, %s5710_s29  ;;  %4280 = vrot.lane.b32.xlu1 %v4459_v31, %s5710_s29 }
 0x55a   : > { %v3660_v33 = vpop.f32.mrf.mxu1 }
 0x55b   : > { %v3774_v11 = vadd.f32 %v3773_v54, %v3660_v33  ;;  %v4054_v33 = vld [vmem:[#allocation5 + $0x37] sm:$0xff] }
 0x55d   : > { %v3863_v35 = vadd.f32 %v3831_v9, %v3774_v11 }
 0x55f   : > { %3895 = vst.msk [vmem:[#allocation4 + $0x98] sm:$0xff] %vm2476_vm3, %v3863_v35 }
 0x560   : > { %4092 = vrot.lane.b32.xlu0 %v4459_v31, %s5710_s29  ;;  %v3776_v3 = vpop.f32.mrf.mxu3 }
 0x561   : > { %4312 = vrot.lane.b32.xlu2 %v4467_v29, %s5709_s25  ;;  %4124 = vrot.lane.b32.xlu1 %v4467_v29, %s5709_s25 }
 0x562   : > { %v3663_v28 = vpop.f32.mrf.mxu1 }
 0x563   : > { %v3777_v46 = vadd.f32 %v3776_v3, %v3663_v28 }
 0x565   : > { %v3864_v39 = vadd.f32 %v3832_v1, %v3777_v46 }
 0x566   : > { %v3948_v43 = vld [vmem:[#allocation4 + $0x90] ss:$2 sm:$0xff]  ;;  %v3964_v14 = vld [vmem:[#allocation4 + $0x91] ss:$2 sm:$0xff] }
 0x567   : > { %3896 = vst.msk [vmem:[#allocation4 + $0xa0] sm:$0xff] %vm2476_vm3, %v3864_v39  ;;  %v3983_v26 = vmax.f32 %v3948_v43, %v3964_v14  ;;  %v3837_v43 = vld [vmem:[#allocation4 + $0xc8] sm:$0xff] }
 0x568   : > { %v3779_v19 = vpop.f32.mrf.mxu3 }
 0x569   : > { %v3991_v20 = vmax.f32 %v3975_v48, %v3983_v26 }
 0x56a   : > { %v3666_v7 = vpop.f32.mrf.mxu1  ;;  %v4087_v63 = vpop.permute.xlu1 %4086 }
 0x56b   : > { %v3780_v58 = vadd.f32 %v3779_v19, %v3666_v7  ;;  %v4003_v49 = vadd.f32 %v7439_v15, %v3991_v20  ;;  %v4141_v36 = vsel %vm2476_vm3, %v4242_v23, %v4087_v63  ;;  %v4275_v32 = vpop.permute.xlu0 %4274 }
 0x56c   : > { %v4149_v18 = vsel %vm1247_vm1, %v4141_v36, %v4119_v60  ;;  %v4330_v24 = vsel %vm2476_vm3, %v4242_v23, %v4275_v32 }
 0x56d   : > { %v3865_v47 = vadd.f32 %v3833_v6, %v3780_v58  ;;  %v4011_v53 = vmax.f32 %v4003_v49, 0.0  ;;  %5362 = vmatmul.msk.f32.gmra.mxu2 %vm4168_vm5, %v4149_v18  ;;  %v3839_v6 = vld [vmem:[#allocation4 + $0xd8] sm:$0xff] }
 0x56f   : > { %3897 = vst.msk [vmem:[#allocation4 + $0xa8] sm:$0xff] %vm2476_vm3, %v3865_v47 }
 0x570   : > { %v3782_v5 = vpop.f32.mrf.mxu3  ;;  %4048 = vst.msk [vmem:[#allocation5 + $0x80] sm:$0xff] %vm2476_vm3, %v4011_v53 }
 0x572   : > { %v3669_v59 = vpop.f32.mrf.mxu1  ;;  %v4307_v10 = vpop.permute.xlu1 %4306 }
 0x573   : > { %v3783_v41 = vadd.f32 %v3782_v5, %v3669_v59  ;;  %v4338_v44 = vsel %vm1247_vm1, %v4330_v24, %v4307_v10  ;;  %v4089_v61 = vpop.permute.xlu2 %4088  ;;  %v3840_v24 = vld [vmem:[#allocation4 + $0xe0] sm:$0xff] }
 0x574   : > { %5381 = vmatmul.msk.f32.vlgmr.msrb.gmra.mxu1 %vm4168_vm5, %v4338_v44  ;;  %v4142_v9 = vsel %vm2476_vm3, %v4054_v33, %v4089_v61 }
 0x575   : > { %v3866_v37 = vadd.f32 %v3834_v21, %v3783_v41 }
 0x576   : > { %v3918_v55 = vld [vmem:[#allocation4 + $0xa0] ss:$2 sm:$0xff]  ;;  %v3934_v13 = vld [vmem:[#allocation4 + $0xa1] ss:$2 sm:$0xff] }
 0x577   : > { %3898 = vst.msk [vmem:[#allocation4 + $0xb0] sm:$0xff] %vm2476_vm3, %v3866_v37  ;;  %v4468_v62 = vld [vmem:[#allocation5 + $0x81] sm:$0xff]  ;;  %v3976_v31 = vmax.f32 %v3918_v55, %v3934_v13 }
 0x578   : > { %v4460_v57 = vld [vmem:[#allocation5 + $0x80] sm:$0xff]  ;;  %4519 = vrot.lane.b32.xlu0 %v4468_v62, %s5709_s25  ;;  %v3785_v34 = vpop.f32.mrf.mxu3 }
 0x579   : > { %4487 = vrot.lane.b32.xlu2 %v4460_v57, %s5710_s29  ;;  %4094 = vrot.lane.b32.xlu1 %v4460_v57, %s5710_s29 }
 0x57a   : > { %v3672_v42 = vpop.f32.mrf.mxu1 }
 0x57b   : > { %v3786_v50 = vadd.f32 %v3785_v34, %v3672_v42  ;;  %v4514_v28 = vpop.permute.xlu2 %4513 }
 0x57d   : > { %v3867_v52 = vadd.f32 %v3835_v16, %v3786_v50 }
 0x57f   : > { %3899 = vst.msk [vmem:[#allocation4 + $0xb8] sm:$0xff] %vm2476_vm3, %v3867_v52 }
 0x580   : > { %4282 = vrot.lane.b32.xlu0 %v4460_v57, %s5710_s29  ;;  %v3788_v4 = vpop.f32.mrf.mxu3  ;;  %v4055_v57 = vld [vmem:[#allocation5 + $0x4f] sm:$0xff] }
 0x581   : > { %4126 = vrot.lane.b32.xlu2 %v4468_v62, %s5709_s25  ;;  %4314 = vrot.lane.b32.xlu1 %v4468_v62, %s5709_s25 }
 0x582   : > { %v3675_v56 = vpop.f32.mrf.mxu1 }
 0x583   : > { %v3789_v17 = vadd.f32 %v3788_v4, %v3675_v56 }
 0x585   : > { %v3868_v38 = vadd.f32 %v3836_v27, %v3789_v17  ;;  %v3841_v27 = vld [vmem:[#allocation4 + $0xe8] sm:$0xff] }
 0x586   : > { %v3950_v22 = vld [vmem:[#allocation4 + $0xb0] ss:$2 sm:$0xff]  ;;  %v3966_v29 = vld [vmem:[#allocation4 + $0xb1] ss:$2 sm:$0xff] }
 0x587   : > { %3900 = vst.msk [vmem:[#allocation4 + $0xc0] sm:$0xff] %vm2476_vm3, %v3868_v38  ;;  %v3984_v12 = vmax.f32 %v3950_v22, %v3966_v29 }
 0x588   : > { %v3791_v54 = vpop.f32.mrf.mxu3 }
 0x589   : > { %v3992_v11 = vmax.f32 %v3976_v31, %v3984_v12 }
 0x58a   : > { %v4482_v35 = vpop.permute.xlu1 %4481  ;;  %v3678_v2 = vpop.f32.mrf.mxu1 }
 0x58b   : > { %v4121_v3 = vpop.permute.xlu0 %4120  ;;  %v4537_v46 = vsel %vm2476_vm3, %v4054_v33, %v4482_v35  ;;  %v4004_v30 = vadd.f32 %v7439_v15, %v3992_v11  ;;  %v3792_v39 = vadd.f32 %v3791_v54, %v3678_v2  ;;  %v3842_v35 = vld [vmem:[#allocation4 + $0xf0] sm:$0xff] }
 0x58c   : > { %v4150_v1 = vsel %vm1247_vm1, %v4142_v9, %v4121_v3  ;;  %v4545_v51 = vsel %vm1247_vm1, %v4537_v46, %v4514_v28 }
 0x58d   : > { %5363 = vmatmul.msk.f32.gmra.mxu2 %vm4168_vm5, %v4150_v1  ;;  %5401 = vmatmul.msk.f32.vlgmr.msrb.gmra.mxu3 %vm4168_vm5, %v4545_v51  ;;  %v4012_v14 = vmax.f32 %v4004_v30, 0.0  ;;  %v3869_v0 = vadd.f32 %v3837_v43, %v3792_v39  ;;  %v3843_v30 = vld [vmem:[#allocation4 + $0xf8] sm:$0xff] }
 0x58f   : > { %4049 = vst.msk [vmem:[#allocation5 + $0x98] sm:$0xff] %vm2476_vm3, %v4012_v14 }
 0x590   : > { %3901 = vst.msk [vmem:[#allocation4 + $0xc8] sm:$0xff] %vm2476_vm3, %v3869_v0  ;;  %v3794_v48 = vpop.f32.mrf.mxu3 }
 0x592   : > { %v4309_v26 = vpop.permute.xlu1 %4308  ;;  %v3681_v8 = vpop.f32.mrf.mxu1 }
 0x593   : > { %v4277_v25 = vpop.permute.xlu0 %4276  ;;  %v3795_v20 = vadd.f32 %v3794_v48, %v3681_v8  ;;  %v4091_v53 = vpop.permute.xlu2 %4090 }
 0x594   : > { %v4331_v19 = vsel %vm2476_vm3, %v4054_v33, %v4277_v25  ;;  %v4143_v34 = vsel %vm2476_vm3, %v4055_v57, %v4091_v53 }
 0x595   : > { %v4339_v7 = vsel %vm1247_vm1, %v4331_v19, %v4309_v26  ;;  %v3870_v23 = vadd.f32 %v3838_v45, %v3795_v20  ;;  %v4451_v19 = vld [vmem:[#allocation5 + $0x67] sm:$0xff] }
 0x596   : > { %5382 = vmatmul.msk.f32.gmra.mxu1 %vm4168_vm5, %v4339_v7  ;;  %v4469_v63 = vld [vmem:[#allocation5 + $0x99] sm:$0xff] }
 0x597   : > { %v4461_v58 = vld [vmem:[#allocation5 + $0x98] sm:$0xff]  ;;  %4521 = vrot.lane.b32.xlu0 %v4469_v63, %s5709_s25  ;;  %3902 = vst.msk [vmem:[#allocation4 + $0xd0] sm:$0xff] %vm2476_vm3, %v3870_v23  ;;  %v3920_v5 = vld [vmem:[#allocation4 + $0xc0] ss:$2 sm:$0xff]  ;;  %v3936_v59 = vld [vmem:[#allocation4 + $0xc1] ss:$2 sm:$0xff] }
 0x598   : > { %4489 = vrot.lane.b32.xlu2 %v4461_v58, %s5710_s29  ;;  %4284 = vrot.lane.b32.xlu1 %v4461_v58, %s5710_s29  ;;  %v3797_v49 = vpop.f32.mrf.mxu3  ;;  %v3977_v37 = vmax.f32 %v3920_v5, %v3936_v59 }
 0x59a   : > { %v3684_v60 = vpop.f32.mrf.mxu1 }
 0x59b   : > { %v3798_v36 = vadd.f32 %v3797_v49, %v3684_v60  ;;  %v4516_v52 = vpop.permute.xlu2 %4515  ;;  %v5643_v49 = vld [vmem:[%s7906_s4] ss:$0 sm:$0xff] }
 0x59d   : > { %v3871_v47 = vadd.f32 %v3839_v6, %v3798_v36 }
 0x59f   : > { %4096 = vrot.lane.b32.xlu0 %v4461_v58, %s5710_s29  ;;  %3903 = vst.msk [vmem:[#allocation4 + $0xd8] sm:$0xff] %vm2476_vm3, %v3871_v47 }
 0x5a0   : > { %4316 = vrot.lane.b32.xlu2 %v4469_v63, %s5709_s25  ;;  %4128 = vrot.lane.b32.xlu1 %v4469_v63, %s5709_s25  ;;  %v3800_v18 = vpop.f32.mrf.mxu3 }
 0x5a2   : > { %v3687_v40 = vpop.f32.mrf.mxu1 }
 0x5a3   : > { %v3801_v32 = vadd.f32 %v3800_v18, %v3687_v40 }
 0x5a5   : > { %v3872_v10 = vadd.f32 %v3840_v24, %v3801_v32  ;;  %v4464_v24 = vld [vmem:[#allocation5 + $0xe0] sm:$0xff] }
 0x5a6   : > { %v3952_v41 = vld [vmem:[#allocation4 + $0xd0] ss:$2 sm:$0xff]  ;;  %v3968_v44 = vld [vmem:[#allocation4 + $0xd1] ss:$2 sm:$0xff] }
 0x5a7   : > { %3904 = vst.msk [vmem:[#allocation4 + $0xe0] sm:$0xff] %vm2476_vm3, %v3872_v10  ;;  %v3985_v62 = vmax.f32 %v3952_v41, %v3968_v44  ;;  %v4472_v10 = vld [vmem:[#allocation5 + $0xe1] sm:$0xff] }
 0x5a8   : > { %v3803_v21 = vpop.f32.mrf.mxu3  ;;  %v4452_v44 = vld [vmem:[#allocation5 + $0x7f] sm:$0xff] }
 0x5a9   : > { %v3993_v16 = vmax.f32 %v3977_v37, %v3985_v62 }
 0x5aa   : > { %v4484_v42 = vpop.permute.xlu1 %4483  ;;  %v3690_v56 = vpop.f32.mrf.mxu1 }
 0x5ab   : > { %v4123_v50 = vpop.permute.xlu0 %4122  ;;  %v4538_v4 = vsel %vm2476_vm3, %v4055_v57, %v4484_v42  ;;  %v3804_v17 = vadd.f32 %v3803_v21, %v3690_v56  ;;  %v4005_v13 = vadd.f32 %v7439_v15, %v3993_v16 }
 0x5ac   : > { %v4151_v61 = vsel %vm1247_vm1, %v4143_v34, %v4123_v50  ;;  %v4546_v55 = vsel %vm1247_vm1, %v4538_v4, %v4516_v52 }
 0x5ad   : > { %5364 = vmatmul.msk.f32.gmra.mxu2 %vm4168_vm5, %v4151_v61  ;;  %5402 = vmatmul.msk.f32.gmra.mxu3 %vm4168_vm5, %v4546_v55  ;;  %v3873_v38 = vadd.f32 %v3841_v27, %v3804_v17  ;;  %v4013_v22 = vmax.f32 %v4005_v13, 0.0 }
 0x5af   : > { %3905 = vst.msk [vmem:[#allocation4 + $0xe8] sm:$0xff] %vm2476_vm3, %v3873_v38  ;;  %v4453_v38 = vld [vmem:[#allocation5 + $0x97] sm:$0xff] }
 0x5b0   : > { %v3806_v29 = vpop.f32.mrf.mxu3  ;;  %4050 = vst.msk [vmem:[#allocation5 + $0xb0] sm:$0xff] %vm2476_vm3, %v4013_v22 }
 0x5b2   : > { %v4311_v31 = vpop.permute.xlu1 %4310  ;;  %v3693_v33 = vpop.f32.mrf.mxu1 }
 0x5b3   : > { %v4279_v12 = vpop.permute.xlu0 %4278  ;;  %v3807_v11 = vadd.f32 %v3806_v29, %v3693_v33  ;;  %v4486_v39 = vpop.permute.xlu2 %4485 }
 0x5b4   : > { %v4332_v54 = vsel %vm2476_vm3, %v4055_v57, %v4279_v12  ;;  %v4539_v8 = vsel %vm2476_vm3, %v4451_v19, %v4486_v39 }
 0x5b5   : > { %v4340_v9 = vsel %vm1247_vm1, %v4332_v54, %v4311_v31  ;;  %v3874_v15 = vadd.f32 %v3842_v35, %v3807_v11 }
 0x5b6   : > { %5383 = vmatmul.msk.f32.gmra.mxu1 %vm4168_vm5, %v4340_v9  ;;  %v3922_v43 = vld [vmem:[#allocation4 + $0xe0] ss:$2 sm:$0xff]  ;;  %v3938_v14 = vld [vmem:[#allocation4 + $0xe1] ss:$2 sm:$0xff] }
 0x5b7   : > { %3906 = vst.msk [vmem:[#allocation4 + $0xf0] sm:$0xff] %vm2476_vm3, %v3874_v15  ;;  %v4470_v3 = vld [vmem:[#allocation5 + $0xb1] sm:$0xff]  ;;  %v3978_v26 = vmax.f32 %v3922_v43, %v3938_v14 }
 0x5b8   : > { %v4462_v28 = vld [vmem:[#allocation5 + $0xb0] sm:$0xff]  ;;  %4523 = vrot.lane.b32.xlu0 %v4470_v3, %s5709_s25  ;;  %v3809_v46 = vpop.f32.mrf.mxu3 }
 0x5b9   : > { %4491 = vrot.lane.b32.xlu2 %v4462_v28, %s5710_s29  ;;  %4098 = vrot.lane.b32.xlu1 %v4462_v28, %s5710_s29  ;;  %v4454_v14 = vld [vmem:[#allocation5 + $0xaf] sm:$0xff] }
 0x5ba   : > { %v3696_v1 = vpop.f32.mrf.mxu1 }
 0x5bb   : > { %v3810_v2 = vadd.f32 %v3809_v46, %v3696_v1  ;;  %v4313_v63 = vpop.permute.xlu2 %4312 }
 0x5bd   : > { %v3875_v51 = vadd.f32 %v3843_v30, %v3810_v2 }
 0x5bf   : > { %3907 = vst.msk [vmem:[#allocation4 + $0xf8] sm:$0xff] %vm2476_vm3, %v3875_v51 }
 0x5c0   : > { %4286 = vrot.lane.b32.xlu0 %v4462_v28, %s5710_s29 }
 0x5c1   : > { %4130 = vrot.lane.b32.xlu2 %v4470_v3, %s5709_s25  ;;  %4318 = vrot.lane.b32.xlu1 %v4470_v3, %s5709_s25 }
 0x5c6   : > { %v3954_v0 = vld [vmem:[#allocation4 + $0xf0] ss:$2 sm:$0xff]  ;;  %v3970_v48 = vld [vmem:[#allocation4 + $0xf1] ss:$2 sm:$0xff] }
 0x5c7   : > { %v3986_v25 = vmax.f32 %v3954_v0, %v3970_v48  ;;  %v4210_v36 = vpop.f32.mrf.mxu2 }
 0x5c8   : > { %4234 = vst.msk [vmem:[#allocation6] sm:$0xff] %vm461_vm0, %v4210_v36 }
 0x5c9   : > { %v3994_v7 = vmax.f32 %v3978_v26, %v3986_v25 }
 0x5ca   : > { %v4518_v20 = vpop.permute.xlu0 %4517 }
 0x5cb   : > { %v4547_v45 = vsel %vm1247_vm1, %v4539_v8, %v4518_v20  ;;  %v4281_v23 = vpop.permute.xlu1 %4280  ;;  %v4006_v60 = vadd.f32 %v5643_v49, %v3994_v7 }
 0x5cc   : > { %v4333_v58 = vsel %vm2476_vm3, %v4451_v19, %v4281_v23  ;;  %5403 = vmatmul.msk.f32.gmra.mxu3 %vm4168_vm5, %v4547_v45 }
 0x5cd   : > { %v4341_v6 = vsel %vm1247_vm1, %v4333_v58, %v4313_v63  ;;  %v4014_v47 = vmax.f32 %v4006_v60, 0.0 }
 0x5ce   : > { %5384 = vmatmul.msk.f32.gmra.mxu1 %vm4168_vm5, %v4341_v6 }
 0x5cf   : > { %4051 = vst.msk [vmem:[#allocation5 + $0xc8] sm:$0xff] %vm2476_vm3, %v4014_v47  ;;  %v4424_v16 = vld [vmem:[#allocation6] sm:$0xff] }
 0x5d2   : > { %v4093_v18 = vpop.permute.xlu0 %4092 }
 0x5d3   : > { %v4125_v53 = vpop.permute.xlu1 %4124  ;;  %v4144_v40 = vsel %vm2476_vm3, %v4451_v19, %v4093_v18  ;;  %v4488_v41 = vpop.permute.xlu2 %4487 }
 0x5d4   : > { %v4152_v32 = vsel %vm1247_vm1, %v4144_v40, %v4125_v53  ;;  %v4540_v21 = vsel %vm2476_vm3, %v4452_v44, %v4488_v41 }
 0x5d5   : > { %5365 = vmatmul.msk.f32.gmra.mxu2 %vm4168_vm5, %v4152_v32 }
 0x5d6   : > { %v4471_v5 = vld [vmem:[#allocation5 + $0xc9] sm:$0xff] }
 0x5d7   : > { %v4463_v59 = vld [vmem:[#allocation5 + $0xc8] sm:$0xff]  ;;  %4525 = vrot.lane.b32.xlu0 %v4471_v5, %s5709_s25 }
 0x5d8   : > { %4493 = vrot.lane.b32.xlu2 %v4463_v59, %s5710_s29  ;;  %4288 = vrot.lane.b32.xlu1 %v4463_v59, %s5710_s29 }
 0x5db   : > { %v4127_v34 = vpop.permute.xlu2 %4126 }
 0x5df   : > { %4495 = vrot.lane.b32.xlu0 %v4464_v24, %s5710_s29 }
 0x5e0   : > { %4320 = vrot.lane.b32.xlu2 %v4471_v5, %s5709_s25  ;;  %4527 = vrot.lane.b32.xlu1 %v4472_v10, %s5709_s25  ;;  %v7759_v10 = vld [vmem:[%s7908_s6] ss:$0 sm:$0xff] }
 0x5ea   : > { %v4520_v37 = vpop.permute.xlu0 %4519 }
 0x5eb   : > { %v4548_v62 = vsel %vm1247_vm1, %v4540_v21, %v4520_v37  ;;  %v4095_v57 = vpop.permute.xlu1 %4094 }
 0x5ec   : > { %v4145_v42 = vsel %vm2476_vm3, %v4452_v44, %v4095_v57  ;;  %5404 = vmatmul.msk.f32.gmra.mxu3 %vm4168_vm5, %v4548_v62  ;;  %v4455_v62 = vld [vmem:[#allocation5 + $0xc7] sm:$0xff] }
 0x5ed   : > { %v4153_v50 = vsel %vm1247_vm1, %v4145_v42, %v4127_v34 }
 0x5ee   : > { %5366 = vmatmul.msk.f32.gmra.mxu2 %vm4168_vm5, %v4153_v50 }
 0x5f0   : > { %v4213_v52 = vpop.f32.mrf.mxu2 }
 0x5f1   : > { %4235 = vst.msk [vmem:[#allocation6 + $0x8] sm:$0xff] %vm461_vm0, %v4213_v52  ;;  %v4400_v4 = vpop.f32.mrf.mxu1 }
 0x5f2   : > { %v4283_v61 = vpop.permute.xlu0 %4282  ;;  %v4432_v56 = vadd.f32 %v4424_v16, %v4400_v4  ;;  %v4490_v27 = vpop.permute.xlu2 %4489 }
 0x5f3   : > { %v4334_v17 = vsel %vm2476_vm3, %v4452_v44, %v4283_v61  ;;  %v4315_v55 = vpop.permute.xlu1 %4314  ;;  %v4541_v22 = vsel %vm2476_vm3, %v4453_v38, %v4490_v27 }
 0x5f4   : > { %v4342_v13 = vsel %vm1247_vm1, %v4334_v17, %v4315_v55  ;;  %4440 = vst.msk [vmem:[#allocation6] sm:$0xff] %vm461_vm0, %v4432_v56 }
 0x5f5   : > { %5385 = vmatmul.msk.f32.gmra.mxu1 %vm4168_vm5, %v4342_v13 }
 0x5f8   : > { %v4425_v30 = vld [vmem:[#allocation6 + $0x8] sm:$0xff] }
 0x5fa   : > { %v4317_v54 = vpop.permute.xlu2 %4316 }
 0x5fb   : > { %v4631_v15 = vld [vmem:[#allocation6] sm:$0xff] }
 0x609   : > { %v4522_v29 = vpop.permute.xlu0 %4521 }
 0x60a   : > { %v4549_v31 = vsel %vm1247_vm1, %v4541_v22, %v4522_v29  ;;  %v4285_v12 = vpop.permute.xlu1 %4284  ;;  %v4456_v22 = vld [vmem:[#allocation5 + $0xdf] sm:$0xff] }
 0x60b   : > { %v4335_v33 = vsel %vm2476_vm3, %v4453_v38, %v4285_v12  ;;  %5405 = vmatmul.msk.f32.gmra.mxu3 %vm4168_vm5, %v4549_v31 }
 0x60c   : > { %v4343_v11 = vsel %vm1247_vm1, %v4335_v33, %v4317_v54 }
 0x60d   : > { %5386 = vmatmul.msk.f32.gmra.mxu1 %vm4168_vm5, %v4343_v11 }
 0x610   : > { %v4216_v9 = vpop.f32.mrf.mxu2  ;;  %v4607_v35 = vpop.f32.mrf.mxu3 }
 0x611   : > { %4236 = vst.msk [vmem:[#allocation6 + $0x10] sm:$0xff] %vm461_vm0, %v4216_v9  ;;  %v4639_v3 = vadd.f32 %v4631_v15, %v4607_v35  ;;  %v4097_v28 = vpop.permute.xlu0 %4096 }
 0x612   : > { %v4129_v46 = vpop.permute.xlu1 %4128  ;;  %v4146_v1 = vsel %vm2476_vm3, %v4453_v38, %v4097_v28 }
 0x613   : > { %v4403_v2 = vpop.f32.mrf.mxu1  ;;  %4647 = vst.msk [vmem:[#allocation6] sm:$0xff] %vm461_vm0, %v4639_v3  ;;  %v4154_v39 = vsel %vm1247_vm1, %v4146_v1, %v4129_v46  ;;  %v4492_v43 = vpop.permute.xlu2 %4491 }
 0x614   : > { %v4433_v51 = vadd.f32 %v4425_v30, %v4403_v2  ;;  %5367 = vmatmul.msk.f32.gmra.mxu2 %vm4168_vm5, %v4154_v39  ;;  %v4542_v0 = vsel %vm2476_vm3, %v4454_v14, %v4492_v43 }
 0x616   : > { %4441 = vst.msk [vmem:[#allocation6 + $0x8] sm:$0xff] %vm461_vm0, %v4433_v51 }
 0x618   : > { %v4426_v49 = vld [vmem:[#allocation6 + $0x10] sm:$0xff] }
 0x61a   : > { %v4655_v53 = vld [vmem:[#allocation6] ss:$2 sm:$0xf]  ;;  %v4663_v40 = vld [vmem:[#allocation6 + $0x1] ss:$2 sm:$0xf] }
 0x61b   : > { %v4131_v19 = vpop.permute.xlu2 %4130  ;;  %v4686_v59 = vmax.f32 %v4655_v53, %v4663_v40 }
 0x61d   : > { %v4632_v23 = vld [vmem:[#allocation6 + $0x8] sm:$0xff] }
 0x62a   : > { %v4524_v48 = vpop.permute.xlu0 %4523 }
 0x62b   : > { %v4550_v26 = vsel %vm1247_vm1, %v4542_v0, %v4524_v48  ;;  %v4099_v25 = vpop.permute.xlu1 %4098 }
 0x62c   : > { %v4147_v8 = vsel %vm2476_vm3, %v4454_v14, %v4099_v25  ;;  %5406 = vmatmul.msk.f32.gmra.mxu3 %vm4168_vm5, %v4550_v26 }
 0x62d   : > { %v4155_v20 = vsel %vm1247_vm1, %v4147_v8, %v4131_v19 }
 0x62e   : > { %5368 = vmatmul.msk.f32.gmra.mxu2 %vm4168_vm5, %v4155_v20 }
 0x630   : > { %v4219_v7 = vpop.f32.mrf.mxu2  ;;  %v4610_v45 = vpop.f32.mrf.mxu3 }
 0x631   : > { %4237 = vst.msk [vmem:[#allocation6 + $0x18] sm:$0xff] %vm461_vm0, %v4219_v7  ;;  %v4640_v63 = vadd.f32 %v4632_v23, %v4610_v45 }
 0x632   : > { %v4287_v60 = vpop.permute.xlu0 %4286  ;;  %v4494_v37 = vpop.permute.xlu2 %4493 }
 0x633   : > { %v4406_v58 = vpop.f32.mrf.mxu1  ;;  %4648 = vst.msk [vmem:[#allocation6 + $0x8] sm:$0xff] %vm461_vm0, %v4640_v63  ;;  %v4336_v6 = vsel %vm2476_vm3, %v4454_v14, %v4287_v60  ;;  %v4319_v47 = vpop.permute.xlu1 %4318  ;;  %v4543_v34 = vsel %vm2476_vm3, %v4455_v62, %v4494_v37 }
 0x634   : > { %v4434_v36 = vadd.f32 %v4426_v49, %v4406_v58  ;;  %v4344_v18 = vsel %vm1247_vm1, %v4336_v6, %v4319_v47 }
 0x635   : > { %5387 = vmatmul.msk.f32.gmra.mxu1 %vm4168_vm5, %v4344_v18 }
 0x636   : > { %4442 = vst.msk [vmem:[#allocation6 + $0x10] sm:$0xff] %vm461_vm0, %v4434_v36 }
 0x638   : > { %v4427_v16 = vld [vmem:[#allocation6 + $0x18] sm:$0xff] }
 0x63a   : > { %v4671_v32 = vld [vmem:[#allocation6 + $0x8] ss:$2 sm:$0xf]  ;;  %v4679_v5 = vld [vmem:[#allocation6 + $0x9] ss:$2 sm:$0xf]  ;;  %v4321_v61 = vpop.permute.xlu2 %4320 }
 0x63b   : > { %v4690_v24 = vmax.f32 %v4671_v32, %v4679_v5 }
 0x63d   : > { %v4694_v41 = vmax.f32 %v4686_v59, %v4690_v24  ;;  %v4633_v27 = vld [vmem:[#allocation6 + $0x10] sm:$0xff] }
 0x63f   : > { %v4702_v44 = vadd.f32 %v7759_v10, %v4694_v41 }
 0x641   : > { %v4706_v21 = vmax.f32 %v4702_v44, 0.0 }
 0x643   : > { %4711 = vst.msk [vmem:[#allocation7] sm:$0xf] %vm4710_vm6, %v4706_v21 }
 0x649   : > { %v4526_v42 = vpop.permute.xlu0 %4525 }
 0x64a   : > { %v4715_v57 = vld [vmem:[#allocation7] sm:$0x3]  ;;  %v4551_v52 = vsel %vm1247_vm1, %v4543_v34, %v4526_v42  ;;  %v4289_v4 = vpop.permute.xlu1 %4288  ;;  %v4719_v36 = vld [vmem:[#allocation7 + $0x2] sm:$0x3] }
 0x64b   : > { %4723 = vst [vmem:[#allocation1] ss:$4 sm:$0xff] %v4715_v57  ;;  %v4409_v50 = vpop.f32.mrf.mxu1  ;;  %v4337_v17 = vsel %vm2476_vm3, %v4455_v62, %v4289_v4  ;;  %5407 = vmatmul.msk.f32.gmra.mxu3 %vm4168_vm5, %v4551_v52  ;;  %v4717_v58 = vld [vmem:[#allocation7 + $0x1] sm:$0x3] }
 0x64c   : > { %v4435_v56 = vadd.f32 %v4427_v16, %v4409_v50  ;;  %v4345_v55 = vsel %vm1247_vm1, %v4337_v17, %v4321_v61 }
 0x64d   : > { %5388 = vmatmul.msk.f32.gmra.mxu1 %vm4168_vm5, %v4345_v55 }
 0x64e   : > { %4443 = vst.msk [vmem:[#allocation6 + $0x18] sm:$0xff] %vm461_vm0, %v4435_v56 }
 0x64f   : > { %v4613_v13 = vpop.f32.mrf.mxu3 }
 0x650   : > { %v4641_v38 = vadd.f32 %v4633_v27, %v4613_v13 }
 0x651   : > { %v4496_v29 = vpop.permute.xlu0 %4495 }
 0x652   : > { %4649 = vst.msk [vmem:[#allocation6 + $0x10] sm:$0xff] %vm461_vm0, %v4641_v38  ;;  %v4544_v31 = vsel %vm2476_vm3, %v4456_v22, %v4496_v29  ;;  %v4528_v12 = vpop.permute.xlu1 %4527 }
 0x653   : > { %v4552_v54 = vsel %vm1247_vm1, %v4544_v31, %v4528_v12 }
 0x654   : > { %5408 = vmatmul.msk.f32.gmra.mxu3 %vm4168_vm5, %v4552_v54 }
 0x655   : > { %v4634_v9 = vld [vmem:[#allocation6 + $0x18] sm:$0xff] }
 0x658   : > { %v4222_v33 = vpop.f32.mrf.mxu2 }
 0x659   : > { %4238 = vst.msk [vmem:[#allocation6 + $0x20] sm:$0xff] %vm461_vm0, %v4222_v33  ;;  %v4657_v1 = vld [vmem:[#allocation6 + $0x10] ss:$2 sm:$0xf] }
 0x65a   : > { %v4665_v2 = vld [vmem:[#allocation6 + $0x11] ss:$2 sm:$0xf] }
 0x65b   : > { %v4687_v39 = vmax.f32 %v4657_v1, %v4665_v2 }
 0x660   : > { %v4428_v28 = vld [vmem:[#allocation6 + $0x20] sm:$0xff] }
 0x66f   : > { %v4616_v11 = vpop.f32.mrf.mxu3 }
 0x670   : > { %v4642_v35 = vadd.f32 %v4634_v9, %v4616_v11 }
 0x671   : > { %v4225_v15 = vpop.f32.mrf.mxu2 }
 0x672   : > { %4650 = vst.msk [vmem:[#allocation6 + $0x18] sm:$0xff] %vm461_vm0, %v4642_v35  ;;  %v4412_v3 = vpop.f32.mrf.mxu1 }
 0x673   : > { %4239 = vst.msk [vmem:[#allocation6 + $0x28] sm:$0xff] %vm461_vm0, %v4225_v15  ;;  %v4436_v46 = vadd.f32 %v4428_v28, %v4412_v3 }
 0x675   : > { %4444 = vst.msk [vmem:[#allocation6 + $0x20] sm:$0xff] %vm461_vm0, %v4436_v46 }
 0x679   : > { %v4673_v30 = vld [vmem:[#allocation6 + $0x18] ss:$2 sm:$0xf]  ;;  %v4681_v51 = vld [vmem:[#allocation6 + $0x19] ss:$2 sm:$0xf] }
 0x67a   : > { %v4691_v43 = vmax.f32 %v4673_v30, %v4681_v51  ;;  %v4429_v19 = vld [vmem:[#allocation6 + $0x28] sm:$0xff] }
 0x67c   : > { %v4695_v14 = vmax.f32 %v4687_v39, %v4691_v43  ;;  %v4635_v7 = vld [vmem:[#allocation6 + $0x20] sm:$0xff] }
 0x67d   : > { %v5414_v43 = vld [vmem:[%s7909_s7 + $0x58] sm:$0xff] }
 0x67e   : > { %v4703_v0 = vadd.f32 %v7759_v10, %v4695_v14  ;;  %4809 = vmatpush.msra.mxu2 %v5414_v43 }
 0x680   : > { %v4707_v48 = vmax.f32 %v4703_v0, 0.0 }
 0x682   : > { %4712 = vst.msk [vmem:[#allocation7 + $0x4] sm:$0xf] %vm4710_vm6, %v4707_v48 }
 0x689   : > { %v4716_v26 = vld [vmem:[#allocation7 + $0x4] sm:$0x3]  ;;  %v4720_v6 = vld [vmem:[#allocation7 + $0x6] sm:$0x3] }
 0x68a   : > { %4725 = vst [vmem:[#allocation1 + $0x1] ss:$4 sm:$0xff] %v4716_v26  ;;  %v4415_v25 = vpop.f32.mrf.mxu1  ;;  %v4718_v23 = vld [vmem:[#allocation7 + $0x5] sm:$0x3] }
 0x68b   : > { %v4437_v8 = vadd.f32 %v4429_v19, %v4415_v25  ;;  %v4755_v18 = vld [vmem:[#allocation7 + $0x4] sm:$0x3]  ;;  %v4759_v54 = vld [vmem:[#allocation7 + $0x6] sm:$0x3] }
 0x68c   : > { %v4757_v27 = vld [vmem:[#allocation7 + $0x5] sm:$0x3] }
 0x68d   : > { %4445 = vst.msk [vmem:[#allocation6 + $0x28] sm:$0xff] %vm461_vm0, %v4437_v8 }
 0x68e   : > { %v4619_v20 = vpop.f32.mrf.mxu3 }
 0x68f   : > { %v4643_v45 = vadd.f32 %v4635_v7, %v4619_v20  ;;  %v5413_v20 = vld [vmem:[%s7909_s7 + $0x50] sm:$0xff]  ;;  %v5422_v7 = vld [vmem:[%s7909_s7 + $0x88] sm:$0xff] }
 0x690   : > { %4810 = vmatpush.msra.mxu2 %v5413_v20  ;;  %4896 = vmatpush.msra.mxu1 %v5422_v7 }
 0x691   : > { %v7781_v63 = vld.sshfl [vmem:[#allocation1] sm:$0xff pattern:$0x73625140]  ;;  %4651 = vst.msk [vmem:[#allocation6 + $0x20] sm:$0xff] %vm461_vm0, %v4643_v45  ;;  %v5412_v45 = vld [vmem:[%s7909_s7 + $0x48] sm:$0xff] }
 0x692   : > { %4732 = vst [vmem:[#allocation1 + $0x1] ss:$4 sm:$0xff] %v4718_v23  ;;  %v5421_v23 = vld [vmem:[%s7909_s7 + $0x80] sm:$0xff]  ;;  %4811 = vmatpush.msra.mxu2 %v5412_v45 }
 0x693   : > { %4730 = vst [vmem:[#allocation1] ss:$4 sm:$0xff] %v4717_v58  ;;  %v5411_v58 = vld [vmem:[%s7909_s7 + $0x40] sm:$0xff]  ;;  %4897 = vmatpush.msra.mxu1 %v5421_v23 }
 0x694   : > { %v4636_v40 = vld [vmem:[#allocation6 + $0x28] sm:$0xff]  ;;  %4812 = vmatpush.msra.mxu2 %v5411_v58 }
 0x697   : > { %v4228_v49 = vpop.f32.mrf.mxu2 }
 0x698   : > { %4240 = vst.msk [vmem:[#allocation6 + $0x30] sm:$0xff] %vm461_vm0, %v4228_v49  ;;  %v4659_v44 = vld [vmem:[#allocation6 + $0x20] ss:$2 sm:$0xf] }
 0x699   : > { %v4667_v21 = vld [vmem:[#allocation6 + $0x21] ss:$2 sm:$0xf] }
 0x69a   : > { %v4733_v60 = vld.sshfl [vmem:[#allocation1] sm:$0xff pattern:$0x73625140]  ;;  %v4688_v57 = vmax.f32 %v4659_v44, %v4667_v21  ;;  %v5410_v49 = vld [vmem:[%s7909_s7 + $0x38] sm:$0xff] }
 0x69b   : > { %4734 = vrot.lane.b32.xlu1 %v4733_v60, %s5711_s14  ;;  %4739 = vst [vmem:[#allocation1] ss:$4 sm:$0xff] %v4719_v36  ;;  %v5409_v60 = vld [vmem:[%s7909_s7 + $0x30] sm:$0xff]  ;;  %4813 = vmatpush.msra.mxu2 %v5410_v49  ;;  %v4753_v36 = vld [vmem:[%s7909_s7 + $0x28] sm:$0xff] }
 0x69c   : > { %4741 = vst [vmem:[#allocation1 + $0x1] ss:$4 sm:$0xff] %v4720_v6  ;;  %v4752_v6 = vld [vmem:[%s7909_s7 + $0x20] sm:$0xff] }
 0x69d   : > { %4814 = vmatpush.msra.mxu2 %v5409_v60 }
 0x69f   : > { %v4430_v24 = vld [vmem:[#allocation6 + $0x30] sm:$0xff]  ;;  %4832 = vmatpush.msrb.mxu2 %v4753_v36 }
 0x6a1   : > { %4833 = vmatpush.msrb.mxu2 %v4752_v6 }
 0x6a3   : > { %v4742_v47 = vld.sshfl [vmem:[#allocation1] sm:$0xff pattern:$0x73625140] }
 0x6a4   : > { %4763 = vst [vmem:[#allocation1] ss:$4 sm:$0xff] %v4755_v18  ;;  %v4751_v18 = vld [vmem:[%s7909_s7 + $0x18] sm:$0xff] }
 0x6a5   : > { %4834 = vmatpush.msrb.mxu2 %v4751_v18 }
 0x6af   : > { %v4622_v53 = vpop.f32.mrf.mxu3 }
 0x6b0   : > { %v4644_v32 = vadd.f32 %v4636_v40, %v4622_v53  ;;  %v4750_v53 = vld [vmem:[%s7909_s7 + $0x10] sm:$0xff]  ;;  %v4749_v40 = vld [vmem:[%s7909_s7 + $0x8] sm:$0xff] }
 0x6b1   : > { %v4231_v5 = vpop.f32.mrf.mxu2  ;;  %4835 = vmatpush.msrb.mxu2 %v4750_v53 }
 0x6b2   : > { %4652 = vst.msk [vmem:[#allocation6 + $0x28] sm:$0xff] %vm461_vm0, %v4644_v32  ;;  %v4418_v59 = vpop.f32.mrf.mxu1  ;;  %v4748_v32 = vld [vmem:[%s7909_s7] sm:$0xff] }
 0x6b3   : > { %4241 = vst.msk [vmem:[#allocation6 + $0x38] sm:$0xff] %vm461_vm0, %v4231_v5  ;;  %v4438_v41 = vadd.f32 %v4430_v24, %v4418_v59  ;;  %4836 = vmatpush.msrb.mxu2 %v4749_v40  ;;  %v5419_v5 = vld [vmem:[%s7909_s7 + $0x70] sm:$0xff]  ;;  %v5418_v59 = vld [vmem:[%s7909_s7 + $0x68] sm:$0xff]  ;;  %v5417_v24 = vld [vmem:[%s7909_s7 + $0x60] sm:$0xff] }
 0x6b5   : > { %4446 = vst.msk [vmem:[#allocation6 + $0x30] sm:$0xff] %vm461_vm0, %v4438_v41  ;;  %4837 = vmatpush.msrb.mxu2 %v4748_v32 }
 0x6b9   : > { %v4675_v37 = vld [vmem:[#allocation6 + $0x28] ss:$2 sm:$0xf]  ;;  %v4683_v62 = vld [vmem:[#allocation6 + $0x29] ss:$2 sm:$0xf] }
 0x6ba   : > { %v4692_v34 = vmax.f32 %v4675_v37, %v4683_v62  ;;  %v4431_v61 = vld [vmem:[#allocation6 + $0x38] sm:$0xff] }
 0x6bc   : > { %v4696_v42 = vmax.f32 %v4688_v57, %v4692_v34  ;;  %v4637_v55 = vld [vmem:[#allocation6 + $0x30] sm:$0xff] }
 0x6be   : > { %v4704_v50 = vadd.f32 %v7759_v10, %v4696_v42 }
 0x6c0   : > { %v4708_v16 = vmax.f32 %v4704_v50, 0.0 }
 0x6c2   : > { %4713 = vst.msk [vmem:[#allocation7 + $0x8] sm:$0xf] %vm4710_vm6, %v4708_v16 }
 0x6c9   : > { %v4756_v52 = vld [vmem:[#allocation7 + $0x8] sm:$0x3]  ;;  %v4760_v11 = vld [vmem:[#allocation7 + $0xa] sm:$0x3] }
 0x6ca   : > { %v4421_v4 = vpop.f32.mrf.mxu1  ;;  %4765 = vst [vmem:[#allocation1 + $0x1] ss:$4 sm:$0xff] %v4756_v52  ;;  %v4758_v22 = vld [vmem:[#allocation7 + $0x9] sm:$0x3] }
 0x6cb   : > { %v4439_v56 = vadd.f32 %v4431_v61, %v4421_v4  ;;  %v4843_v2 = vld [vmem:[#allocation7 + $0x8] sm:$0x3]  ;;  %v4847_v25 = vld [vmem:[#allocation7 + $0xa] sm:$0x3] }
 0x6cc   : > { %v4845_v0 = vld [vmem:[#allocation7 + $0x9] sm:$0x3] }
 0x6cd   : > { %4447 = vst.msk [vmem:[#allocation6 + $0x38] sm:$0xff] %vm461_vm0, %v4439_v56 }
 0x6ce   : > { %v4625_v17 = vpop.f32.mrf.mxu3 }
 0x6cf   : > { %v4645_v13 = vadd.f32 %v4637_v55, %v4625_v17 }
 0x6d1   : > { %4653 = vst.msk [vmem:[#allocation6 + $0x30] sm:$0xff] %vm461_vm0, %v4645_v13  ;;  %v7793_v38 = vld.sshfl [vmem:[#allocation1] sm:$0xff pattern:$0x73625140] }
 0x6d2   : > { %4770 = vst [vmem:[#allocation1] ss:$4 sm:$0xff] %v4757_v27 }
 0x6d3   : > { %4772 = vst [vmem:[#allocation1 + $0x1] ss:$4 sm:$0xff] %v4758_v22 }
 0x6d4   : > { %v4638_v31 = vld [vmem:[#allocation6 + $0x38] sm:$0xff] }
 0x6d7   : > { %v4628_v29 = vpop.f32.mrf.mxu3 }
 0x6d8   : > { %v4646_v12 = vadd.f32 %v4638_v31, %v4628_v29  ;;  %v4661_v9 = vld [vmem:[#allocation6 + $0x30] ss:$2 sm:$0xf]  ;;  %v4669_v35 = vld [vmem:[#allocation6 + $0x31] ss:$2 sm:$0xf] }
 0x6d9   : > { %v4689_v28 = vmax.f32 %v4661_v9, %v4669_v35 }
 0x6da   : > { %4654 = vst.msk [vmem:[#allocation6 + $0x38] sm:$0xff] %vm461_vm0, %v4646_v12  ;;  %v4773_v33 = vld.sshfl [vmem:[#allocation1] sm:$0xff pattern:$0x73625140] }
 0x6db   : > { %4779 = vst [vmem:[#allocation1] ss:$4 sm:$0xff] %v4759_v54  ;;  %4774 = vrot.lane.b32.xlu2 %v4773_v33, %s5711_s14 }
 0x6dc   : > { %4781 = vst [vmem:[#allocation1 + $0x1] ss:$4 sm:$0xff] %v4760_v11 }
 0x6e1   : > { %v4677_v15 = vld [vmem:[#allocation6 + $0x38] ss:$2 sm:$0xf]  ;;  %v4685_v3 = vld [vmem:[#allocation6 + $0x39] ss:$2 sm:$0xf] }
 0x6e2   : > { %v4693_v46 = vmax.f32 %v4677_v15, %v4685_v3 }
 0x6e3   : > { %v4782_v1 = vld.sshfl [vmem:[#allocation1] sm:$0xff pattern:$0x73625140]  ;;  %4743 = vrot.lane.b32.xlu2 %v4742_v47, %s5710_s29  ;;  %v5420_v47 = vld [vmem:[%s7909_s7 + $0x78] sm:$0xff] }
 0x6e4   : > { %v4697_v30 = vmax.f32 %v4689_v28, %v4693_v46  ;;  %4851 = vst [vmem:[#allocation1] ss:$4 sm:$0xff] %v4843_v2  ;;  %4783 = vrot.lane.b32.xlu0 %v4782_v1, %s5710_s29  ;;  %4898 = vmatpush.msra.mxu1 %v5420_v47 }
 0x6e6   : > { %v4705_v51 = vadd.f32 %v7759_v10, %v4697_v30  ;;  %4899 = vmatpush.msra.mxu1 %v5419_v5 }
 0x6e8   : > { %v4709_v39 = vmax.f32 %v4705_v51, 0.0  ;;  %4900 = vmatpush.msra.mxu1 %v5418_v59 }
 0x6ea   : > { %4714 = vst.msk [vmem:[#allocation7 + $0xc] sm:$0xf] %vm4710_vm6, %v4709_v39  ;;  %4901 = vmatpush.msra.mxu1 %v5417_v24 }
 0x6f1   : > { %v4844_v14 = vld [vmem:[#allocation7 + $0xc] sm:$0x3]  ;;  %v4848_v8 = vld [vmem:[#allocation7 + $0xe] sm:$0x3] }
 0x6f2   : > { %4853 = vst [vmem:[#allocation1 + $0x1] ss:$4 sm:$0xff] %v4844_v14  ;;  %v4846_v26 = vld [vmem:[#allocation7 + $0xd] sm:$0x3] }
 0x6f9   : > { %v4854_v48 = vld.sshfl [vmem:[#allocation1] sm:$0xff pattern:$0x73625140] }
 0x6fa   : > { %4858 = vst [vmem:[#allocation1] ss:$4 sm:$0xff] %v4845_v0 }
 0x6fb   : > { %4860 = vst [vmem:[#allocation1 + $0x1] ss:$4 sm:$0xff] %v4846_v26 }
 0x702   : > { %v4861_v19 = vld.sshfl [vmem:[#allocation1] sm:$0xff pattern:$0x73625140] }
 0x703   : > { %4862 = vrot.lane.b32.xlu0 %v4861_v19, %s5711_s14  ;;  %4867 = vst [vmem:[#allocation1] ss:$4 sm:$0xff] %v4847_v25  ;;  %s4931_s14 = scalar_lea.hbm %s7911_s9, %s5430_s24 }
 0x704   : > { %4869 = vst [vmem:[#allocation1 + $0x1] ss:$4 sm:$0xff] %v4848_v8  ;;  %s4934_s21 = sshll.u32 %s4931_s14, 4  ;;  %s4935_s21 = int_to_ptr.hbm [resolvable:$true] %s4934_s21 }
 0x705   : > { %s5658_s26 = sshra.s32 %s4935_s21, 4  ;;  %s5659_s26 = int_to_ptr.hbm [resolvable:$true] %s5658_s26 }
 0x706   : > { %s5660_s27 = scalar_lea.hbm %s5659_s26, 4  ;;  %p5665_p0 = scmp.lt.s32.totalorder %s5659_s26, %s7911_s9 }
 0x707   : > { %p5661_p11 = scmp.ne.s32.totalorder %s5659_s26, %s5660_s27  ;;  %p5666_p1 = scmp.lt.s32.totalorder %s5664_s23, %s5660_s27 }
 0x709   : > { %p5662_p12 = pnand %p5661_p11, %p5801_p5  ;;  %p5667_p2 = por %p5666_p1, %p5665_p0 }
 0x70b   : > { %v4870_v10 = vld.sshfl [vmem:[#allocation1] sm:$0xff pattern:$0x73625140]  ;;  %p5663_p13 = pneg %p5662_p12 }
 0x70c   : > { %4871 = vrot.lane.b32.xlu1 %v4870_v10, %s5710_s29 }
 0x70d   : > { %v4735_v62 = vpop.permute.xlu1 %4734  ;;  %p5668_p3 = pnand %p5667_p2, %p5663_p13 }
 0x70e   : > { %v4746_v34 = vsel %vm461_vm0, %v7781_v63, %v4735_v62  ;;  %v5639_v63 = vld [vmem:[%s7910_s8] ss:$0 sm:$0xff] }
 0x735   : > { %v4775_v41 = vpop.permute.xlu2 %4774 }
 0x736   : > { %v4786_v44 = vsel %vm461_vm0, %v7793_v38, %v4775_v41 }
 0x73d   : > { %v4744_v57 = vpop.permute.xlu2 %4743 }
 0x73e   : > { %v4747_v42 = vsel %vm2476_vm3, %v4746_v34, %v4744_v57 }
 0x756   : > { %v4784_v21 = vpop.permute.xlu0 %4783 }
 0x757   : > { %v4787_v37 = vsel %vm2476_vm3, %v4786_v44, %v4784_v21 }
 0x758   : > { %5415 = vmatmul.msk.f32.vlgmr.msra.gmra.mxu2 %vm4795_vm7, %v4787_v37 }
 0x760   : > { %5416 = vmatmul.msk.f32.vlgmr.msrb.gmra.mxu2 %vm4795_vm7, %v4747_v42 }
 0x775   : > { %v4863_v50 = vpop.permute.xlu0 %4862 }
 0x776   : > { %v4874_v16 = vsel %vm461_vm0, %v4854_v48, %v4863_v50 }
 0x77e   : > { %v4872_v52 = vpop.permute.xlu1 %4871 }
 0x77f   : > { %v4875_v4 = vsel %vm2476_vm3, %v4874_v16, %v4872_v52 }
 0x780   : > { %5423 = vmatmul.msk.f32.vlgmr.msra.gmra.mxu1 %vm4795_vm7, %v4875_v4 }
 0x7db   : > { %v4816_v61 = vpop.f32.mrf.mxu2 }
 0x7e3   : > { %v4839_v56 = vpop.f32.mrf.mxu2 }
 0x7e4   : > { %v4840_v17 = vadd.f32 %v4839_v56, %v4816_v61 }
 0x7fd   : > { %v4903_v55 = vpop.f32.mrf.mxu1 }
 0x7fe   : > { %v4906_v13 = vadd.f32 %v4903_v55, %v4840_v17 }
 0x800   : > { %v4911_v27 = vadd.f32 %v5639_v63, %v4906_v13 }
 0x802   : > { %v4912_v38 = vmax.f32 %v4911_v27, 0.0 }
 0x804   : > { %v4914_v22 = vrot.slane %v4912_v38, 2  ;;  %4917 = vst.msk [vmem:[%s325_s16] sm:$0x3] %vm4916_vm8, %v4912_v38 }
 0x806   : > { %4918 = vst.msk [vmem:[%s325_s16 + $0x2] sm:$0x3] %vm4916_vm8, %v4914_v22 }
 0x807   : > { %5671 = shalt.err (!%p5668_p3)
}
 0x808   : > { %s5712_s22 = smov 2  }
 0x809   : > { %5437 = dma.vmem_to_hbm [thread:$0]  (%p5801_p5), %s4933_s17, 64, %s4935_s21, %s4920_s13, %s5710_s29, %s5710_s29, %s5712_s22  }
 0x80a PF: > { %p5443_p4 = scmp.ge.s32.totalorder %s5706_s12, 2  ;;  %s4949_s16 = sand.u32 1, %s5694_s30  }
 0x80b   : > { %s4950_s26 = scalar_lea.sflag [#allocation9], %s4949_s16 }
 0x80c   : > { %p5440_p7 = pnand %p5443_p4, %p5805_p6 }
 0x80e   : > { %p5441_p8 = pneg %p5440_p7 }
 0x810   : > { %5689 = dma.done.wait (%p5441_p8), %s4950_s26, 64  }
 0x811   : > { %5691 = vsyncadd (%p5441_p8), %s4950_s26, 4294967232  ;;  %p19_p9 = scmp.ge.s32.totalorder %s5788_s15, 4   ;;  %s7926_s30 = smov %s5698_s10 }
 0x812   : > { %s7927_s10 = smov %s5702_s11  ;;  %s7928_s11 = smov %s5799_s18 }
 0x813   : > { %s7929_s12 = smov %s5788_s15  ;;  %21 = sbr.rel (!%p19_p9) target bundleno = 3 (0x3), region = 287 }
 0x818   :  { %4956 = vsyncpa [#allocation9], 1 }
 0x819   :  { %4958 = vsyncpa [#allocation9 + $0x1], 1 }

</bundles_post_ra>
